<compile_context>
chip_gen: v6e
topology: v6e:2x2x1
jax: 0.10.0
libtpu: 0.0.40
codegen_flags: <defaults>
</compile_context>

<pallas_src>
import math
import functools

import jax
import jax.numpy as jnp
from jax.experimental import pallas as pl
from jax.experimental.pallas import tpu as pltpu


# ----------------------------- in-kernel helpers -----------------------------

def _gelu_tanh(x):
    c = math.sqrt(2.0 / math.pi)
    return 0.5 * x * (1.0 + jnp.tanh(c * (x + 0.044715 * x * x * x)))


def _layernorm(x, gamma, beta, eps):
    # Matches the custom torch LayerNorm: UNBIASED std (N-1) and divide by (std + eps).
    # Exact division here (LN error feeds the residual and a second LN); the approx
    # EUP reciprocal is reserved for the softmax denominator.
    n = x.shape[-1]
    mean = jnp.mean(x, axis=-1, keepdims=True)
    diff = x - mean
    var = jnp.sum(diff * diff, axis=-1, keepdims=True) * (1.0 / (n - 1))
    return gamma * (diff / (jnp.sqrt(var) + eps)) + beta


# --------------------------------- kernel ------------------------------------

def transformer_block_kernel(xq_ref, xkv_ref, km_ref,
                             wq_ref, bq_ref, wk_ref, bk_ref, wv_ref, bv_ref,
                             wo_ref, bo_ref,
                             g1_ref, be1_ref,
                             w1_ref, b1_ref, w2_ref, b2_ref,
                             g2_ref, be2_ref,
                             o_ref, kc_ref, vc_ref, *, num_heads, eps):
    f32 = jnp.float32
    bf16 = jnp.bfloat16

    # ---- K/V projection: once per batch (first query tile), cached head-major
    #      in bf16 VMEM scratch and reused for all remaining query tiles.
    @pl.when(pl.program_id(1) == 0)
    def _project_kv():
        xkv = xkv_ref[...]                                     # (S, H) bf16
        for h in range(num_heads):
            k_h = jnp.dot(xkv, wk_ref[h], preferred_element_type=f32) + bk_ref[h]
            v_h = jnp.dot(xkv, wv_ref[h], preferred_element_type=f32) + bv_ref[h]
            kc_ref[h] = k_h.astype(bf16)                       # (S, dk)
            vc_ref[h] = v_h.astype(bf16)

    xq = xq_ref[...]                                           # (TQ, H) f32 — residual path
    xq_b = xq.astype(bf16)
    key_masked = km_ref[...] == 0.0                            # (1, S) bool, True => masked key
    TQ, H = xq.shape

    # ---- multi-head attention; head split carried by the pre-split weights so all
    #      activations stay lane-dense 2-D (no reshape/transpose relayouts).
    acc = jnp.zeros((TQ, H), f32)
    for h in range(num_heads):
        # 1/sqrt(dk) is already folded into wq/bq by the wrapper.
        q_h = (jnp.dot(xq_b, wq_ref[h], preferred_element_type=f32)
               + bq_ref[h]).astype(bf16)                       # (TQ, dk)
        k_h = kc_ref[h]                                        # (S, dk) bf16
        v_h = vc_ref[h]                                        # (S, dk) bf16

        # scores = q @ k^T  (contract last dims, no explicit transpose value)
        s = jax.lax.dot_general(q_h, k_h, (((1,), (1,)), ((), ())),
                                preferred_element_type=f32)    # (TQ, S) f32
        s = jnp.where(key_masked, -1e9, s)                     # torch masked_fill(mask==0, -1e9)
        s = s - jnp.max(s, axis=-1, keepdims=True)
        p = jnp.exp(s)
        p = p * pl.reciprocal(jnp.sum(p, axis=-1, keepdims=True), approx=True)

        ctx = jnp.dot(p.astype(bf16), v_h, preferred_element_type=f32)     # (TQ, dk)
        # head merge on the MXU against the per-head slice of the output projection
        acc = acc + jnp.dot(ctx.astype(bf16), wo_ref[h],
                            preferred_element_type=f32)        # (TQ, H) lane-dense

    attn = acc + bo_ref[...]

    # ---- input sublayer: LayerNorm(x + attn(x))
    x1 = _layernorm(xq + attn, g1_ref[...], be1_ref[...], eps)

    # ---- position-wise feed-forward (bf16 MXU operands, f32 GELU)
    f = jnp.dot(x1.astype(bf16), w1_ref[...], preferred_element_type=f32) + b1_ref[...]
    f = _gelu_tanh(f)
    f = jnp.dot(f.astype(bf16), w2_ref[...], preferred_element_type=f32) + b2_ref[...]

    # ---- output sublayer: LayerNorm(x1 + ff(x1)); dropout == identity (eval mode)
    o_ref[...] = _layernorm(x1 + f, g2_ref[...], be2_ref[...], eps).astype(o_ref.dtype)


# -------------------------------- wrapper ------------------------------------

def _vmem_limit_bytes():
    # Physical-VMEM-aware limit: ~100 MiB on v5e/v6e (128 MiB phys), ~56 MiB on v7x (64 MiB phys).
    try:
        cap = int(pltpu.get_tpu_info().vmem_capacity_bytes)
    except Exception:
        cap = 128 * 1024 * 1024
    return int(min(cap - 8 * 1024 * 1024, 100 * 1024 * 1024))


def transformer_block(x, key_mask, params, num_heads, eps=1e-6, *,
                      tq=None, single_buffer_weights=True):
    """x: (B, S, H) f32.  key_mask: (B, 1, S) float, 0 => key is masked."""
    B, S, H = x.shape
    assert H % num_heads == 0
    dk = H // num_heads
    d_ff = params["w1"].shape[1]
    scale = 1.0 / math.sqrt(dk)

    if tq is None:
        # v6e/v7x MXU is 256-wide; v5e is 128-wide (pass tq=128 there). Small S: one tile.
        tq = 256 if S % 256 == 0 else (128 if S % 128 == 0 else S)
    assert S % tq == 0, "S must be a multiple of the query tile"
    n_q = S // tq

    wdt = jnp.bfloat16

    def split_out_heads(w):          # (H, H_out) -> (heads, H, dk): output-dim head split
        return jnp.transpose(w.reshape(H, num_heads, dk), (1, 0, 2))

    # Weight-side head split (free, wrapper-side) + bf16 storage; 1/sqrt(dk) baked into wq/bq.
    wq = split_out_heads(params["wq"] * scale).astype(wdt)
    wk = split_out_heads(params["wk"]).astype(wdt)
    wv = split_out_heads(params["wv"]).astype(wdt)
    bq = (params["bq"] * scale).reshape(num_heads, 1, dk)
    bk = params["bk"].reshape(num_heads, 1, dk)
    bv = params["bv"].reshape(num_heads, 1, dk)
    wo = params["wo"].reshape(num_heads, dk, H).astype(wdt)    # input-dim head split
    w1 = params["w1"].astype(wdt)
    w2 = params["w2"].astype(wdt)

    # K/V path only ever needs bf16: stream it as bf16 (half the DMA bytes / VMEM).
    x_kv = x.astype(wdt)

    def const_spec(shape):
        kw = {}
        if single_buffer_weights:
            # Grid-invariant blocks: a single VMEM buffer suffices (no double-buffer waste).
            kw["pipeline_mode"] = pl.Buffered(1)
        return pl.BlockSpec(shape, lambda b, q: (0,) * len(shape), **kw)

    in_specs = [
        pl.BlockSpec((None, tq, H), lambda b, q: (b, q, 0)),   # x  (query tile, f32)
        pl.BlockSpec((None, S, H), lambda b, q: (b, 0, 0)),    # x  (full K/V seq, bf16)
        pl.BlockSpec((None, 1, S), lambda b, q: (b, 0, 0)),    # key-valid mask -> (1, S)
        const_spec((num_heads, H, dk)), const_spec((num_heads, 1, dk)),   # wq, bq
        const_spec((num_heads, H, dk)), const_spec((num_heads, 1, dk)),   # wk, bk
        const_spec((num_heads, H, dk)), const_spec((num_heads, 1, dk)),   # wv, bv
        const_spec((num_heads, dk, H)), const_spec((1, H)),               # wo, bo
        const_spec((1, H)), const_spec((1, H)),                           # ln1 gamma/beta
        const_spec((H, d_ff)), const_spec((1, d_ff)),                     # ff w1, b1
        const_spec((d_ff, H)), const_spec((1, H)),                        # ff w2, b2
        const_spec((1, H)), const_spec((1, H)),                           # ln2 gamma/beta
    ]

    kernel = functools.partial(transformer_block_kernel, num_heads=num_heads, eps=eps)
    return pl.pallas_call(
        kernel,
        out_shape=jax.ShapeDtypeStruct((B, S, H), x.dtype),
        grid=(B, n_q),
        in_specs=in_specs,
        out_specs=pl.BlockSpec((None, tq, H), lambda b, q: (b, q, 0)),
        scratch_shapes=[pltpu.VMEM((num_heads, S, dk), wdt),   # K cache (head-major bf16)
                        pltpu.VMEM((num_heads, S, dk), wdt)],  # V cache
        compiler_params=pltpu.CompilerParams(
            # q axis must stay on one core so the cached K/V stay valid across q tiles.
            dimension_semantics=("parallel", "arbitrary"),
            vmem_limit_bytes=_vmem_limit_bytes(),
        ),
    )(x, x_kv, key_mask,
      wq, bq, wk, bk, wv, bv, wo, params["bo"],
      params["g1"], params["be1"],
      w1, params["b1"], w2, params["b2"],
      params["g2"], params["be2"])


# ------------------------- pure-JAX reference (check) -------------------------

def _layernorm_ref(x, gamma, beta, eps):
    n = x.shape[-1]
    mean = jnp.mean(x, axis=-1, keepdims=True)
    diff = x - mean
    var = jnp.sum(diff * diff, axis=-1, keepdims=True) / (n - 1)
    return gamma * diff / (jnp.sqrt(var) + eps) + beta


def reference(x, key_mask, p, num_heads, eps=1e-6):
    B, S, H = x.shape
    dk = H // num_heads
    q = x @ p["wq"] + p["bq"]
    k = x @ p["wk"] + p["bk"]
    v = x @ p["wv"] + p["bv"]
    qh = q.reshape(B, S, num_heads, dk).transpose(0, 2, 1, 3)
    kh = k.reshape(B, S, num_heads, dk).transpose(0, 2, 1, 3)
    vh = v.reshape(B, S, num_heads, dk).transpose(0, 2, 1, 3)
    s = jnp.einsum("bhqd,bhkd->bhqk", qh, kh) / math.sqrt(dk)
    s = jnp.where(key_mask[:, None, :, :] == 0.0, -1e9, s)     # (B,1,1,S) broadcast
    a = jax.nn.softmax(s, axis=-1)
    ctx = jnp.einsum("bhqk,bhkd->bhqd", a, vh).transpose(0, 2, 1, 3).reshape(B, S, H)
    attn_out = ctx @ p["wo"] + p["bo"]
    x1 = _layernorm_ref(x + attn_out, p["g1"], p["be1"], eps)
    f = _gelu_tanh(x1 @ p["w1"] + p["b1"])
    f = f @ p["w2"] + p["b2"]
    return _layernorm_ref(x1 + f, p["g2"], p["be2"], eps)


# ---------------------------------- main --------------------------------------

if __name__ == "__main__":
    B, S, H, HEADS, D_FF = 2, 8, 32, 4, 128
    key = jax.random.PRNGKey(0)
    ks = jax.random.split(key, 16)

    def init(k, shape, scale=0.05):
        return jax.random.normal(k, shape, jnp.float32) * scale

    params = dict(
        wq=init(ks[0], (H, H)), bq=init(ks[1], (1, H)),
        wk=init(ks[2], (H, H)), bk=init(ks[3], (1, H)),
        wv=init(ks[4], (H, H)), bv=init(ks[5], (1, H)),
        wo=init(ks[6], (H, H)), bo=init(ks[7], (1, H)),
        g1=jnp.ones((1, H), jnp.float32), be1=jnp.zeros((1, H), jnp.float32),
        w1=init(ks[8], (H, D_FF)), b1=init(ks[9], (1, D_FF)),
        w2=init(ks[10], (D_FF, H)), b2=init(ks[11], (1, H)),
        g2=jnp.ones((1, H), jnp.float32), be2=jnp.zeros((1, H), jnp.float32),
    )

    x = jax.random.normal(ks[12], (B, S, H), jnp.float32)

    # padding-style key mask: batch 0 sees all S keys, batch 1 sees S-3 keys.
    # Passed as an O(S) key-valid vector (B, 1, S) instead of a dense (B, S, S) mask.
    lens = jnp.array([S, S - 3])
    key_valid = (jnp.arange(S)[None, :] < lens[:, None]).astype(jnp.float32)   # (B, S)
    key_mask = key_valid[:, None, :]                                           # (B, 1, S)

    try:
        out = transformer_block(x, key_mask, params, HEADS)
    except Exception:
        # Fallback for JAX builds that reject single-buffered (pl.Buffered(1)) blocks
        # in the outer pallas_call pipeline: use default double-buffered weights.
        out = transformer_block(x, key_mask, params, HEADS, single_buffer_weights=False)
    out = jax.block_until_ready(out)

    ref = reference(x, key_mask, params, HEADS)
    assert out.shape == (B, S, H)
    assert bool(jnp.allclose(out, ref, atol=2e-2, rtol=2e-2)), "kernel/reference mismatch"

    print("KERNEL_OK")
</pallas_src>

<mosaic_0001>
module attributes {stable_mosaic.version = 11 : i64} {
  func.func @transformer_block_kernel(%arg0: i32, %arg1: i32, %arg2: memref<1x8x32xf32, #tpu.memory_space<vmem>>, %arg3: memref<1x8x32xbf16, #tpu.memory_space<vmem>>, %arg4: memref<1x1x8xf32, #tpu.memory_space<vmem>>, %arg5: memref<4x32x8xbf16, #tpu.memory_space<vmem>>, %arg6: memref<4x1x8xf32, #tpu.memory_space<vmem>>, %arg7: memref<4x32x8xbf16, #tpu.memory_space<vmem>>, %arg8: memref<4x1x8xf32, #tpu.memory_space<vmem>>, %arg9: memref<4x32x8xbf16, #tpu.memory_space<vmem>>, %arg10: memref<4x1x8xf32, #tpu.memory_space<vmem>>, %arg11: memref<4x8x32xbf16, #tpu.memory_space<vmem>>, %arg12: memref<1x32xf32, #tpu.memory_space<vmem>>, %arg13: memref<1x32xf32, #tpu.memory_space<vmem>>, %arg14: memref<1x32xf32, #tpu.memory_space<vmem>>, %arg15: memref<32x128xbf16, #tpu.memory_space<vmem>>, %arg16: memref<1x128xf32, #tpu.memory_space<vmem>>, %arg17: memref<128x32xbf16, #tpu.memory_space<vmem>>, %arg18: memref<1x32xf32, #tpu.memory_space<vmem>>, %arg19: memref<1x32xf32, #tpu.memory_space<vmem>>, %arg20: memref<1x32xf32, #tpu.memory_space<vmem>>, %arg21: memref<1x8x32xf32, #tpu.memory_space<vmem>>, %arg22: memref<4x8x8xbf16, #tpu.memory_space<vmem>>, %arg23: memref<4x8x8xbf16, #tpu.memory_space<vmem>>) attributes {dimension_semantics = [#tpu.dimension_semantics<parallel>, #tpu.dimension_semantics<arbitrary>], iteration_bounds = array<i64: 2, 1>, scalar_prefetch = 0 : i64, scratch_operands = 2 : i64, tpu.core_type = #tpu.core_type<tc>, window_params = [{transform_indices = @transform_0, window_bounds = array<i64: 1, 8, 32>}, {transform_indices = @transform_1, window_bounds = array<i64: 1, 8, 32>}, {transform_indices = @transform_2, window_bounds = array<i64: 1, 1, 8>}, {pipeline_mode = #tpu.pipeline_mode<synchronous>, transform_indices = @transform_3, window_bounds = array<i64: 4, 32, 8>}, {pipeline_mode = #tpu.pipeline_mode<synchronous>, transform_indices = @transform_4, window_bounds = array<i64: 4, 1, 8>}, {pipeline_mode = #tpu.pipeline_mode<synchronous>, transform_indices = @transform_5, window_bounds = array<i64: 4, 32, 8>}, {pipeline_mode = #tpu.pipeline_mode<synchronous>, transform_indices = @transform_6, window_bounds = array<i64: 4, 1, 8>}, {pipeline_mode = #tpu.pipeline_mode<synchronous>, transform_indices = @transform_7, window_bounds = array<i64: 4, 32, 8>}, {pipeline_mode = #tpu.pipeline_mode<synchronous>, transform_indices = @transform_8, window_bounds = array<i64: 4, 1, 8>}, {pipeline_mode = #tpu.pipeline_mode<synchronous>, transform_indices = @transform_9, window_bounds = array<i64: 4, 8, 32>}, {pipeline_mode = #tpu.pipeline_mode<synchronous>, transform_indices = @transform_10, window_bounds = array<i64: 1, 32>}, {pipeline_mode = #tpu.pipeline_mode<synchronous>, transform_indices = @transform_11, window_bounds = array<i64: 1, 32>}, {pipeline_mode = #tpu.pipeline_mode<synchronous>, transform_indices = @transform_12, window_bounds = array<i64: 1, 32>}, {pipeline_mode = #tpu.pipeline_mode<synchronous>, transform_indices = @transform_13, window_bounds = array<i64: 32, 128>}, {pipeline_mode = #tpu.pipeline_mode<synchronous>, transform_indices = @transform_14, window_bounds = array<i64: 1, 128>}, {pipeline_mode = #tpu.pipeline_mode<synchronous>, transform_indices = @transform_15, window_bounds = array<i64: 128, 32>}, {pipeline_mode = #tpu.pipeline_mode<synchronous>, transform_indices = @transform_16, window_bounds = array<i64: 1, 32>}, {pipeline_mode = #tpu.pipeline_mode<synchronous>, transform_indices = @transform_17, window_bounds = array<i64: 1, 32>}, {pipeline_mode = #tpu.pipeline_mode<synchronous>, transform_indices = @transform_18, window_bounds = array<i64: 1, 32>}, {transform_indices = @transform_19, window_bounds = array<i64: 1, 8, 32>}]} {
    %c0_i32 = arith.constant 0 : i32
    %0 = arith.cmpi eq, %arg1, %c0_i32 : i32
    %1 = arith.extui %0 : i1 to i32
    %c0_i32_0 = arith.constant 0 : i32
    %2 = arith.cmpi ne, %1, %c0_i32_0 : i32
    scf.if %2 {
      %c0_129 = arith.constant 0 : index
      %c0_130 = arith.constant 0 : index
      %c0_131 = arith.constant 0 : index
      %224 = vector.load %arg3[%c0_129, %c0_130, %c0_131] : memref<1x8x32xbf16, #tpu.memory_space<vmem>>, vector<1x8x32xbf16>
      %225 = vector.shape_cast %224 : vector<1x8x32xbf16> to vector<8x32xbf16>
      %c0_132 = arith.constant 0 : index
      %c0_133 = arith.constant 0 : index
      %c0_134 = arith.constant 0 : index
      %226 = vector.load %arg7[%c0_132, %c0_133, %c0_134] : memref<4x32x8xbf16, #tpu.memory_space<vmem>>, vector<1x32x8xbf16>
      %227 = vector.shape_cast %226 : vector<1x32x8xbf16> to vector<32x8xbf16>
      %cst_135 = arith.constant dense<0.000000e+00> : vector<8x8xf32>
      %228 = tpu.matmul %225, %227, %cst_135 {dimension_numbers = #tpu.dot_dimension_numbers<[1], [0], [0], [1], [0, 0, 1, 1], [], []>} : vector<8x32xbf16>, vector<32x8xbf16>, vector<8x8xf32> -> vector<8x8xf32>
      %c0_136 = arith.constant 0 : index
      %c0_137 = arith.constant 0 : index
      %c0_138 = arith.constant 0 : index
      %229 = vector.load %arg8[%c0_136, %c0_137, %c0_138] : memref<4x1x8xf32, #tpu.memory_space<vmem>>, vector<1x1x8xf32>
      %230 = vector.shape_cast %229 : vector<1x1x8xf32> to vector<1x8xf32>
      %231 = vector.broadcast %230 : vector<1x8xf32> to vector<8x8xf32>
      %232 = arith.addf %228, %231 : vector<8x8xf32>
      %c0_139 = arith.constant 0 : index
      %c0_140 = arith.constant 0 : index
      %c0_141 = arith.constant 0 : index
      %233 = vector.load %arg9[%c0_139, %c0_140, %c0_141] : memref<4x32x8xbf16, #tpu.memory_space<vmem>>, vector<1x32x8xbf16>
      %234 = vector.shape_cast %233 : vector<1x32x8xbf16> to vector<32x8xbf16>
      %cst_142 = arith.constant dense<0.000000e+00> : vector<8x8xf32>
      %235 = tpu.matmul %225, %234, %cst_142 {dimension_numbers = #tpu.dot_dimension_numbers<[1], [0], [0], [1], [0, 0, 1, 1], [], []>} : vector<8x32xbf16>, vector<32x8xbf16>, vector<8x8xf32> -> vector<8x8xf32>
      %c0_143 = arith.constant 0 : index
      %c0_144 = arith.constant 0 : index
      %c0_145 = arith.constant 0 : index
      %236 = vector.load %arg10[%c0_143, %c0_144, %c0_145] : memref<4x1x8xf32, #tpu.memory_space<vmem>>, vector<1x1x8xf32>
      %237 = vector.shape_cast %236 : vector<1x1x8xf32> to vector<1x8xf32>
      %238 = vector.broadcast %237 : vector<1x8xf32> to vector<8x8xf32>
      %239 = arith.addf %235, %238 : vector<8x8xf32>
      %240 = arith.truncf %232 : vector<8x8xf32> to vector<8x8xbf16>
      %c0_146 = arith.constant 0 : index
      %c0_147 = arith.constant 0 : index
      %c0_148 = arith.constant 0 : index
      %241 = vector.load %arg22[%c0_146, %c0_147, %c0_148] : memref<4x8x8xbf16, #tpu.memory_space<vmem>>, vector<1x8x8xbf16>
      %242 = vector.shape_cast %241 : vector<1x8x8xbf16> to vector<8x8xbf16>
      %243 = vector.shape_cast %240 : vector<8x8xbf16> to vector<1x8x8xbf16>
      tpu.vector_store %arg22[%c0_146, %c0_147, %c0_148], %243 {strides = array<i32>} : memref<4x8x8xbf16, #tpu.memory_space<vmem>>, vector<1x8x8xbf16>,
      %244 = arith.truncf %239 : vector<8x8xf32> to vector<8x8xbf16>
      %c0_149 = arith.constant 0 : index
      %c0_150 = arith.constant 0 : index
      %c0_151 = arith.constant 0 : index
      %245 = vector.load %arg23[%c0_149, %c0_150, %c0_151] : memref<4x8x8xbf16, #tpu.memory_space<vmem>>, vector<1x8x8xbf16>
      %246 = vector.shape_cast %245 : vector<1x8x8xbf16> to vector<8x8xbf16>
      %247 = vector.shape_cast %244 : vector<8x8xbf16> to vector<1x8x8xbf16>
      tpu.vector_store %arg23[%c0_149, %c0_150, %c0_151], %247 {strides = array<i32>} : memref<4x8x8xbf16, #tpu.memory_space<vmem>>, vector<1x8x8xbf16>,
      %c1_152 = arith.constant 1 : index
      %c0_153 = arith.constant 0 : index
      %c0_154 = arith.constant 0 : index
      %248 = vector.load %arg7[%c1_152, %c0_153, %c0_154] : memref<4x32x8xbf16, #tpu.memory_space<vmem>>, vector<1x32x8xbf16>
      %249 = vector.shape_cast %248 : vector<1x32x8xbf16> to vector<32x8xbf16>
      %cst_155 = arith.constant dense<0.000000e+00> : vector<8x8xf32>
      %250 = tpu.matmul %225, %249, %cst_155 {dimension_numbers = #tpu.dot_dimension_numbers<[1], [0], [0], [1], [0, 0, 1, 1], [], []>} : vector<8x32xbf16>, vector<32x8xbf16>, vector<8x8xf32> -> vector<8x8xf32>
      %c1_156 = arith.constant 1 : index
      %c0_157 = arith.constant 0 : index
      %c0_158 = arith.constant 0 : index
      %251 = vector.load %arg8[%c1_156, %c0_157, %c0_158] : memref<4x1x8xf32, #tpu.memory_space<vmem>>, vector<1x1x8xf32>
      %252 = vector.shape_cast %251 : vector<1x1x8xf32> to vector<1x8xf32>
      %253 = vector.broadcast %252 : vector<1x8xf32> to vector<8x8xf32>
      %254 = arith.addf %250, %253 : vector<8x8xf32>
      %c1_159 = arith.constant 1 : index
      %c0_160 = arith.constant 0 : index
      %c0_161 = arith.constant 0 : index
      %255 = vector.load %arg9[%c1_159, %c0_160, %c0_161] : memref<4x32x8xbf16, #tpu.memory_space<vmem>>, vector<1x32x8xbf16>
      %256 = vector.shape_cast %255 : vector<1x32x8xbf16> to vector<32x8xbf16>
      %cst_162 = arith.constant dense<0.000000e+00> : vector<8x8xf32>
      %257 = tpu.matmul %225, %256, %cst_162 {dimension_numbers = #tpu.dot_dimension_numbers<[1], [0], [0], [1], [0, 0, 1, 1], [], []>} : vector<8x32xbf16>, vector<32x8xbf16>, vector<8x8xf32> -> vector<8x8xf32>
      %c1_163 = arith.constant 1 : index
      %c0_164 = arith.constant 0 : index
      %c0_165 = arith.constant 0 : index
      %258 = vector.load %arg10[%c1_163, %c0_164, %c0_165] : memref<4x1x8xf32, #tpu.memory_space<vmem>>, vector<1x1x8xf32>
      %259 = vector.shape_cast %258 : vector<1x1x8xf32> to vector<1x8xf32>
      %260 = vector.broadcast %259 : vector<1x8xf32> to vector<8x8xf32>
      %261 = arith.addf %257, %260 : vector<8x8xf32>
      %262 = arith.truncf %254 : vector<8x8xf32> to vector<8x8xbf16>
      %c1_166 = arith.constant 1 : index
      %c0_167 = arith.constant 0 : index
      %c0_168 = arith.constant 0 : index
      %263 = vector.load %arg22[%c1_166, %c0_167, %c0_168] : memref<4x8x8xbf16, #tpu.memory_space<vmem>>, vector<1x8x8xbf16>
      %264 = vector.shape_cast %263 : vector<1x8x8xbf16> to vector<8x8xbf16>
      %265 = vector.shape_cast %262 : vector<8x8xbf16> to vector<1x8x8xbf16>
      tpu.vector_store %arg22[%c1_166, %c0_167, %c0_168], %265 {strides = array<i32>} : memref<4x8x8xbf16, #tpu.memory_space<vmem>>, vector<1x8x8xbf16>,
      %266 = arith.truncf %261 : vector<8x8xf32> to vector<8x8xbf16>
      %c1_169 = arith.constant 1 : index
      %c0_170 = arith.constant 0 : index
      %c0_171 = arith.constant 0 : index
      %267 = vector.load %arg23[%c1_169, %c0_170, %c0_171] : memref<4x8x8xbf16, #tpu.memory_space<vmem>>, vector<1x8x8xbf16>
      %268 = vector.shape_cast %267 : vector<1x8x8xbf16> to vector<8x8xbf16>
      %269 = vector.shape_cast %266 : vector<8x8xbf16> to vector<1x8x8xbf16>
      tpu.vector_store %arg23[%c1_169, %c0_170, %c0_171], %269 {strides = array<i32>} : memref<4x8x8xbf16, #tpu.memory_space<vmem>>, vector<1x8x8xbf16>,
      %c2_172 = arith.constant 2 : index
      %c0_173 = arith.constant 0 : index
      %c0_174 = arith.constant 0 : index
      %270 = vector.load %arg7[%c2_172, %c0_173, %c0_174] : memref<4x32x8xbf16, #tpu.memory_space<vmem>>, vector<1x32x8xbf16>
      %271 = vector.shape_cast %270 : vector<1x32x8xbf16> to vector<32x8xbf16>
      %cst_175 = arith.constant dense<0.000000e+00> : vector<8x8xf32>
      %272 = tpu.matmul %225, %271, %cst_175 {dimension_numbers = #tpu.dot_dimension_numbers<[1], [0], [0], [1], [0, 0, 1, 1], [], []>} : vector<8x32xbf16>, vector<32x8xbf16>, vector<8x8xf32> -> vector<8x8xf32>
      %c2_176 = arith.constant 2 : index
      %c0_177 = arith.constant 0 : index
      %c0_178 = arith.constant 0 : index
      %273 = vector.load %arg8[%c2_176, %c0_177, %c0_178] : memref<4x1x8xf32, #tpu.memory_space<vmem>>, vector<1x1x8xf32>
      %274 = vector.shape_cast %273 : vector<1x1x8xf32> to vector<1x8xf32>
      %275 = vector.broadcast %274 : vector<1x8xf32> to vector<8x8xf32>
      %276 = arith.addf %272, %275 : vector<8x8xf32>
      %c2_179 = arith.constant 2 : index
      %c0_180 = arith.constant 0 : index
      %c0_181 = arith.constant 0 : index
      %277 = vector.load %arg9[%c2_179, %c0_180, %c0_181] : memref<4x32x8xbf16, #tpu.memory_space<vmem>>, vector<1x32x8xbf16>
      %278 = vector.shape_cast %277 : vector<1x32x8xbf16> to vector<32x8xbf16>
      %cst_182 = arith.constant dense<0.000000e+00> : vector<8x8xf32>
      %279 = tpu.matmul %225, %278, %cst_182 {dimension_numbers = #tpu.dot_dimension_numbers<[1], [0], [0], [1], [0, 0, 1, 1], [], []>} : vector<8x32xbf16>, vector<32x8xbf16>, vector<8x8xf32> -> vector<8x8xf32>
      %c2_183 = arith.constant 2 : index
      %c0_184 = arith.constant 0 : index
      %c0_185 = arith.constant 0 : index
      %280 = vector.load %arg10[%c2_183, %c0_184, %c0_185] : memref<4x1x8xf32, #tpu.memory_space<vmem>>, vector<1x1x8xf32>
      %281 = vector.shape_cast %280 : vector<1x1x8xf32> to vector<1x8xf32>
      %282 = vector.broadcast %281 : vector<1x8xf32> to vector<8x8xf32>
      %283 = arith.addf %279, %282 : vector<8x8xf32>
      %284 = arith.truncf %276 : vector<8x8xf32> to vector<8x8xbf16>
      %c2_186 = arith.constant 2 : index
      %c0_187 = arith.constant 0 : index
      %c0_188 = arith.constant 0 : index
      %285 = vector.load %arg22[%c2_186, %c0_187, %c0_188] : memref<4x8x8xbf16, #tpu.memory_space<vmem>>, vector<1x8x8xbf16>
      %286 = vector.shape_cast %285 : vector<1x8x8xbf16> to vector<8x8xbf16>
      %287 = vector.shape_cast %284 : vector<8x8xbf16> to vector<1x8x8xbf16>
      tpu.vector_store %arg22[%c2_186, %c0_187, %c0_188], %287 {strides = array<i32>} : memref<4x8x8xbf16, #tpu.memory_space<vmem>>, vector<1x8x8xbf16>,
      %288 = arith.truncf %283 : vector<8x8xf32> to vector<8x8xbf16>
      %c2_189 = arith.constant 2 : index
      %c0_190 = arith.constant 0 : index
      %c0_191 = arith.constant 0 : index
      %289 = vector.load %arg23[%c2_189, %c0_190, %c0_191] : memref<4x8x8xbf16, #tpu.memory_space<vmem>>, vector<1x8x8xbf16>
      %290 = vector.shape_cast %289 : vector<1x8x8xbf16> to vector<8x8xbf16>
      %291 = vector.shape_cast %288 : vector<8x8xbf16> to vector<1x8x8xbf16>
      tpu.vector_store %arg23[%c2_189, %c0_190, %c0_191], %291 {strides = array<i32>} : memref<4x8x8xbf16, #tpu.memory_space<vmem>>, vector<1x8x8xbf16>,
      %c3_192 = arith.constant 3 : index
      %c0_193 = arith.constant 0 : index
      %c0_194 = arith.constant 0 : index
      %292 = vector.load %arg7[%c3_192, %c0_193, %c0_194] : memref<4x32x8xbf16, #tpu.memory_space<vmem>>, vector<1x32x8xbf16>
      %293 = vector.shape_cast %292 : vector<1x32x8xbf16> to vector<32x8xbf16>
      %cst_195 = arith.constant dense<0.000000e+00> : vector<8x8xf32>
      %294 = tpu.matmul %225, %293, %cst_195 {dimension_numbers = #tpu.dot_dimension_numbers<[1], [0], [0], [1], [0, 0, 1, 1], [], []>} : vector<8x32xbf16>, vector<32x8xbf16>, vector<8x8xf32> -> vector<8x8xf32>
      %c3_196 = arith.constant 3 : index
      %c0_197 = arith.constant 0 : index
      %c0_198 = arith.constant 0 : index
      %295 = vector.load %arg8[%c3_196, %c0_197, %c0_198] : memref<4x1x8xf32, #tpu.memory_space<vmem>>, vector<1x1x8xf32>
      %296 = vector.shape_cast %295 : vector<1x1x8xf32> to vector<1x8xf32>
      %297 = vector.broadcast %296 : vector<1x8xf32> to vector<8x8xf32>
      %298 = arith.addf %294, %297 : vector<8x8xf32>
      %c3_199 = arith.constant 3 : index
      %c0_200 = arith.constant 0 : index
      %c0_201 = arith.constant 0 : index
      %299 = vector.load %arg9[%c3_199, %c0_200, %c0_201] : memref<4x32x8xbf16, #tpu.memory_space<vmem>>, vector<1x32x8xbf16>
      %300 = vector.shape_cast %299 : vector<1x32x8xbf16> to vector<32x8xbf16>
      %cst_202 = arith.constant dense<0.000000e+00> : vector<8x8xf32>
      %301 = tpu.matmul %225, %300, %cst_202 {dimension_numbers = #tpu.dot_dimension_numbers<[1], [0], [0], [1], [0, 0, 1, 1], [], []>} : vector<8x32xbf16>, vector<32x8xbf16>, vector<8x8xf32> -> vector<8x8xf32>
      %c3_203 = arith.constant 3 : index
      %c0_204 = arith.constant 0 : index
      %c0_205 = arith.constant 0 : index
      %302 = vector.load %arg10[%c3_203, %c0_204, %c0_205] : memref<4x1x8xf32, #tpu.memory_space<vmem>>, vector<1x1x8xf32>
      %303 = vector.shape_cast %302 : vector<1x1x8xf32> to vector<1x8xf32>
      %304 = vector.broadcast %303 : vector<1x8xf32> to vector<8x8xf32>
      %305 = arith.addf %301, %304 : vector<8x8xf32>
      %306 = arith.truncf %298 : vector<8x8xf32> to vector<8x8xbf16>
      %c3_206 = arith.constant 3 : index
      %c0_207 = arith.constant 0 : index
      %c0_208 = arith.constant 0 : index
      %307 = vector.load %arg22[%c3_206, %c0_207, %c0_208] : memref<4x8x8xbf16, #tpu.memory_space<vmem>>, vector<1x8x8xbf16>
      %308 = vector.shape_cast %307 : vector<1x8x8xbf16> to vector<8x8xbf16>
      %309 = vector.shape_cast %306 : vector<8x8xbf16> to vector<1x8x8xbf16>
      tpu.vector_store %arg22[%c3_206, %c0_207, %c0_208], %309 {strides = array<i32>} : memref<4x8x8xbf16, #tpu.memory_space<vmem>>, vector<1x8x8xbf16>,
      %310 = arith.truncf %305 : vector<8x8xf32> to vector<8x8xbf16>
      %c3_209 = arith.constant 3 : index
      %c0_210 = arith.constant 0 : index
      %c0_211 = arith.constant 0 : index
      %311 = vector.load %arg23[%c3_209, %c0_210, %c0_211] : memref<4x8x8xbf16, #tpu.memory_space<vmem>>, vector<1x8x8xbf16>
      %312 = vector.shape_cast %311 : vector<1x8x8xbf16> to vector<8x8xbf16>
      %313 = vector.shape_cast %310 : vector<8x8xbf16> to vector<1x8x8xbf16>
      tpu.vector_store %arg23[%c3_209, %c0_210, %c0_211], %313 {strides = array<i32>} : memref<4x8x8xbf16, #tpu.memory_space<vmem>>, vector<1x8x8xbf16>,
    } else {
    }
    %c0 = arith.constant 0 : index
    %c0_1 = arith.constant 0 : index
    %c0_2 = arith.constant 0 : index
    %3 = vector.load %arg2[%c0, %c0_1, %c0_2] : memref<1x8x32xf32, #tpu.memory_space<vmem>>, vector<1x8x32xf32>
    %4 = vector.shape_cast %3 : vector<1x8x32xf32> to vector<8x32xf32>
    %5 = arith.truncf %4 : vector<8x32xf32> to vector<8x32xbf16>
    %c0_3 = arith.constant 0 : index
    %c0_4 = arith.constant 0 : index
    %c0_5 = arith.constant 0 : index
    %6 = vector.load %arg4[%c0_3, %c0_4, %c0_5] : memref<1x1x8xf32, #tpu.memory_space<vmem>>, vector<1x1x8xf32>
    %7 = vector.shape_cast %6 : vector<1x1x8xf32> to vector<1x8xf32>
    %cst = arith.constant 0.000000e+00 : f32
    %8 = vector.broadcast %cst : f32 to vector<1x8xf32>
    %9 = arith.cmpf oeq, %7, %8 : vector<1x8xf32>
    %cst_6 = arith.constant 0.000000e+00 : f32
    %10 = vector.broadcast %cst_6 : f32 to vector<8x32xf32>
    %c0_7 = arith.constant 0 : index
    %c0_8 = arith.constant 0 : index
    %c0_9 = arith.constant 0 : index
    %11 = vector.load %arg5[%c0_7, %c0_8, %c0_9] : memref<4x32x8xbf16, #tpu.memory_space<vmem>>, vector<1x32x8xbf16>
    %12 = vector.shape_cast %11 : vector<1x32x8xbf16> to vector<32x8xbf16>
    %cst_10 = arith.constant dense<0.000000e+00> : vector<8x8xf32>
    %13 = tpu.matmul %5, %12, %cst_10 {dimension_numbers = #tpu.dot_dimension_numbers<[1], [0], [0], [1], [0, 0, 1, 1], [], []>} : vector<8x32xbf16>, vector<32x8xbf16>, vector<8x8xf32> -> vector<8x8xf32>
    %c0_11 = arith.constant 0 : index
    %c0_12 = arith.constant 0 : index
    %c0_13 = arith.constant 0 : index
    %14 = vector.load %arg6[%c0_11, %c0_12, %c0_13] : memref<4x1x8xf32, #tpu.memory_space<vmem>>, vector<1x1x8xf32>
    %15 = vector.shape_cast %14 : vector<1x1x8xf32> to vector<1x8xf32>
    %16 = vector.broadcast %15 : vector<1x8xf32> to vector<8x8xf32>
    %17 = arith.addf %13, %16 : vector<8x8xf32>
    %18 = arith.truncf %17 : vector<8x8xf32> to vector<8x8xbf16>
    %c0_14 = arith.constant 0 : index
    %c0_15 = arith.constant 0 : index
    %c0_16 = arith.constant 0 : index
    %19 = vector.load %arg22[%c0_14, %c0_15, %c0_16] : memref<4x8x8xbf16, #tpu.memory_space<vmem>>, vector<1x8x8xbf16>
    %20 = vector.shape_cast %19 : vector<1x8x8xbf16> to vector<8x8xbf16>
    %c0_17 = arith.constant 0 : index
    %c0_18 = arith.constant 0 : index
    %c0_19 = arith.constant 0 : index
    %21 = vector.load %arg23[%c0_17, %c0_18, %c0_19] : memref<4x8x8xbf16, #tpu.memory_space<vmem>>, vector<1x8x8xbf16>
    %22 = vector.shape_cast %21 : vector<1x8x8xbf16> to vector<8x8xbf16>
    %cst_20 = arith.constant dense<0.000000e+00> : vector<8x8xf32>
    %23 = tpu.matmul %18, %20, %cst_20 {dimension_numbers = #tpu.dot_dimension_numbers<[1], [1], [0], [0], [0, 0, 1, 0], [], []>} : vector<8x8xbf16>, vector<8x8xbf16>, vector<8x8xf32> -> vector<8x8xf32>
    %cst_21 = arith.constant -1.000000e+09 : f32
    %24 = vector.shape_cast %9 : vector<1x8xi1> to vector<1x8xi1>
    %25 = vector.broadcast %24 : vector<1x8xi1> to vector<8x8xi1>
    %26 = vector.broadcast %cst_21 : f32 to vector<8x8xf32>
    %27 = arith.select %25, %26, %23 : vector<8x8xi1>, vector<8x8xf32>
    %cst_22 = arith.constant dense<0xFF800000> : vector<8xf32>
    %28 = vector.multi_reduction <maximumf>, %27, %cst_22 [1] : vector<8x8xf32> to vector<8xf32>
    %29 = vector.shape_cast %28 : vector<8xf32> to vector<8x1xf32>
    %30 = vector.broadcast %29 : vector<8x1xf32> to vector<8x8xf32>
    %31 = arith.subf %27, %30 : vector<8x8xf32>
    %32 = math.exp %31 : vector<8x8xf32>
    %cst_23 = arith.constant dense<0.000000e+00> : vector<8xf32>
    %33 = vector.multi_reduction <add>, %32, %cst_23 [1] : vector<8x8xf32> to vector<8xf32>
    %34 = vector.shape_cast %33 : vector<8xf32> to vector<8x1xf32>
    %35 = tpu.reciprocal %34 {approx = true} : vector<8x1xf32> -> vector<8x1xf32>
    %36 = vector.broadcast %35 : vector<8x1xf32> to vector<8x8xf32>
    %37 = arith.mulf %32, %36 : vector<8x8xf32>
    %38 = arith.truncf %37 : vector<8x8xf32> to vector<8x8xbf16>
    %cst_24 = arith.constant dense<0.000000e+00> : vector<8x8xf32>
    %39 = tpu.matmul %38, %22, %cst_24 {dimension_numbers = #tpu.dot_dimension_numbers<[1], [0], [0], [1], [0, 0, 1, 1], [], []>} : vector<8x8xbf16>, vector<8x8xbf16>, vector<8x8xf32> -> vector<8x8xf32>
    %40 = arith.truncf %39 : vector<8x8xf32> to vector<8x8xbf16>
    %c0_25 = arith.constant 0 : index
    %c0_26 = arith.constant 0 : index
    %c0_27 = arith.constant 0 : index
    %41 = vector.load %arg11[%c0_25, %c0_26, %c0_27] : memref<4x8x32xbf16, #tpu.memory_space<vmem>>, vector<1x8x32xbf16>
    %42 = vector.shape_cast %41 : vector<1x8x32xbf16> to vector<8x32xbf16>
    %cst_28 = arith.constant dense<0.000000e+00> : vector<8x32xf32>
    %43 = tpu.matmul %40, %42, %cst_28 {dimension_numbers = #tpu.dot_dimension_numbers<[1], [0], [0], [1], [0, 0, 1, 1], [], []>} : vector<8x8xbf16>, vector<8x32xbf16>, vector<8x32xf32> -> vector<8x32xf32>
    %44 = arith.addf %10, %43 : vector<8x32xf32>
    %c1 = arith.constant 1 : index
    %c0_29 = arith.constant 0 : index
    %c0_30 = arith.constant 0 : index
    %45 = vector.load %arg5[%c1, %c0_29, %c0_30] : memref<4x32x8xbf16, #tpu.memory_space<vmem>>, vector<1x32x8xbf16>
    %46 = vector.shape_cast %45 : vector<1x32x8xbf16> to vector<32x8xbf16>
    %cst_31 = arith.constant dense<0.000000e+00> : vector<8x8xf32>
    %47 = tpu.matmul %5, %46, %cst_31 {dimension_numbers = #tpu.dot_dimension_numbers<[1], [0], [0], [1], [0, 0, 1, 1], [], []>} : vector<8x32xbf16>, vector<32x8xbf16>, vector<8x8xf32> -> vector<8x8xf32>
    %c1_32 = arith.constant 1 : index
    %c0_33 = arith.constant 0 : index
    %c0_34 = arith.constant 0 : index
    %48 = vector.load %arg6[%c1_32, %c0_33, %c0_34] : memref<4x1x8xf32, #tpu.memory_space<vmem>>, vector<1x1x8xf32>
    %49 = vector.shape_cast %48 : vector<1x1x8xf32> to vector<1x8xf32>
    %50 = vector.broadcast %49 : vector<1x8xf32> to vector<8x8xf32>
    %51 = arith.addf %47, %50 : vector<8x8xf32>
    %52 = arith.truncf %51 : vector<8x8xf32> to vector<8x8xbf16>
    %c1_35 = arith.constant 1 : index
    %c0_36 = arith.constant 0 : index
    %c0_37 = arith.constant 0 : index
    %53 = vector.load %arg22[%c1_35, %c0_36, %c0_37] : memref<4x8x8xbf16, #tpu.memory_space<vmem>>, vector<1x8x8xbf16>
    %54 = vector.shape_cast %53 : vector<1x8x8xbf16> to vector<8x8xbf16>
    %c1_38 = arith.constant 1 : index
    %c0_39 = arith.constant 0 : index
    %c0_40 = arith.constant 0 : index
    %55 = vector.load %arg23[%c1_38, %c0_39, %c0_40] : memref<4x8x8xbf16, #tpu.memory_space<vmem>>, vector<1x8x8xbf16>
    %56 = vector.shape_cast %55 : vector<1x8x8xbf16> to vector<8x8xbf16>
    %cst_41 = arith.constant dense<0.000000e+00> : vector<8x8xf32>
    %57 = tpu.matmul %52, %54, %cst_41 {dimension_numbers = #tpu.dot_dimension_numbers<[1], [1], [0], [0], [0, 0, 1, 0], [], []>} : vector<8x8xbf16>, vector<8x8xbf16>, vector<8x8xf32> -> vector<8x8xf32>
    %cst_42 = arith.constant -1.000000e+09 : f32
    %58 = vector.shape_cast %9 : vector<1x8xi1> to vector<1x8xi1>
    %59 = vector.broadcast %58 : vector<1x8xi1> to vector<8x8xi1>
    %60 = vector.broadcast %cst_42 : f32 to vector<8x8xf32>
    %61 = arith.select %59, %60, %57 : vector<8x8xi1>, vector<8x8xf32>
    %cst_43 = arith.constant dense<0xFF800000> : vector<8xf32>
    %62 = vector.multi_reduction <maximumf>, %61, %cst_43 [1] : vector<8x8xf32> to vector<8xf32>
    %63 = vector.shape_cast %62 : vector<8xf32> to vector<8x1xf32>
    %64 = vector.broadcast %63 : vector<8x1xf32> to vector<8x8xf32>
    %65 = arith.subf %61, %64 : vector<8x8xf32>
    %66 = math.exp %65 : vector<8x8xf32>
    %cst_44 = arith.constant dense<0.000000e+00> : vector<8xf32>
    %67 = vector.multi_reduction <add>, %66, %cst_44 [1] : vector<8x8xf32> to vector<8xf32>
    %68 = vector.shape_cast %67 : vector<8xf32> to vector<8x1xf32>
    %69 = tpu.reciprocal %68 {approx = true} : vector<8x1xf32> -> vector<8x1xf32>
    %70 = vector.broadcast %69 : vector<8x1xf32> to vector<8x8xf32>
    %71 = arith.mulf %66, %70 : vector<8x8xf32>
    %72 = arith.truncf %71 : vector<8x8xf32> to vector<8x8xbf16>
    %cst_45 = arith.constant dense<0.000000e+00> : vector<8x8xf32>
    %73 = tpu.matmul %72, %56, %cst_45 {dimension_numbers = #tpu.dot_dimension_numbers<[1], [0], [0], [1], [0, 0, 1, 1], [], []>} : vector<8x8xbf16>, vector<8x8xbf16>, vector<8x8xf32> -> vector<8x8xf32>
    %74 = arith.truncf %73 : vector<8x8xf32> to vector<8x8xbf16>
    %c1_46 = arith.constant 1 : index
    %c0_47 = arith.constant 0 : index
    %c0_48 = arith.constant 0 : index
    %75 = vector.load %arg11[%c1_46, %c0_47, %c0_48] : memref<4x8x32xbf16, #tpu.memory_space<vmem>>, vector<1x8x32xbf16>
    %76 = vector.shape_cast %75 : vector<1x8x32xbf16> to vector<8x32xbf16>
    %cst_49 = arith.constant dense<0.000000e+00> : vector<8x32xf32>
    %77 = tpu.matmul %74, %76, %cst_49 {dimension_numbers = #tpu.dot_dimension_numbers<[1], [0], [0], [1], [0, 0, 1, 1], [], []>} : vector<8x8xbf16>, vector<8x32xbf16>, vector<8x32xf32> -> vector<8x32xf32>
    %78 = arith.addf %44, %77 : vector<8x32xf32>
    %c2 = arith.constant 2 : index
    %c0_50 = arith.constant 0 : index
    %c0_51 = arith.constant 0 : index
    %79 = vector.load %arg5[%c2, %c0_50, %c0_51] : memref<4x32x8xbf16, #tpu.memory_space<vmem>>, vector<1x32x8xbf16>
    %80 = vector.shape_cast %79 : vector<1x32x8xbf16> to vector<32x8xbf16>
    %cst_52 = arith.constant dense<0.000000e+00> : vector<8x8xf32>
    %81 = tpu.matmul %5, %80, %cst_52 {dimension_numbers = #tpu.dot_dimension_numbers<[1], [0], [0], [1], [0, 0, 1, 1], [], []>} : vector<8x32xbf16>, vector<32x8xbf16>, vector<8x8xf32> -> vector<8x8xf32>
    %c2_53 = arith.constant 2 : index
    %c0_54 = arith.constant 0 : index
    %c0_55 = arith.constant 0 : index
    %82 = vector.load %arg6[%c2_53, %c0_54, %c0_55] : memref<4x1x8xf32, #tpu.memory_space<vmem>>, vector<1x1x8xf32>
    %83 = vector.shape_cast %82 : vector<1x1x8xf32> to vector<1x8xf32>
    %84 = vector.broadcast %83 : vector<1x8xf32> to vector<8x8xf32>
    %85 = arith.addf %81, %84 : vector<8x8xf32>
    %86 = arith.truncf %85 : vector<8x8xf32> to vector<8x8xbf16>
    %c2_56 = arith.constant 2 : index
    %c0_57 = arith.constant 0 : index
    %c0_58 = arith.constant 0 : index
    %87 = vector.load %arg22[%c2_56, %c0_57, %c0_58] : memref<4x8x8xbf16, #tpu.memory_space<vmem>>, vector<1x8x8xbf16>
    %88 = vector.shape_cast %87 : vector<1x8x8xbf16> to vector<8x8xbf16>
    %c2_59 = arith.constant 2 : index
    %c0_60 = arith.constant 0 : index
    %c0_61 = arith.constant 0 : index
    %89 = vector.load %arg23[%c2_59, %c0_60, %c0_61] : memref<4x8x8xbf16, #tpu.memory_space<vmem>>, vector<1x8x8xbf16>
    %90 = vector.shape_cast %89 : vector<1x8x8xbf16> to vector<8x8xbf16>
    %cst_62 = arith.constant dense<0.000000e+00> : vector<8x8xf32>
    %91 = tpu.matmul %86, %88, %cst_62 {dimension_numbers = #tpu.dot_dimension_numbers<[1], [1], [0], [0], [0, 0, 1, 0], [], []>} : vector<8x8xbf16>, vector<8x8xbf16>, vector<8x8xf32> -> vector<8x8xf32>
    %cst_63 = arith.constant -1.000000e+09 : f32
    %92 = vector.shape_cast %9 : vector<1x8xi1> to vector<1x8xi1>
    %93 = vector.broadcast %92 : vector<1x8xi1> to vector<8x8xi1>
    %94 = vector.broadcast %cst_63 : f32 to vector<8x8xf32>
    %95 = arith.select %93, %94, %91 : vector<8x8xi1>, vector<8x8xf32>
    %cst_64 = arith.constant dense<0xFF800000> : vector<8xf32>
    %96 = vector.multi_reduction <maximumf>, %95, %cst_64 [1] : vector<8x8xf32> to vector<8xf32>
    %97 = vector.shape_cast %96 : vector<8xf32> to vector<8x1xf32>
    %98 = vector.broadcast %97 : vector<8x1xf32> to vector<8x8xf32>
    %99 = arith.subf %95, %98 : vector<8x8xf32>
    %100 = math.exp %99 : vector<8x8xf32>
    %cst_65 = arith.constant dense<0.000000e+00> : vector<8xf32>
    %101 = vector.multi_reduction <add>, %100, %cst_65 [1] : vector<8x8xf32> to vector<8xf32>
    %102 = vector.shape_cast %101 : vector<8xf32> to vector<8x1xf32>
    %103 = tpu.reciprocal %102 {approx = true} : vector<8x1xf32> -> vector<8x1xf32>
    %104 = vector.broadcast %103 : vector<8x1xf32> to vector<8x8xf32>
    %105 = arith.mulf %100, %104 : vector<8x8xf32>
    %106 = arith.truncf %105 : vector<8x8xf32> to vector<8x8xbf16>
    %cst_66 = arith.constant dense<0.000000e+00> : vector<8x8xf32>
    %107 = tpu.matmul %106, %90, %cst_66 {dimension_numbers = #tpu.dot_dimension_numbers<[1], [0], [0], [1], [0, 0, 1, 1], [], []>} : vector<8x8xbf16>, vector<8x8xbf16>, vector<8x8xf32> -> vector<8x8xf32>
    %108 = arith.truncf %107 : vector<8x8xf32> to vector<8x8xbf16>
    %c2_67 = arith.constant 2 : index
    %c0_68 = arith.constant 0 : index
    %c0_69 = arith.constant 0 : index
    %109 = vector.load %arg11[%c2_67, %c0_68, %c0_69] : memref<4x8x32xbf16, #tpu.memory_space<vmem>>, vector<1x8x32xbf16>
    %110 = vector.shape_cast %109 : vector<1x8x32xbf16> to vector<8x32xbf16>
    %cst_70 = arith.constant dense<0.000000e+00> : vector<8x32xf32>
    %111 = tpu.matmul %108, %110, %cst_70 {dimension_numbers = #tpu.dot_dimension_numbers<[1], [0], [0], [1], [0, 0, 1, 1], [], []>} : vector<8x8xbf16>, vector<8x32xbf16>, vector<8x32xf32> -> vector<8x32xf32>
    %112 = arith.addf %78, %111 : vector<8x32xf32>
    %c3 = arith.constant 3 : index
    %c0_71 = arith.constant 0 : index
    %c0_72 = arith.constant 0 : index
    %113 = vector.load %arg5[%c3, %c0_71, %c0_72] : memref<4x32x8xbf16, #tpu.memory_space<vmem>>, vector<1x32x8xbf16>
    %114 = vector.shape_cast %113 : vector<1x32x8xbf16> to vector<32x8xbf16>
    %cst_73 = arith.constant dense<0.000000e+00> : vector<8x8xf32>
    %115 = tpu.matmul %5, %114, %cst_73 {dimension_numbers = #tpu.dot_dimension_numbers<[1], [0], [0], [1], [0, 0, 1, 1], [], []>} : vector<8x32xbf16>, vector<32x8xbf16>, vector<8x8xf32> -> vector<8x8xf32>
    %c3_74 = arith.constant 3 : index
    %c0_75 = arith.constant 0 : index
    %c0_76 = arith.constant 0 : index
    %116 = vector.load %arg6[%c3_74, %c0_75, %c0_76] : memref<4x1x8xf32, #tpu.memory_space<vmem>>, vector<1x1x8xf32>
    %117 = vector.shape_cast %116 : vector<1x1x8xf32> to vector<1x8xf32>
    %118 = vector.broadcast %117 : vector<1x8xf32> to vector<8x8xf32>
    %119 = arith.addf %115, %118 : vector<8x8xf32>
    %120 = arith.truncf %119 : vector<8x8xf32> to vector<8x8xbf16>
    %c3_77 = arith.constant 3 : index
    %c0_78 = arith.constant 0 : index
    %c0_79 = arith.constant 0 : index
    %121 = vector.load %arg22[%c3_77, %c0_78, %c0_79] : memref<4x8x8xbf16, #tpu.memory_space<vmem>>, vector<1x8x8xbf16>
    %122 = vector.shape_cast %121 : vector<1x8x8xbf16> to vector<8x8xbf16>
    %c3_80 = arith.constant 3 : index
    %c0_81 = arith.constant 0 : index
    %c0_82 = arith.constant 0 : index
    %123 = vector.load %arg23[%c3_80, %c0_81, %c0_82] : memref<4x8x8xbf16, #tpu.memory_space<vmem>>, vector<1x8x8xbf16>
    %124 = vector.shape_cast %123 : vector<1x8x8xbf16> to vector<8x8xbf16>
    %cst_83 = arith.constant dense<0.000000e+00> : vector<8x8xf32>
    %125 = tpu.matmul %120, %122, %cst_83 {dimension_numbers = #tpu.dot_dimension_numbers<[1], [1], [0], [0], [0, 0, 1, 0], [], []>} : vector<8x8xbf16>, vector<8x8xbf16>, vector<8x8xf32> -> vector<8x8xf32>
    %cst_84 = arith.constant -1.000000e+09 : f32
    %126 = vector.shape_cast %9 : vector<1x8xi1> to vector<1x8xi1>
    %127 = vector.broadcast %126 : vector<1x8xi1> to vector<8x8xi1>
    %128 = vector.broadcast %cst_84 : f32 to vector<8x8xf32>
    %129 = arith.select %127, %128, %125 : vector<8x8xi1>, vector<8x8xf32>
    %cst_85 = arith.constant dense<0xFF800000> : vector<8xf32>
    %130 = vector.multi_reduction <maximumf>, %129, %cst_85 [1] : vector<8x8xf32> to vector<8xf32>
    %131 = vector.shape_cast %130 : vector<8xf32> to vector<8x1xf32>
    %132 = vector.broadcast %131 : vector<8x1xf32> to vector<8x8xf32>
    %133 = arith.subf %129, %132 : vector<8x8xf32>
    %134 = math.exp %133 : vector<8x8xf32>
    %cst_86 = arith.constant dense<0.000000e+00> : vector<8xf32>
    %135 = vector.multi_reduction <add>, %134, %cst_86 [1] : vector<8x8xf32> to vector<8xf32>
    %136 = vector.shape_cast %135 : vector<8xf32> to vector<8x1xf32>
    %137 = tpu.reciprocal %136 {approx = true} : vector<8x1xf32> -> vector<8x1xf32>
    %138 = vector.broadcast %137 : vector<8x1xf32> to vector<8x8xf32>
    %139 = arith.mulf %134, %138 : vector<8x8xf32>
    %140 = arith.truncf %139 : vector<8x8xf32> to vector<8x8xbf16>
    %cst_87 = arith.constant dense<0.000000e+00> : vector<8x8xf32>
    %141 = tpu.matmul %140, %124, %cst_87 {dimension_numbers = #tpu.dot_dimension_numbers<[1], [0], [0], [1], [0, 0, 1, 1], [], []>} : vector<8x8xbf16>, vector<8x8xbf16>, vector<8x8xf32> -> vector<8x8xf32>
    %142 = arith.truncf %141 : vector<8x8xf32> to vector<8x8xbf16>
    %c3_88 = arith.constant 3 : index
    %c0_89 = arith.constant 0 : index
    %c0_90 = arith.constant 0 : index
    %143 = vector.load %arg11[%c3_88, %c0_89, %c0_90] : memref<4x8x32xbf16, #tpu.memory_space<vmem>>, vector<1x8x32xbf16>
    %144 = vector.shape_cast %143 : vector<1x8x32xbf16> to vector<8x32xbf16>
    %cst_91 = arith.constant dense<0.000000e+00> : vector<8x32xf32>
    %145 = tpu.matmul %142, %144, %cst_91 {dimension_numbers = #tpu.dot_dimension_numbers<[1], [0], [0], [1], [0, 0, 1, 1], [], []>} : vector<8x8xbf16>, vector<8x32xbf16>, vector<8x32xf32> -> vector<8x32xf32>
    %146 = arith.addf %112, %145 : vector<8x32xf32>
    %c0_92 = arith.constant 0 : index
    %c0_93 = arith.constant 0 : index
    %147 = vector.load %arg12[%c0_92, %c0_93] : memref<1x32xf32, #tpu.memory_space<vmem>>, vector<1x32xf32>
    %148 = vector.broadcast %147 : vector<1x32xf32> to vector<8x32xf32>
    %149 = arith.addf %146, %148 : vector<8x32xf32>
    %150 = arith.addf %4, %149 : vector<8x32xf32>
    %c0_94 = arith.constant 0 : index
    %c0_95 = arith.constant 0 : index
    %151 = vector.load %arg13[%c0_94, %c0_95] : memref<1x32xf32, #tpu.memory_space<vmem>>, vector<1x32xf32>
    %c0_96 = arith.constant 0 : index
    %c0_97 = arith.constant 0 : index
    %152 = vector.load %arg14[%c0_96, %c0_97] : memref<1x32xf32, #tpu.memory_space<vmem>>, vector<1x32xf32>
    %cst_98 = arith.constant dense<0.000000e+00> : vector<8xf32>
    %153 = vector.multi_reduction <add>, %150, %cst_98 [1] : vector<8x32xf32> to vector<8xf32>
    %154 = vector.shape_cast %153 : vector<8xf32> to vector<8x1xf32>
    %cst_99 = arith.constant 3.200000e+01 : f32
    %155 = vector.broadcast %cst_99 : f32 to vector<8x1xf32>
    %156 = arith.divf %154, %155 : vector<8x1xf32>
    %157 = vector.broadcast %156 : vector<8x1xf32> to vector<8x32xf32>
    %158 = arith.subf %150, %157 : vector<8x32xf32>
    %159 = arith.mulf %158, %158 : vector<8x32xf32>
    %cst_100 = arith.constant dense<0.000000e+00> : vector<8xf32>
    %160 = vector.multi_reduction <add>, %159, %cst_100 [1] : vector<8x32xf32> to vector<8xf32>
    %161 = vector.shape_cast %160 : vector<8xf32> to vector<8x1xf32>
    %cst_101 = arith.constant 0.0322580636 : f32
    %162 = vector.broadcast %cst_101 : f32 to vector<8x1xf32>
    %163 = arith.mulf %161, %162 : vector<8x1xf32>
    %164 = math.sqrt %163 : vector<8x1xf32>
    %cst_102 = arith.constant 9.99999997E-7 : f32
    %165 = vector.broadcast %cst_102 : f32 to vector<8x1xf32>
    %166 = arith.addf %164, %165 : vector<8x1xf32>
    %167 = vector.broadcast %166 : vector<8x1xf32> to vector<8x32xf32>
    %168 = arith.divf %158, %167 : vector<8x32xf32>
    %169 = vector.broadcast %151 : vector<1x32xf32> to vector<8x32xf32>
    %170 = arith.mulf %169, %168 : vector<8x32xf32>
    %171 = vector.broadcast %152 : vector<1x32xf32> to vector<8x32xf32>
    %172 = arith.addf %170, %171 : vector<8x32xf32>
    %173 = arith.truncf %172 : vector<8x32xf32> to vector<8x32xbf16>
    %c0_103 = arith.constant 0 : index
    %c0_104 = arith.constant 0 : index
    %174 = vector.load %arg15[%c0_103, %c0_104] : memref<32x128xbf16, #tpu.memory_space<vmem>>, vector<32x128xbf16>
    %cst_105 = arith.constant dense<0.000000e+00> : vector<8x128xf32>
    %175 = tpu.matmul %173, %174, %cst_105 {dimension_numbers = #tpu.dot_dimension_numbers<[1], [0], [0], [1], [0, 0, 1, 1], [], []>} : vector<8x32xbf16>, vector<32x128xbf16>, vector<8x128xf32> -> vector<8x128xf32>
    %c0_106 = arith.constant 0 : index
    %c0_107 = arith.constant 0 : index
    %176 = vector.load %arg16[%c0_106, %c0_107] : memref<1x128xf32, #tpu.memory_space<vmem>>, vector<1x128xf32>
    %177 = vector.broadcast %176 : vector<1x128xf32> to vector<8x128xf32>
    %178 = arith.addf %175, %177 : vector<8x128xf32>
    %cst_108 = arith.constant 5.000000e-01 : f32
    %179 = vector.broadcast %cst_108 : f32 to vector<8x128xf32>
    %180 = arith.mulf %179, %178 : vector<8x128xf32>
    %cst_109 = arith.constant 4.471500e-02 : f32
    %181 = vector.broadcast %cst_109 : f32 to vector<8x128xf32>
    %182 = arith.mulf %181, %178 : vector<8x128xf32>
    %183 = arith.mulf %182, %178 : vector<8x128xf32>
    %184 = arith.mulf %183, %178 : vector<8x128xf32>
    %185 = arith.addf %178, %184 : vector<8x128xf32>
    %cst_110 = arith.constant 0.797884583 : f32
    %186 = vector.broadcast %cst_110 : f32 to vector<8x128xf32>
    %187 = arith.mulf %186, %185 : vector<8x128xf32>
    %188 = math.tanh %187 : vector<8x128xf32>
    %cst_111 = arith.constant 1.000000e+00 : f32
    %189 = vector.broadcast %cst_111 : f32 to vector<8x128xf32>
    %190 = arith.addf %189, %188 : vector<8x128xf32>
    %191 = arith.mulf %180, %190 : vector<8x128xf32>
    %192 = arith.truncf %191 : vector<8x128xf32> to vector<8x128xbf16>
    %c0_112 = arith.constant 0 : index
    %c0_113 = arith.constant 0 : index
    %193 = vector.load %arg17[%c0_112, %c0_113] : memref<128x32xbf16, #tpu.memory_space<vmem>>, vector<128x32xbf16>
    %cst_114 = arith.constant dense<0.000000e+00> : vector<8x32xf32>
    %194 = tpu.matmul %192, %193, %cst_114 {dimension_numbers = #tpu.dot_dimension_numbers<[1], [0], [0], [1], [0, 0, 1, 1], [], []>} : vector<8x128xbf16>, vector<128x32xbf16>, vector<8x32xf32> -> vector<8x32xf32>
    %c0_115 = arith.constant 0 : index
    %c0_116 = arith.constant 0 : index
    %195 = vector.load %arg18[%c0_115, %c0_116] : memref<1x32xf32, #tpu.memory_space<vmem>>, vector<1x32xf32>
    %196 = vector.broadcast %195 : vector<1x32xf32> to vector<8x32xf32>
    %197 = arith.addf %194, %196 : vector<8x32xf32>
    %198 = arith.addf %172, %197 : vector<8x32xf32>
    %c0_117 = arith.constant 0 : index
    %c0_118 = arith.constant 0 : index
    %199 = vector.load %arg19[%c0_117, %c0_118] : memref<1x32xf32, #tpu.memory_space<vmem>>, vector<1x32xf32>
    %c0_119 = arith.constant 0 : index
    %c0_120 = arith.constant 0 : index
    %200 = vector.load %arg20[%c0_119, %c0_120] : memref<1x32xf32, #tpu.memory_space<vmem>>, vector<1x32xf32>
    %cst_121 = arith.constant dense<0.000000e+00> : vector<8xf32>
    %201 = vector.multi_reduction <add>, %198, %cst_121 [1] : vector<8x32xf32> to vector<8xf32>
    %202 = vector.shape_cast %201 : vector<8xf32> to vector<8x1xf32>
    %cst_122 = arith.constant 3.200000e+01 : f32
    %203 = vector.broadcast %cst_122 : f32 to vector<8x1xf32>
    %204 = arith.divf %202, %203 : vector<8x1xf32>
    %205 = vector.broadcast %204 : vector<8x1xf32> to vector<8x32xf32>
    %206 = arith.subf %198, %205 : vector<8x32xf32>
    %207 = arith.mulf %206, %206 : vector<8x32xf32>
    %cst_123 = arith.constant dense<0.000000e+00> : vector<8xf32>
    %208 = vector.multi_reduction <add>, %207, %cst_123 [1] : vector<8x32xf32> to vector<8xf32>
    %209 = vector.shape_cast %208 : vector<8xf32> to vector<8x1xf32>
    %cst_124 = arith.constant 0.0322580636 : f32
    %210 = vector.broadcast %cst_124 : f32 to vector<8x1xf32>
    %211 = arith.mulf %209, %210 : vector<8x1xf32>
    %212 = math.sqrt %211 : vector<8x1xf32>
    %cst_125 = arith.constant 9.99999997E-7 : f32
    %213 = vector.broadcast %cst_125 : f32 to vector<8x1xf32>
    %214 = arith.addf %212, %213 : vector<8x1xf32>
    %215 = vector.broadcast %214 : vector<8x1xf32> to vector<8x32xf32>
    %216 = arith.divf %206, %215 : vector<8x32xf32>
    %217 = vector.broadcast %199 : vector<1x32xf32> to vector<8x32xf32>
    %218 = arith.mulf %217, %216 : vector<8x32xf32>
    %219 = vector.broadcast %200 : vector<1x32xf32> to vector<8x32xf32>
    %220 = arith.addf %218, %219 : vector<8x32xf32>
    %c0_126 = arith.constant 0 : index
    %c0_127 = arith.constant 0 : index
    %c0_128 = arith.constant 0 : index
    %221 = vector.load %arg21[%c0_126, %c0_127, %c0_128] : memref<1x8x32xf32, #tpu.memory_space<vmem>>, vector<1x8x32xf32>
    %222 = vector.shape_cast %221 : vector<1x8x32xf32> to vector<8x32xf32>
    %223 = vector.shape_cast %220 : vector<8x32xf32> to vector<1x8x32xf32>
    tpu.vector_store %arg21[%c0_126, %c0_127, %c0_128], %223 {strides = array<i32>} : memref<1x8x32xf32, #tpu.memory_space<vmem>>, vector<1x8x32xf32>,
    return
  }
  func.func @transform_0(%arg0: i32, %arg1: i32) -> (i32, i32, i32) {
    %c0_i32 = arith.constant 0 : i32
    %c0_i32_0 = arith.constant 0 : i32
    return %arg0, %arg1, %c0_i32 : i32, i32, i32
  }
  func.func @transform_1(%arg0: i32, %arg1: i32) -> (i32, i32, i32) {
    %c0_i32 = arith.constant 0 : i32
    %c0_i32_0 = arith.constant 0 : i32
    %c0_i32_1 = arith.constant 0 : i32
    return %arg0, %c0_i32, %c0_i32_0 : i32, i32, i32
  }
  func.func @transform_2(%arg0: i32, %arg1: i32) -> (i32, i32, i32) {
    %c0_i32 = arith.constant 0 : i32
    %c0_i32_0 = arith.constant 0 : i32
    %c0_i32_1 = arith.constant 0 : i32
    return %arg0, %c0_i32, %c0_i32_0 : i32, i32, i32
  }
  func.func @transform_3(%arg0: i32, %arg1: i32) -> (i32, i32, i32) {
    %c0_i32 = arith.constant 0 : i32
    %c0_i32_0 = arith.constant 0 : i32
    %c0_i32_1 = arith.constant 0 : i32
    %c0_i32_2 = arith.constant 0 : i32
    return %c0_i32, %c0_i32_0, %c0_i32_1 : i32, i32, i32
  }
  func.func @transform_4(%arg0: i32, %arg1: i32) -> (i32, i32, i32) {
    %c0_i32 = arith.constant 0 : i32
    %c0_i32_0 = arith.constant 0 : i32
    %c0_i32_1 = arith.constant 0 : i32
    %c0_i32_2 = arith.constant 0 : i32
    return %c0_i32, %c0_i32_0, %c0_i32_1 : i32, i32, i32
  }
  func.func @transform_5(%arg0: i32, %arg1: i32) -> (i32, i32, i32) {
    %c0_i32 = arith.constant 0 : i32
    %c0_i32_0 = arith.constant 0 : i32
    %c0_i32_1 = arith.constant 0 : i32
    %c0_i32_2 = arith.constant 0 : i32
    return %c0_i32, %c0_i32_0, %c0_i32_1 : i32, i32, i32
  }
  func.func @transform_6(%arg0: i32, %arg1: i32) -> (i32, i32, i32) {
    %c0_i32 = arith.constant 0 : i32
    %c0_i32_0 = arith.constant 0 : i32
    %c0_i32_1 = arith.constant 0 : i32
    %c0_i32_2 = arith.constant 0 : i32
    return %c0_i32, %c0_i32_0, %c0_i32_1 : i32, i32, i32
  }
  func.func @transform_7(%arg0: i32, %arg1: i32) -> (i32, i32, i32) {
    %c0_i32 = arith.constant 0 : i32
    %c0_i32_0 = arith.constant 0 : i32
    %c0_i32_1 = arith.constant 0 : i32
    %c0_i32_2 = arith.constant 0 : i32
    return %c0_i32, %c0_i32_0, %c0_i32_1 : i32, i32, i32
  }
  func.func @transform_8(%arg0: i32, %arg1: i32) -> (i32, i32, i32) {
    %c0_i32 = arith.constant 0 : i32
    %c0_i32_0 = arith.constant 0 : i32
    %c0_i32_1 = arith.constant 0 : i32
    %c0_i32_2 = arith.constant 0 : i32
    return %c0_i32, %c0_i32_0, %c0_i32_1 : i32, i32, i32
  }
  func.func @transform_9(%arg0: i32, %arg1: i32) -> (i32, i32, i32) {
    %c0_i32 = arith.constant 0 : i32
    %c0_i32_0 = arith.constant 0 : i32
    %c0_i32_1 = arith.constant 0 : i32
    %c0_i32_2 = arith.constant 0 : i32
    return %c0_i32, %c0_i32_0, %c0_i32_1 : i32, i32, i32
  }
  func.func @transform_10(%arg0: i32, %arg1: i32) -> (i32, i32) {
    %c0_i32 = arith.constant 0 : i32
    %c0_i32_0 = arith.constant 0 : i32
    %c0_i32_1 = arith.constant 0 : i32
    return %c0_i32, %c0_i32_0 : i32, i32
  }
  func.func @transform_11(%arg0: i32, %arg1: i32) -> (i32, i32) {
    %c0_i32 = arith.constant 0 : i32
    %c0_i32_0 = arith.constant 0 : i32
    %c0_i32_1 = arith.constant 0 : i32
    return %c0_i32, %c0_i32_0 : i32, i32
  }
  func.func @transform_12(%arg0: i32, %arg1: i32) -> (i32, i32) {
    %c0_i32 = arith.constant 0 : i32
    %c0_i32_0 = arith.constant 0 : i32
    %c0_i32_1 = arith.constant 0 : i32
    return %c0_i32, %c0_i32_0 : i32, i32
  }
  func.func @transform_13(%arg0: i32, %arg1: i32) -> (i32, i32) {
    %c0_i32 = arith.constant 0 : i32
    %c0_i32_0 = arith.constant 0 : i32
    %c0_i32_1 = arith.constant 0 : i32
    return %c0_i32, %c0_i32_0 : i32, i32
  }
  func.func @transform_14(%arg0: i32, %arg1: i32) -> (i32, i32) {
    %c0_i32 = arith.constant 0 : i32
    %c0_i32_0 = arith.constant 0 : i32
    %c0_i32_1 = arith.constant 0 : i32
    return %c0_i32, %c0_i32_0 : i32, i32
  }
  func.func @transform_15(%arg0: i32, %arg1: i32) -> (i32, i32) {
    %c0_i32 = arith.constant 0 : i32
    %c0_i32_0 = arith.constant 0 : i32
    %c0_i32_1 = arith.constant 0 : i32
    return %c0_i32, %c0_i32_0 : i32, i32
  }
  func.func @transform_16(%arg0: i32, %arg1: i32) -> (i32, i32) {
    %c0_i32 = arith.constant 0 : i32
    %c0_i32_0 = arith.constant 0 : i32
    %c0_i32_1 = arith.constant 0 : i32
    return %c0_i32, %c0_i32_0 : i32, i32
  }
  func.func @transform_17(%arg0: i32, %arg1: i32) -> (i32, i32) {
    %c0_i32 = arith.constant 0 : i32
    %c0_i32_0 = arith.constant 0 : i32
    %c0_i32_1 = arith.constant 0 : i32
    return %c0_i32, %c0_i32_0 : i32, i32
  }
  func.func @transform_18(%arg0: i32, %arg1: i32) -> (i32, i32) {
    %c0_i32 = arith.constant 0 : i32
    %c0_i32_0 = arith.constant 0 : i32
    %c0_i32_1 = arith.constant 0 : i32
    return %c0_i32, %c0_i32_0 : i32, i32
  }
  func.func @transform_19(%arg0: i32, %arg1: i32) -> (i32, i32, i32) {
    %c0_i32 = arith.constant 0 : i32
    %c0_i32_0 = arith.constant 0 : i32
    return %arg0, %arg1, %c0_i32 : i32, i32, i32
  }
}

module attributes {stable_mosaic.version = 11 : i64} {
  func.func @transformer_block_kernel(%arg0: i32, %arg1: i32, %arg2: memref<1x8x32xf32, #tpu.memory_space<vmem>>, %arg3: memref<1x8x32xbf16, #tpu.memory_space<vmem>>, %arg4: memref<1x1x8xf32, #tpu.memory_space<vmem>>, %arg5: memref<4x32x8xbf16, #tpu.memory_space<vmem>>, %arg6: memref<4x1x8xf32, #tpu.memory_space<vmem>>, %arg7: memref<4x32x8xbf16, #tpu.memory_space<vmem>>, %arg8: memref<4x1x8xf32, #tpu.memory_space<vmem>>, %arg9: memref<4x32x8xbf16, #tpu.memory_space<vmem>>, %arg10: memref<4x1x8xf32, #tpu.memory_space<vmem>>, %arg11: memref<4x8x32xbf16, #tpu.memory_space<vmem>>, %arg12: memref<1x32xf32, #tpu.memory_space<vmem>>, %arg13: memref<1x32xf32, #tpu.memory_space<vmem>>, %arg14: memref<1x32xf32, #tpu.memory_space<vmem>>, %arg15: memref<32x128xbf16, #tpu.memory_space<vmem>>, %arg16: memref<1x128xf32, #tpu.memory_space<vmem>>, %arg17: memref<128x32xbf16, #tpu.memory_space<vmem>>, %arg18: memref<1x32xf32, #tpu.memory_space<vmem>>, %arg19: memref<1x32xf32, #tpu.memory_space<vmem>>, %arg20: memref<1x32xf32, #tpu.memory_space<vmem>>, %arg21: memref<1x8x32xf32, #tpu.memory_space<vmem>>, %arg22: memref<4x8x8xbf16, #tpu.memory_space<vmem>>, %arg23: memref<4x8x8xbf16, #tpu.memory_space<vmem>>) attributes {dimension_semantics = [#tpu.dimension_semantics<parallel>, #tpu.dimension_semantics<arbitrary>], iteration_bounds = array<i64: 2, 1>, scalar_prefetch = 0 : i64, scratch_operands = 2 : i64, tpu.core_type = #tpu.core_type<tc>, window_params = [{transform_indices = @transform_0, window_bounds = array<i64: 1, 8, 32>}, {transform_indices = @transform_1, window_bounds = array<i64: 1, 8, 32>}, {transform_indices = @transform_2, window_bounds = array<i64: 1, 1, 8>}, {pipeline_mode = #tpu.pipeline_mode<synchronous>, transform_indices = @transform_3, window_bounds = array<i64: 4, 32, 8>}, {pipeline_mode = #tpu.pipeline_mode<synchronous>, transform_indices = @transform_4, window_bounds = array<i64: 4, 1, 8>}, {pipeline_mode = #tpu.pipeline_mode<synchronous>, transform_indices = @transform_5, window_bounds = array<i64: 4, 32, 8>}, {pipeline_mode = #tpu.pipeline_mode<synchronous>, transform_indices = @transform_6, window_bounds = array<i64: 4, 1, 8>}, {pipeline_mode = #tpu.pipeline_mode<synchronous>, transform_indices = @transform_7, window_bounds = array<i64: 4, 32, 8>}, {pipeline_mode = #tpu.pipeline_mode<synchronous>, transform_indices = @transform_8, window_bounds = array<i64: 4, 1, 8>}, {pipeline_mode = #tpu.pipeline_mode<synchronous>, transform_indices = @transform_9, window_bounds = array<i64: 4, 8, 32>}, {pipeline_mode = #tpu.pipeline_mode<synchronous>, transform_indices = @transform_10, window_bounds = array<i64: 1, 32>}, {pipeline_mode = #tpu.pipeline_mode<synchronous>, transform_indices = @transform_11, window_bounds = array<i64: 1, 32>}, {pipeline_mode = #tpu.pipeline_mode<synchronous>, transform_indices = @transform_12, window_bounds = array<i64: 1, 32>}, {pipeline_mode = #tpu.pipeline_mode<synchronous>, transform_indices = @transform_13, window_bounds = array<i64: 32, 128>}, {pipeline_mode = #tpu.pipeline_mode<synchronous>, transform_indices = @transform_14, window_bounds = array<i64: 1, 128>}, {pipeline_mode = #tpu.pipeline_mode<synchronous>, transform_indices = @transform_15, window_bounds = array<i64: 128, 32>}, {pipeline_mode = #tpu.pipeline_mode<synchronous>, transform_indices = @transform_16, window_bounds = array<i64: 1, 32>}, {pipeline_mode = #tpu.pipeline_mode<synchronous>, transform_indices = @transform_17, window_bounds = array<i64: 1, 32>}, {pipeline_mode = #tpu.pipeline_mode<synchronous>, transform_indices = @transform_18, window_bounds = array<i64: 1, 32>}, {transform_indices = @transform_19, window_bounds = array<i64: 1, 8, 32>}]} {
    %c0_i32 = arith.constant 0 : i32
    %0 = arith.cmpi eq, %arg1, %c0_i32 : i32
    %1 = arith.extui %0 : i1 to i32
    %c0_i32_0 = arith.constant 0 : i32
    %2 = arith.cmpi ne, %1, %c0_i32_0 : i32
    scf.if %2 {
      %c0_129 = arith.constant 0 : index
      %c0_130 = arith.constant 0 : index
      %c0_131 = arith.constant 0 : index
      %224 = vector.load %arg3[%c0_129, %c0_130, %c0_131] : memref<1x8x32xbf16, #tpu.memory_space<vmem>>, vector<1x8x32xbf16>
      %225 = vector.shape_cast %224 : vector<1x8x32xbf16> to vector<8x32xbf16>
      %c0_132 = arith.constant 0 : index
      %c0_133 = arith.constant 0 : index
      %c0_134 = arith.constant 0 : index
      %226 = vector.load %arg7[%c0_132, %c0_133, %c0_134] : memref<4x32x8xbf16, #tpu.memory_space<vmem>>, vector<1x32x8xbf16>
      %227 = vector.shape_cast %226 : vector<1x32x8xbf16> to vector<32x8xbf16>
      %cst_135 = arith.constant dense<0.000000e+00> : vector<8x8xf32>
      %228 = tpu.matmul %225, %227, %cst_135 {dimension_numbers = #tpu.dot_dimension_numbers<[1], [0], [0], [1], [0, 0, 1, 1], [], []>} : vector<8x32xbf16>, vector<32x8xbf16>, vector<8x8xf32> -> vector<8x8xf32>
      %c0_136 = arith.constant 0 : index
      %c0_137 = arith.constant 0 : index
      %c0_138 = arith.constant 0 : index
      %229 = vector.load %arg8[%c0_136, %c0_137, %c0_138] : memref<4x1x8xf32, #tpu.memory_space<vmem>>, vector<1x1x8xf32>
      %230 = vector.shape_cast %229 : vector<1x1x8xf32> to vector<1x8xf32>
      %231 = vector.broadcast %230 : vector<1x8xf32> to vector<8x8xf32>
      %232 = arith.addf %228, %231 : vector<8x8xf32>
      %c0_139 = arith.constant 0 : index
      %c0_140 = arith.constant 0 : index
      %c0_141 = arith.constant 0 : index
      %233 = vector.load %arg9[%c0_139, %c0_140, %c0_141] : memref<4x32x8xbf16, #tpu.memory_space<vmem>>, vector<1x32x8xbf16>
      %234 = vector.shape_cast %233 : vector<1x32x8xbf16> to vector<32x8xbf16>
      %cst_142 = arith.constant dense<0.000000e+00> : vector<8x8xf32>
      %235 = tpu.matmul %225, %234, %cst_142 {dimension_numbers = #tpu.dot_dimension_numbers<[1], [0], [0], [1], [0, 0, 1, 1], [], []>} : vector<8x32xbf16>, vector<32x8xbf16>, vector<8x8xf32> -> vector<8x8xf32>
      %c0_143 = arith.constant 0 : index
      %c0_144 = arith.constant 0 : index
      %c0_145 = arith.constant 0 : index
      %236 = vector.load %arg10[%c0_143, %c0_144, %c0_145] : memref<4x1x8xf32, #tpu.memory_space<vmem>>, vector<1x1x8xf32>
      %237 = vector.shape_cast %236 : vector<1x1x8xf32> to vector<1x8xf32>
      %238 = vector.broadcast %237 : vector<1x8xf32> to vector<8x8xf32>
      %239 = arith.addf %235, %238 : vector<8x8xf32>
      %240 = arith.truncf %232 : vector<8x8xf32> to vector<8x8xbf16>
      %c0_146 = arith.constant 0 : index
      %c0_147 = arith.constant 0 : index
      %c0_148 = arith.constant 0 : index
      %241 = vector.load %arg22[%c0_146, %c0_147, %c0_148] : memref<4x8x8xbf16, #tpu.memory_space<vmem>>, vector<1x8x8xbf16>
      %242 = vector.shape_cast %241 : vector<1x8x8xbf16> to vector<8x8xbf16>
      %243 = vector.shape_cast %240 : vector<8x8xbf16> to vector<1x8x8xbf16>
      tpu.vector_store %arg22[%c0_146, %c0_147, %c0_148], %243 {strides = array<i32>} : memref<4x8x8xbf16, #tpu.memory_space<vmem>>, vector<1x8x8xbf16>,
      %244 = arith.truncf %239 : vector<8x8xf32> to vector<8x8xbf16>
      %c0_149 = arith.constant 0 : index
      %c0_150 = arith.constant 0 : index
      %c0_151 = arith.constant 0 : index
      %245 = vector.load %arg23[%c0_149, %c0_150, %c0_151] : memref<4x8x8xbf16, #tpu.memory_space<vmem>>, vector<1x8x8xbf16>
      %246 = vector.shape_cast %245 : vector<1x8x8xbf16> to vector<8x8xbf16>
      %247 = vector.shape_cast %244 : vector<8x8xbf16> to vector<1x8x8xbf16>
      tpu.vector_store %arg23[%c0_149, %c0_150, %c0_151], %247 {strides = array<i32>} : memref<4x8x8xbf16, #tpu.memory_space<vmem>>, vector<1x8x8xbf16>,
      %c1_152 = arith.constant 1 : index
      %c0_153 = arith.constant 0 : index
      %c0_154 = arith.constant 0 : index
      %248 = vector.load %arg7[%c1_152, %c0_153, %c0_154] : memref<4x32x8xbf16, #tpu.memory_space<vmem>>, vector<1x32x8xbf16>
      %249 = vector.shape_cast %248 : vector<1x32x8xbf16> to vector<32x8xbf16>
      %cst_155 = arith.constant dense<0.000000e+00> : vector<8x8xf32>
      %250 = tpu.matmul %225, %249, %cst_155 {dimension_numbers = #tpu.dot_dimension_numbers<[1], [0], [0], [1], [0, 0, 1, 1], [], []>} : vector<8x32xbf16>, vector<32x8xbf16>, vector<8x8xf32> -> vector<8x8xf32>
      %c1_156 = arith.constant 1 : index
      %c0_157 = arith.constant 0 : index
      %c0_158 = arith.constant 0 : index
      %251 = vector.load %arg8[%c1_156, %c0_157, %c0_158] : memref<4x1x8xf32, #tpu.memory_space<vmem>>, vector<1x1x8xf32>
      %252 = vector.shape_cast %251 : vector<1x1x8xf32> to vector<1x8xf32>
      %253 = vector.broadcast %252 : vector<1x8xf32> to vector<8x8xf32>
      %254 = arith.addf %250, %253 : vector<8x8xf32>
      %c1_159 = arith.constant 1 : index
      %c0_160 = arith.constant 0 : index
      %c0_161 = arith.constant 0 : index
      %255 = vector.load %arg9[%c1_159, %c0_160, %c0_161] : memref<4x32x8xbf16, #tpu.memory_space<vmem>>, vector<1x32x8xbf16>
      %256 = vector.shape_cast %255 : vector<1x32x8xbf16> to vector<32x8xbf16>
      %cst_162 = arith.constant dense<0.000000e+00> : vector<8x8xf32>
      %257 = tpu.matmul %225, %256, %cst_162 {dimension_numbers = #tpu.dot_dimension_numbers<[1], [0], [0], [1], [0, 0, 1, 1], [], []>} : vector<8x32xbf16>, vector<32x8xbf16>, vector<8x8xf32> -> vector<8x8xf32>
      %c1_163 = arith.constant 1 : index
      %c0_164 = arith.constant 0 : index
      %c0_165 = arith.constant 0 : index
      %258 = vector.load %arg10[%c1_163, %c0_164, %c0_165] : memref<4x1x8xf32, #tpu.memory_space<vmem>>, vector<1x1x8xf32>
      %259 = vector.shape_cast %258 : vector<1x1x8xf32> to vector<1x8xf32>
      %260 = vector.broadcast %259 : vector<1x8xf32> to vector<8x8xf32>
      %261 = arith.addf %257, %260 : vector<8x8xf32>
      %262 = arith.truncf %254 : vector<8x8xf32> to vector<8x8xbf16>
      %c1_166 = arith.constant 1 : index
      %c0_167 = arith.constant 0 : index
      %c0_168 = arith.constant 0 : index
      %263 = vector.load %arg22[%c1_166, %c0_167, %c0_168] : memref<4x8x8xbf16, #tpu.memory_space<vmem>>, vector<1x8x8xbf16>
      %264 = vector.shape_cast %263 : vector<1x8x8xbf16> to vector<8x8xbf16>
      %265 = vector.shape_cast %262 : vector<8x8xbf16> to vector<1x8x8xbf16>
      tpu.vector_store %arg22[%c1_166, %c0_167, %c0_168], %265 {strides = array<i32>} : memref<4x8x8xbf16, #tpu.memory_space<vmem>>, vector<1x8x8xbf16>,
      %266 = arith.truncf %261 : vector<8x8xf32> to vector<8x8xbf16>
      %c1_169 = arith.constant 1 : index
      %c0_170 = arith.constant 0 : index
      %c0_171 = arith.constant 0 : index
      %267 = vector.load %arg23[%c1_169, %c0_170, %c0_171] : memref<4x8x8xbf16, #tpu.memory_space<vmem>>, vector<1x8x8xbf16>
      %268 = vector.shape_cast %267 : vector<1x8x8xbf16> to vector<8x8xbf16>
      %269 = vector.shape_cast %266 : vector<8x8xbf16> to vector<1x8x8xbf16>
      tpu.vector_store %arg23[%c1_169, %c0_170, %c0_171], %269 {strides = array<i32>} : memref<4x8x8xbf16, #tpu.memory_space<vmem>>, vector<1x8x8xbf16>,
      %c2_172 = arith.constant 2 : index
      %c0_173 = arith.constant 0 : index
      %c0_174 = arith.constant 0 : index
      %270 = vector.load %arg7[%c2_172, %c0_173, %c0_174] : memref<4x32x8xbf16, #tpu.memory_space<vmem>>, vector<1x32x8xbf16>
      %271 = vector.shape_cast %270 : vector<1x32x8xbf16> to vector<32x8xbf16>
      %cst_175 = arith.constant dense<0.000000e+00> : vector<8x8xf32>
      %272 = tpu.matmul %225, %271, %cst_175 {dimension_numbers = #tpu.dot_dimension_numbers<[1], [0], [0], [1], [0, 0, 1, 1], [], []>} : vector<8x32xbf16>, vector<32x8xbf16>, vector<8x8xf32> -> vector<8x8xf32>
      %c2_176 = arith.constant 2 : index
      %c0_177 = arith.constant 0 : index
      %c0_178 = arith.constant 0 : index
      %273 = vector.load %arg8[%c2_176, %c0_177, %c0_178] : memref<4x1x8xf32, #tpu.memory_space<vmem>>, vector<1x1x8xf32>
      %274 = vector.shape_cast %273 : vector<1x1x8xf32> to vector<1x8xf32>
      %275 = vector.broadcast %274 : vector<1x8xf32> to vector<8x8xf32>
      %276 = arith.addf %272, %275 : vector<8x8xf32>
      %c2_179 = arith.constant 2 : index
      %c0_180 = arith.constant 0 : index
      %c0_181 = arith.constant 0 : index
      %277 = vector.load %arg9[%c2_179, %c0_180, %c0_181] : memref<4x32x8xbf16, #tpu.memory_space<vmem>>, vector<1x32x8xbf16>
      %278 = vector.shape_cast %277 : vector<1x32x8xbf16> to vector<32x8xbf16>
      %cst_182 = arith.constant dense<0.000000e+00> : vector<8x8xf32>
      %279 = tpu.matmul %225, %278, %cst_182 {dimension_numbers = #tpu.dot_dimension_numbers<[1], [0], [0], [1], [0, 0, 1, 1], [], []>} : vector<8x32xbf16>, vector<32x8xbf16>, vector<8x8xf32> -> vector<8x8xf32>
      %c2_183 = arith.constant 2 : index
      %c0_184 = arith.constant 0 : index
      %c0_185 = arith.constant 0 : index
      %280 = vector.load %arg10[%c2_183, %c0_184, %c0_185] : memref<4x1x8xf32, #tpu.memory_space<vmem>>, vector<1x1x8xf32>
      %281 = vector.shape_cast %280 : vector<1x1x8xf32> to vector<1x8xf32>
      %282 = vector.broadcast %281 : vector<1x8xf32> to vector<8x8xf32>
      %283 = arith.addf %279, %282 : vector<8x8xf32>
      %284 = arith.truncf %276 : vector<8x8xf32> to vector<8x8xbf16>
      %c2_186 = arith.constant 2 : index
      %c0_187 = arith.constant 0 : index
      %c0_188 = arith.constant 0 : index
      %285 = vector.load %arg22[%c2_186, %c0_187, %c0_188] : memref<4x8x8xbf16, #tpu.memory_space<vmem>>, vector<1x8x8xbf16>
      %286 = vector.shape_cast %285 : vector<1x8x8xbf16> to vector<8x8xbf16>
      %287 = vector.shape_cast %284 : vector<8x8xbf16> to vector<1x8x8xbf16>
      tpu.vector_store %arg22[%c2_186, %c0_187, %c0_188], %287 {strides = array<i32>} : memref<4x8x8xbf16, #tpu.memory_space<vmem>>, vector<1x8x8xbf16>,
      %288 = arith.truncf %283 : vector<8x8xf32> to vector<8x8xbf16>
      %c2_189 = arith.constant 2 : index
      %c0_190 = arith.constant 0 : index
      %c0_191 = arith.constant 0 : index
      %289 = vector.load %arg23[%c2_189, %c0_190, %c0_191] : memref<4x8x8xbf16, #tpu.memory_space<vmem>>, vector<1x8x8xbf16>
      %290 = vector.shape_cast %289 : vector<1x8x8xbf16> to vector<8x8xbf16>
      %291 = vector.shape_cast %288 : vector<8x8xbf16> to vector<1x8x8xbf16>
      tpu.vector_store %arg23[%c2_189, %c0_190, %c0_191], %291 {strides = array<i32>} : memref<4x8x8xbf16, #tpu.memory_space<vmem>>, vector<1x8x8xbf16>,
      %c3_192 = arith.constant 3 : index
      %c0_193 = arith.constant 0 : index
      %c0_194 = arith.constant 0 : index
      %292 = vector.load %arg7[%c3_192, %c0_193, %c0_194] : memref<4x32x8xbf16, #tpu.memory_space<vmem>>, vector<1x32x8xbf16>
      %293 = vector.shape_cast %292 : vector<1x32x8xbf16> to vector<32x8xbf16>
      %cst_195 = arith.constant dense<0.000000e+00> : vector<8x8xf32>
      %294 = tpu.matmul %225, %293, %cst_195 {dimension_numbers = #tpu.dot_dimension_numbers<[1], [0], [0], [1], [0, 0, 1, 1], [], []>} : vector<8x32xbf16>, vector<32x8xbf16>, vector<8x8xf32> -> vector<8x8xf32>
      %c3_196 = arith.constant 3 : index
      %c0_197 = arith.constant 0 : index
      %c0_198 = arith.constant 0 : index
      %295 = vector.load %arg8[%c3_196, %c0_197, %c0_198] : memref<4x1x8xf32, #tpu.memory_space<vmem>>, vector<1x1x8xf32>
      %296 = vector.shape_cast %295 : vector<1x1x8xf32> to vector<1x8xf32>
      %297 = vector.broadcast %296 : vector<1x8xf32> to vector<8x8xf32>
      %298 = arith.addf %294, %297 : vector<8x8xf32>
      %c3_199 = arith.constant 3 : index
      %c0_200 = arith.constant 0 : index
      %c0_201 = arith.constant 0 : index
      %299 = vector.load %arg9[%c3_199, %c0_200, %c0_201] : memref<4x32x8xbf16, #tpu.memory_space<vmem>>, vector<1x32x8xbf16>
      %300 = vector.shape_cast %299 : vector<1x32x8xbf16> to vector<32x8xbf16>
      %cst_202 = arith.constant dense<0.000000e+00> : vector<8x8xf32>
      %301 = tpu.matmul %225, %300, %cst_202 {dimension_numbers = #tpu.dot_dimension_numbers<[1], [0], [0], [1], [0, 0, 1, 1], [], []>} : vector<8x32xbf16>, vector<32x8xbf16>, vector<8x8xf32> -> vector<8x8xf32>
      %c3_203 = arith.constant 3 : index
      %c0_204 = arith.constant 0 : index
      %c0_205 = arith.constant 0 : index
      %302 = vector.load %arg10[%c3_203, %c0_204, %c0_205] : memref<4x1x8xf32, #tpu.memory_space<vmem>>, vector<1x1x8xf32>
      %303 = vector.shape_cast %302 : vector<1x1x8xf32> to vector<1x8xf32>
      %304 = vector.broadcast %303 : vector<1x8xf32> to vector<8x8xf32>
      %305 = arith.addf %301, %304 : vector<8x8xf32>
      %306 = arith.truncf %298 : vector<8x8xf32> to vector<8x8xbf16>
      %c3_206 = arith.constant 3 : index
      %c0_207 = arith.constant 0 : index
      %c0_208 = arith.constant 0 : index
      %307 = vector.load %arg22[%c3_206, %c0_207, %c0_208] : memref<4x8x8xbf16, #tpu.memory_space<vmem>>, vector<1x8x8xbf16>
      %308 = vector.shape_cast %307 : vector<1x8x8xbf16> to vector<8x8xbf16>
      %309 = vector.shape_cast %306 : vector<8x8xbf16> to vector<1x8x8xbf16>
      tpu.vector_store %arg22[%c3_206, %c0_207, %c0_208], %309 {strides = array<i32>} : memref<4x8x8xbf16, #tpu.memory_space<vmem>>, vector<1x8x8xbf16>,
      %310 = arith.truncf %305 : vector<8x8xf32> to vector<8x8xbf16>
      %c3_209 = arith.constant 3 : index
      %c0_210 = arith.constant 0 : index
      %c0_211 = arith.constant 0 : index
      %311 = vector.load %arg23[%c3_209, %c0_210, %c0_211] : memref<4x8x8xbf16, #tpu.memory_space<vmem>>, vector<1x8x8xbf16>
      %312 = vector.shape_cast %311 : vector<1x8x8xbf16> to vector<8x8xbf16>
      %313 = vector.shape_cast %310 : vector<8x8xbf16> to vector<1x8x8xbf16>
      tpu.vector_store %arg23[%c3_209, %c0_210, %c0_211], %313 {strides = array<i32>} : memref<4x8x8xbf16, #tpu.memory_space<vmem>>, vector<1x8x8xbf16>,
    } else {
    }
    %c0 = arith.constant 0 : index
    %c0_1 = arith.constant 0 : index
    %c0_2 = arith.constant 0 : index
    %3 = vector.load %arg2[%c0, %c0_1, %c0_2] : memref<1x8x32xf32, #tpu.memory_space<vmem>>, vector<1x8x32xf32>
    %4 = vector.shape_cast %3 : vector<1x8x32xf32> to vector<8x32xf32>
    %5 = arith.truncf %4 : vector<8x32xf32> to vector<8x32xbf16>
    %c0_3 = arith.constant 0 : index
    %c0_4 = arith.constant 0 : index
    %c0_5 = arith.constant 0 : index
    %6 = vector.load %arg4[%c0_3, %c0_4, %c0_5] : memref<1x1x8xf32, #tpu.memory_space<vmem>>, vector<1x1x8xf32>
    %7 = vector.shape_cast %6 : vector<1x1x8xf32> to vector<1x8xf32>
    %cst = arith.constant 0.000000e+00 : f32
    %8 = vector.broadcast %cst : f32 to vector<1x8xf32>
    %9 = arith.cmpf oeq, %7, %8 : vector<1x8xf32>
    %cst_6 = arith.constant 0.000000e+00 : f32
    %10 = vector.broadcast %cst_6 : f32 to vector<8x32xf32>
    %c0_7 = arith.constant 0 : index
    %c0_8 = arith.constant 0 : index
    %c0_9 = arith.constant 0 : index
    %11 = vector.load %arg5[%c0_7, %c0_8, %c0_9] : memref<4x32x8xbf16, #tpu.memory_space<vmem>>, vector<1x32x8xbf16>
    %12 = vector.shape_cast %11 : vector<1x32x8xbf16> to vector<32x8xbf16>
    %cst_10 = arith.constant dense<0.000000e+00> : vector<8x8xf32>
    %13 = tpu.matmul %5, %12, %cst_10 {dimension_numbers = #tpu.dot_dimension_numbers<[1], [0], [0], [1], [0, 0, 1, 1], [], []>} : vector<8x32xbf16>, vector<32x8xbf16>, vector<8x8xf32> -> vector<8x8xf32>
    %c0_11 = arith.constant 0 : index
    %c0_12 = arith.constant 0 : index
    %c0_13 = arith.constant 0 : index
    %14 = vector.load %arg6[%c0_11, %c0_12, %c0_13] : memref<4x1x8xf32, #tpu.memory_space<vmem>>, vector<1x1x8xf32>
    %15 = vector.shape_cast %14 : vector<1x1x8xf32> to vector<1x8xf32>
    %16 = vector.broadcast %15 : vector<1x8xf32> to vector<8x8xf32>
    %17 = arith.addf %13, %16 : vector<8x8xf32>
    %18 = arith.truncf %17 : vector<8x8xf32> to vector<8x8xbf16>
    %c0_14 = arith.constant 0 : index
    %c0_15 = arith.constant 0 : index
    %c0_16 = arith.constant 0 : index
    %19 = vector.load %arg22[%c0_14, %c0_15, %c0_16] : memref<4x8x8xbf16, #tpu.memory_space<vmem>>, vector<1x8x8xbf16>
    %20 = vector.shape_cast %19 : vector<1x8x8xbf16> to vector<8x8xbf16>
    %c0_17 = arith.constant 0 : index
    %c0_18 = arith.constant 0 : index
    %c0_19 = arith.constant 0 : index
    %21 = vector.load %arg23[%c0_17, %c0_18, %c0_19] : memref<4x8x8xbf16, #tpu.memory_space<vmem>>, vector<1x8x8xbf16>
    %22 = vector.shape_cast %21 : vector<1x8x8xbf16> to vector<8x8xbf16>
    %cst_20 = arith.constant dense<0.000000e+00> : vector<8x8xf32>
    %23 = tpu.matmul %18, %20, %cst_20 {dimension_numbers = #tpu.dot_dimension_numbers<[1], [1], [0], [0], [0, 0, 1, 0], [], []>} : vector<8x8xbf16>, vector<8x8xbf16>, vector<8x8xf32> -> vector<8x8xf32>
    %cst_21 = arith.constant -1.000000e+09 : f32
    %24 = vector.shape_cast %9 : vector<1x8xi1> to vector<1x8xi1>
    %25 = vector.broadcast %24 : vector<1x8xi1> to vector<8x8xi1>
    %26 = vector.broadcast %cst_21 : f32 to vector<8x8xf32>
    %27 = arith.select %25, %26, %23 : vector<8x8xi1>, vector<8x8xf32>
    %cst_22 = arith.constant dense<0xFF800000> : vector<8xf32>
    %28 = vector.multi_reduction <maximumf>, %27, %cst_22 [1] : vector<8x8xf32> to vector<8xf32>
    %29 = vector.shape_cast %28 : vector<8xf32> to vector<8x1xf32>
    %30 = vector.broadcast %29 : vector<8x1xf32> to vector<8x8xf32>
    %31 = arith.subf %27, %30 : vector<8x8xf32>
    %32 = math.exp %31 : vector<8x8xf32>
    %cst_23 = arith.constant dense<0.000000e+00> : vector<8xf32>
    %33 = vector.multi_reduction <add>, %32, %cst_23 [1] : vector<8x8xf32> to vector<8xf32>
    %34 = vector.shape_cast %33 : vector<8xf32> to vector<8x1xf32>
    %35 = tpu.reciprocal %34 {approx = true} : vector<8x1xf32> -> vector<8x1xf32>
    %36 = vector.broadcast %35 : vector<8x1xf32> to vector<8x8xf32>
    %37 = arith.mulf %32, %36 : vector<8x8xf32>
    %38 = arith.truncf %37 : vector<8x8xf32> to vector<8x8xbf16>
    %cst_24 = arith.constant dense<0.000000e+00> : vector<8x8xf32>
    %39 = tpu.matmul %38, %22, %cst_24 {dimension_numbers = #tpu.dot_dimension_numbers<[1], [0], [0], [1], [0, 0, 1, 1], [], []>} : vector<8x8xbf16>, vector<8x8xbf16>, vector<8x8xf32> -> vector<8x8xf32>
    %40 = arith.truncf %39 : vector<8x8xf32> to vector<8x8xbf16>
    %c0_25 = arith.constant 0 : index
    %c0_26 = arith.constant 0 : index
    %c0_27 = arith.constant 0 : index
    %41 = vector.load %arg11[%c0_25, %c0_26, %c0_27] : memref<4x8x32xbf16, #tpu.memory_space<vmem>>, vector<1x8x32xbf16>
    %42 = vector.shape_cast %41 : vector<1x8x32xbf16> to vector<8x32xbf16>
    %cst_28 = arith.constant dense<0.000000e+00> : vector<8x32xf32>
    %43 = tpu.matmul %40, %42, %cst_28 {dimension_numbers = #tpu.dot_dimension_numbers<[1], [0], [0], [1], [0, 0, 1, 1], [], []>} : vector<8x8xbf16>, vector<8x32xbf16>, vector<8x32xf32> -> vector<8x32xf32>
    %44 = arith.addf %10, %43 : vector<8x32xf32>
    %c1 = arith.constant 1 : index
    %c0_29 = arith.constant 0 : index
    %c0_30 = arith.constant 0 : index
    %45 = vector.load %arg5[%c1, %c0_29, %c0_30] : memref<4x32x8xbf16, #tpu.memory_space<vmem>>, vector<1x32x8xbf16>
    %46 = vector.shape_cast %45 : vector<1x32x8xbf16> to vector<32x8xbf16>
    %cst_31 = arith.constant dense<0.000000e+00> : vector<8x8xf32>
    %47 = tpu.matmul %5, %46, %cst_31 {dimension_numbers = #tpu.dot_dimension_numbers<[1], [0], [0], [1], [0, 0, 1, 1], [], []>} : vector<8x32xbf16>, vector<32x8xbf16>, vector<8x8xf32> -> vector<8x8xf32>
    %c1_32 = arith.constant 1 : index
    %c0_33 = arith.constant 0 : index
    %c0_34 = arith.constant 0 : index
    %48 = vector.load %arg6[%c1_32, %c0_33, %c0_34] : memref<4x1x8xf32, #tpu.memory_space<vmem>>, vector<1x1x8xf32>
    %49 = vector.shape_cast %48 : vector<1x1x8xf32> to vector<1x8xf32>
    %50 = vector.broadcast %49 : vector<1x8xf32> to vector<8x8xf32>
    %51 = arith.addf %47, %50 : vector<8x8xf32>
    %52 = arith.truncf %51 : vector<8x8xf32> to vector<8x8xbf16>
    %c1_35 = arith.constant 1 : index
    %c0_36 = arith.constant 0 : index
    %c0_37 = arith.constant 0 : index
    %53 = vector.load %arg22[%c1_35, %c0_36, %c0_37] : memref<4x8x8xbf16, #tpu.memory_space<vmem>>, vector<1x8x8xbf16>
    %54 = vector.shape_cast %53 : vector<1x8x8xbf16> to vector<8x8xbf16>
    %c1_38 = arith.constant 1 : index
    %c0_39 = arith.constant 0 : index
    %c0_40 = arith.constant 0 : index
    %55 = vector.load %arg23[%c1_38, %c0_39, %c0_40] : memref<4x8x8xbf16, #tpu.memory_space<vmem>>, vector<1x8x8xbf16>
    %56 = vector.shape_cast %55 : vector<1x8x8xbf16> to vector<8x8xbf16>
    %cst_41 = arith.constant dense<0.000000e+00> : vector<8x8xf32>
    %57 = tpu.matmul %52, %54, %cst_41 {dimension_numbers = #tpu.dot_dimension_numbers<[1], [1], [0], [0], [0, 0, 1, 0], [], []>} : vector<8x8xbf16>, vector<8x8xbf16>, vector<8x8xf32> -> vector<8x8xf32>
    %cst_42 = arith.constant -1.000000e+09 : f32
    %58 = vector.shape_cast %9 : vector<1x8xi1> to vector<1x8xi1>
    %59 = vector.broadcast %58 : vector<1x8xi1> to vector<8x8xi1>
    %60 = vector.broadcast %cst_42 : f32 to vector<8x8xf32>
    %61 = arith.select %59, %60, %57 : vector<8x8xi1>, vector<8x8xf32>
    %cst_43 = arith.constant dense<0xFF800000> : vector<8xf32>
    %62 = vector.multi_reduction <maximumf>, %61, %cst_43 [1] : vector<8x8xf32> to vector<8xf32>
    %63 = vector.shape_cast %62 : vector<8xf32> to vector<8x1xf32>
    %64 = vector.broadcast %63 : vector<8x1xf32> to vector<8x8xf32>
    %65 = arith.subf %61, %64 : vector<8x8xf32>
    %66 = math.exp %65 : vector<8x8xf32>
    %cst_44 = arith.constant dense<0.000000e+00> : vector<8xf32>
    %67 = vector.multi_reduction <add>, %66, %cst_44 [1] : vector<8x8xf32> to vector<8xf32>
    %68 = vector.shape_cast %67 : vector<8xf32> to vector<8x1xf32>
    %69 = tpu.reciprocal %68 {approx = true} : vector<8x1xf32> -> vector<8x1xf32>
    %70 = vector.broadcast %69 : vector<8x1xf32> to vector<8x8xf32>
    %71 = arith.mulf %66, %70 : vector<8x8xf32>
    %72 = arith.truncf %71 : vector<8x8xf32> to vector<8x8xbf16>
    %cst_45 = arith.constant dense<0.000000e+00> : vector<8x8xf32>
    %73 = tpu.matmul %72, %56, %cst_45 {dimension_numbers = #tpu.dot_dimension_numbers<[1], [0], [0], [1], [0, 0, 1, 1], [], []>} : vector<8x8xbf16>, vector<8x8xbf16>, vector<8x8xf32> -> vector<8x8xf32>
    %74 = arith.truncf %73 : vector<8x8xf32> to vector<8x8xbf16>
    %c1_46 = arith.constant 1 : index
    %c0_47 = arith.constant 0 : index
    %c0_48 = arith.constant 0 : index
    %75 = vector.load %arg11[%c1_46, %c0_47, %c0_48] : memref<4x8x32xbf16, #tpu.memory_space<vmem>>, vector<1x8x32xbf16>
    %76 = vector.shape_cast %75 : vector<1x8x32xbf16> to vector<8x32xbf16>
    %cst_49 = arith.constant dense<0.000000e+00> : vector<8x32xf32>
    %77 = tpu.matmul %74, %76, %cst_49 {dimension_numbers = #tpu.dot_dimension_numbers<[1], [0], [0], [1], [0, 0, 1, 1], [], []>} : vector<8x8xbf16>, vector<8x32xbf16>, vector<8x32xf32> -> vector<8x32xf32>
    %78 = arith.addf %44, %77 : vector<8x32xf32>
    %c2 = arith.constant 2 : index
    %c0_50 = arith.constant 0 : index
    %c0_51 = arith.constant 0 : index
    %79 = vector.load %arg5[%c2, %c0_50, %c0_51] : memref<4x32x8xbf16, #tpu.memory_space<vmem>>, vector<1x32x8xbf16>
    %80 = vector.shape_cast %79 : vector<1x32x8xbf16> to vector<32x8xbf16>
    %cst_52 = arith.constant dense<0.000000e+00> : vector<8x8xf32>
    %81 = tpu.matmul %5, %80, %cst_52 {dimension_numbers = #tpu.dot_dimension_numbers<[1], [0], [0], [1], [0, 0, 1, 1], [], []>} : vector<8x32xbf16>, vector<32x8xbf16>, vector<8x8xf32> -> vector<8x8xf32>
    %c2_53 = arith.constant 2 : index
    %c0_54 = arith.constant 0 : index
    %c0_55 = arith.constant 0 : index
    %82 = vector.load %arg6[%c2_53, %c0_54, %c0_55] : memref<4x1x8xf32, #tpu.memory_space<vmem>>, vector<1x1x8xf32>
    %83 = vector.shape_cast %82 : vector<1x1x8xf32> to vector<1x8xf32>
    %84 = vector.broadcast %83 : vector<1x8xf32> to vector<8x8xf32>
    %85 = arith.addf %81, %84 : vector<8x8xf32>
    %86 = arith.truncf %85 : vector<8x8xf32> to vector<8x8xbf16>
    %c2_56 = arith.constant 2 : index
    %c0_57 = arith.constant 0 : index
    %c0_58 = arith.constant 0 : index
    %87 = vector.load %arg22[%c2_56, %c0_57, %c0_58] : memref<4x8x8xbf16, #tpu.memory_space<vmem>>, vector<1x8x8xbf16>
    %88 = vector.shape_cast %87 : vector<1x8x8xbf16> to vector<8x8xbf16>
    %c2_59 = arith.constant 2 : index
    %c0_60 = arith.constant 0 : index
    %c0_61 = arith.constant 0 : index
    %89 = vector.load %arg23[%c2_59, %c0_60, %c0_61] : memref<4x8x8xbf16, #tpu.memory_space<vmem>>, vector<1x8x8xbf16>
    %90 = vector.shape_cast %89 : vector<1x8x8xbf16> to vector<8x8xbf16>
    %cst_62 = arith.constant dense<0.000000e+00> : vector<8x8xf32>
    %91 = tpu.matmul %86, %88, %cst_62 {dimension_numbers = #tpu.dot_dimension_numbers<[1], [1], [0], [0], [0, 0, 1, 0], [], []>} : vector<8x8xbf16>, vector<8x8xbf16>, vector<8x8xf32> -> vector<8x8xf32>
    %cst_63 = arith.constant -1.000000e+09 : f32
    %92 = vector.shape_cast %9 : vector<1x8xi1> to vector<1x8xi1>
    %93 = vector.broadcast %92 : vector<1x8xi1> to vector<8x8xi1>
    %94 = vector.broadcast %cst_63 : f32 to vector<8x8xf32>
    %95 = arith.select %93, %94, %91 : vector<8x8xi1>, vector<8x8xf32>
    %cst_64 = arith.constant dense<0xFF800000> : vector<8xf32>
    %96 = vector.multi_reduction <maximumf>, %95, %cst_64 [1] : vector<8x8xf32> to vector<8xf32>
    %97 = vector.shape_cast %96 : vector<8xf32> to vector<8x1xf32>
    %98 = vector.broadcast %97 : vector<8x1xf32> to vector<8x8xf32>
    %99 = arith.subf %95, %98 : vector<8x8xf32>
    %100 = math.exp %99 : vector<8x8xf32>
    %cst_65 = arith.constant dense<0.000000e+00> : vector<8xf32>
    %101 = vector.multi_reduction <add>, %100, %cst_65 [1] : vector<8x8xf32> to vector<8xf32>
    %102 = vector.shape_cast %101 : vector<8xf32> to vector<8x1xf32>
    %103 = tpu.reciprocal %102 {approx = true} : vector<8x1xf32> -> vector<8x1xf32>
    %104 = vector.broadcast %103 : vector<8x1xf32> to vector<8x8xf32>
    %105 = arith.mulf %100, %104 : vector<8x8xf32>
    %106 = arith.truncf %105 : vector<8x8xf32> to vector<8x8xbf16>
    %cst_66 = arith.constant dense<0.000000e+00> : vector<8x8xf32>
    %107 = tpu.matmul %106, %90, %cst_66 {dimension_numbers = #tpu.dot_dimension_numbers<[1], [0], [0], [1], [0, 0, 1, 1], [], []>} : vector<8x8xbf16>, vector<8x8xbf16>, vector<8x8xf32> -> vector<8x8xf32>
    %108 = arith.truncf %107 : vector<8x8xf32> to vector<8x8xbf16>
    %c2_67 = arith.constant 2 : index
    %c0_68 = arith.constant 0 : index
    %c0_69 = arith.constant 0 : index
    %109 = vector.load %arg11[%c2_67, %c0_68, %c0_69] : memref<4x8x32xbf16, #tpu.memory_space<vmem>>, vector<1x8x32xbf16>
    %110 = vector.shape_cast %109 : vector<1x8x32xbf16> to vector<8x32xbf16>
    %cst_70 = arith.constant dense<0.000000e+00> : vector<8x32xf32>
    %111 = tpu.matmul %108, %110, %cst_70 {dimension_numbers = #tpu.dot_dimension_numbers<[1], [0], [0], [1], [0, 0, 1, 1], [], []>} : vector<8x8xbf16>, vector<8x32xbf16>, vector<8x32xf32> -> vector<8x32xf32>
    %112 = arith.addf %78, %111 : vector<8x32xf32>
    %c3 = arith.constant 3 : index
    %c0_71 = arith.constant 0 : index
    %c0_72 = arith.constant 0 : index
    %113 = vector.load %arg5[%c3, %c0_71, %c0_72] : memref<4x32x8xbf16, #tpu.memory_space<vmem>>, vector<1x32x8xbf16>
    %114 = vector.shape_cast %113 : vector<1x32x8xbf16> to vector<32x8xbf16>
    %cst_73 = arith.constant dense<0.000000e+00> : vector<8x8xf32>
    %115 = tpu.matmul %5, %114, %cst_73 {dimension_numbers = #tpu.dot_dimension_numbers<[1], [0], [0], [1], [0, 0, 1, 1], [], []>} : vector<8x32xbf16>, vector<32x8xbf16>, vector<8x8xf32> -> vector<8x8xf32>
    %c3_74 = arith.constant 3 : index
    %c0_75 = arith.constant 0 : index
    %c0_76 = arith.constant 0 : index
    %116 = vector.load %arg6[%c3_74, %c0_75, %c0_76] : memref<4x1x8xf32, #tpu.memory_space<vmem>>, vector<1x1x8xf32>
    %117 = vector.shape_cast %116 : vector<1x1x8xf32> to vector<1x8xf32>
    %118 = vector.broadcast %117 : vector<1x8xf32> to vector<8x8xf32>
    %119 = arith.addf %115, %118 : vector<8x8xf32>
    %120 = arith.truncf %119 : vector<8x8xf32> to vector<8x8xbf16>
    %c3_77 = arith.constant 3 : index
    %c0_78 = arith.constant 0 : index
    %c0_79 = arith.constant 0 : index
    %121 = vector.load %arg22[%c3_77, %c0_78, %c0_79] : memref<4x8x8xbf16, #tpu.memory_space<vmem>>, vector<1x8x8xbf16>
    %122 = vector.shape_cast %121 : vector<1x8x8xbf16> to vector<8x8xbf16>
    %c3_80 = arith.constant 3 : index
    %c0_81 = arith.constant 0 : index
    %c0_82 = arith.constant 0 : index
    %123 = vector.load %arg23[%c3_80, %c0_81, %c0_82] : memref<4x8x8xbf16, #tpu.memory_space<vmem>>, vector<1x8x8xbf16>
    %124 = vector.shape_cast %123 : vector<1x8x8xbf16> to vector<8x8xbf16>
    %cst_83 = arith.constant dense<0.000000e+00> : vector<8x8xf32>
    %125 = tpu.matmul %120, %122, %cst_83 {dimension_numbers = #tpu.dot_dimension_numbers<[1], [1], [0], [0], [0, 0, 1, 0], [], []>} : vector<8x8xbf16>, vector<8x8xbf16>, vector<8x8xf32> -> vector<8x8xf32>
    %cst_84 = arith.constant -1.000000e+09 : f32
    %126 = vector.shape_cast %9 : vector<1x8xi1> to vector<1x8xi1>
    %127 = vector.broadcast %126 : vector<1x8xi1> to vector<8x8xi1>
    %128 = vector.broadcast %cst_84 : f32 to vector<8x8xf32>
    %129 = arith.select %127, %128, %125 : vector<8x8xi1>, vector<8x8xf32>
    %cst_85 = arith.constant dense<0xFF800000> : vector<8xf32>
    %130 = vector.multi_reduction <maximumf>, %129, %cst_85 [1] : vector<8x8xf32> to vector<8xf32>
    %131 = vector.shape_cast %130 : vector<8xf32> to vector<8x1xf32>
    %132 = vector.broadcast %131 : vector<8x1xf32> to vector<8x8xf32>
    %133 = arith.subf %129, %132 : vector<8x8xf32>
    %134 = math.exp %133 : vector<8x8xf32>
    %cst_86 = arith.constant dense<0.000000e+00> : vector<8xf32>
    %135 = vector.multi_reduction <add>, %134, %cst_86 [1] : vector<8x8xf32> to vector<8xf32>
    %136 = vector.shape_cast %135 : vector<8xf32> to vector<8x1xf32>
    %137 = tpu.reciprocal %136 {approx = true} : vector<8x1xf32> -> vector<8x1xf32>
    %138 = vector.broadcast %137 : vector<8x1xf32> to vector<8x8xf32>
    %139 = arith.mulf %134, %138 : vector<8x8xf32>
    %140 = arith.truncf %139 : vector<8x8xf32> to vector<8x8xbf16>
    %cst_87 = arith.constant dense<0.000000e+00> : vector<8x8xf32>
    %141 = tpu.matmul %140, %124, %cst_87 {dimension_numbers = #tpu.dot_dimension_numbers<[1], [0], [0], [1], [0, 0, 1, 1], [], []>} : vector<8x8xbf16>, vector<8x8xbf16>, vector<8x8xf32> -> vector<8x8xf32>
    %142 = arith.truncf %141 : vector<8x8xf32> to vector<8x8xbf16>
    %c3_88 = arith.constant 3 : index
    %c0_89 = arith.constant 0 : index
    %c0_90 = arith.constant 0 : index
    %143 = vector.load %arg11[%c3_88, %c0_89, %c0_90] : memref<4x8x32xbf16, #tpu.memory_space<vmem>>, vector<1x8x32xbf16>
    %144 = vector.shape_cast %143 : vector<1x8x32xbf16> to vector<8x32xbf16>
    %cst_91 = arith.constant dense<0.000000e+00> : vector<8x32xf32>
    %145 = tpu.matmul %142, %144, %cst_91 {dimension_numbers = #tpu.dot_dimension_numbers<[1], [0], [0], [1], [0, 0, 1, 1], [], []>} : vector<8x8xbf16>, vector<8x32xbf16>, vector<8x32xf32> -> vector<8x32xf32>
    %146 = arith.addf %112, %145 : vector<8x32xf32>
    %c0_92 = arith.constant 0 : index
    %c0_93 = arith.constant 0 : index
    %147 = vector.load %arg12[%c0_92, %c0_93] : memref<1x32xf32, #tpu.memory_space<vmem>>, vector<1x32xf32>
    %148 = vector.broadcast %147 : vector<1x32xf32> to vector<8x32xf32>
    %149 = arith.addf %146, %148 : vector<8x32xf32>
    %150 = arith.addf %4, %149 : vector<8x32xf32>
    %c0_94 = arith.constant 0 : index
    %c0_95 = arith.constant 0 : index
    %151 = vector.load %arg13[%c0_94, %c0_95] : memref<1x32xf32, #tpu.memory_space<vmem>>, vector<1x32xf32>
    %c0_96 = arith.constant 0 : index
    %c0_97 = arith.constant 0 : index
    %152 = vector.load %arg14[%c0_96, %c0_97] : memref<1x32xf32, #tpu.memory_space<vmem>>, vector<1x32xf32>
    %cst_98 = arith.constant dense<0.000000e+00> : vector<8xf32>
    %153 = vector.multi_reduction <add>, %150, %cst_98 [1] : vector<8x32xf32> to vector<8xf32>
    %154 = vector.shape_cast %153 : vector<8xf32> to vector<8x1xf32>
    %cst_99 = arith.constant 3.200000e+01 : f32
    %155 = vector.broadcast %cst_99 : f32 to vector<8x1xf32>
    %156 = arith.divf %154, %155 : vector<8x1xf32>
    %157 = vector.broadcast %156 : vector<8x1xf32> to vector<8x32xf32>
    %158 = arith.subf %150, %157 : vector<8x32xf32>
    %159 = arith.mulf %158, %158 : vector<8x32xf32>
    %cst_100 = arith.constant dense<0.000000e+00> : vector<8xf32>
    %160 = vector.multi_reduction <add>, %159, %cst_100 [1] : vector<8x32xf32> to vector<8xf32>
    %161 = vector.shape_cast %160 : vector<8xf32> to vector<8x1xf32>
    %cst_101 = arith.constant 0.0322580636 : f32
    %162 = vector.broadcast %cst_101 : f32 to vector<8x1xf32>
    %163 = arith.mulf %161, %162 : vector<8x1xf32>
    %164 = math.sqrt %163 : vector<8x1xf32>
    %cst_102 = arith.constant 9.99999997E-7 : f32
    %165 = vector.broadcast %cst_102 : f32 to vector<8x1xf32>
    %166 = arith.addf %164, %165 : vector<8x1xf32>
    %167 = vector.broadcast %166 : vector<8x1xf32> to vector<8x32xf32>
    %168 = arith.divf %158, %167 : vector<8x32xf32>
    %169 = vector.broadcast %151 : vector<1x32xf32> to vector<8x32xf32>
    %170 = arith.mulf %169, %168 : vector<8x32xf32>
    %171 = vector.broadcast %152 : vector<1x32xf32> to vector<8x32xf32>
    %172 = arith.addf %170, %171 : vector<8x32xf32>
    %173 = arith.truncf %172 : vector<8x32xf32> to vector<8x32xbf16>
    %c0_103 = arith.constant 0 : index
    %c0_104 = arith.constant 0 : index
    %174 = vector.load %arg15[%c0_103, %c0_104] : memref<32x128xbf16, #tpu.memory_space<vmem>>, vector<32x128xbf16>
    %cst_105 = arith.constant dense<0.000000e+00> : vector<8x128xf32>
    %175 = tpu.matmul %173, %174, %cst_105 {dimension_numbers = #tpu.dot_dimension_numbers<[1], [0], [0], [1], [0, 0, 1, 1], [], []>} : vector<8x32xbf16>, vector<32x128xbf16>, vector<8x128xf32> -> vector<8x128xf32>
    %c0_106 = arith.constant 0 : index
    %c0_107 = arith.constant 0 : index
    %176 = vector.load %arg16[%c0_106, %c0_107] : memref<1x128xf32, #tpu.memory_space<vmem>>, vector<1x128xf32>
    %177 = vector.broadcast %176 : vector<1x128xf32> to vector<8x128xf32>
    %178 = arith.addf %175, %177 : vector<8x128xf32>
    %cst_108 = arith.constant 5.000000e-01 : f32
    %179 = vector.broadcast %cst_108 : f32 to vector<8x128xf32>
    %180 = arith.mulf %179, %178 : vector<8x128xf32>
    %cst_109 = arith.constant 4.471500e-02 : f32
    %181 = vector.broadcast %cst_109 : f32 to vector<8x128xf32>
    %182 = arith.mulf %181, %178 : vector<8x128xf32>
    %183 = arith.mulf %182, %178 : vector<8x128xf32>
    %184 = arith.mulf %183, %178 : vector<8x128xf32>
    %185 = arith.addf %178, %184 : vector<8x128xf32>
    %cst_110 = arith.constant 0.797884583 : f32
    %186 = vector.broadcast %cst_110 : f32 to vector<8x128xf32>
    %187 = arith.mulf %186, %185 : vector<8x128xf32>
    %188 = math.tanh %187 : vector<8x128xf32>
    %cst_111 = arith.constant 1.000000e+00 : f32
    %189 = vector.broadcast %cst_111 : f32 to vector<8x128xf32>
    %190 = arith.addf %189, %188 : vector<8x128xf32>
    %191 = arith.mulf %180, %190 : vector<8x128xf32>
    %192 = arith.truncf %191 : vector<8x128xf32> to vector<8x128xbf16>
    %c0_112 = arith.constant 0 : index
    %c0_113 = arith.constant 0 : index
    %193 = vector.load %arg17[%c0_112, %c0_113] : memref<128x32xbf16, #tpu.memory_space<vmem>>, vector<128x32xbf16>
    %cst_114 = arith.constant dense<0.000000e+00> : vector<8x32xf32>
    %194 = tpu.matmul %192, %193, %cst_114 {dimension_numbers = #tpu.dot_dimension_numbers<[1], [0], [0], [1], [0, 0, 1, 1], [], []>} : vector<8x128xbf16>, vector<128x32xbf16>, vector<8x32xf32> -> vector<8x32xf32>
    %c0_115 = arith.constant 0 : index
    %c0_116 = arith.constant 0 : index
    %195 = vector.load %arg18[%c0_115, %c0_116] : memref<1x32xf32, #tpu.memory_space<vmem>>, vector<1x32xf32>
    %196 = vector.broadcast %195 : vector<1x32xf32> to vector<8x32xf32>
    %197 = arith.addf %194, %196 : vector<8x32xf32>
    %198 = arith.addf %172, %197 : vector<8x32xf32>
    %c0_117 = arith.constant 0 : index
    %c0_118 = arith.constant 0 : index
    %199 = vector.load %arg19[%c0_117, %c0_118] : memref<1x32xf32, #tpu.memory_space<vmem>>, vector<1x32xf32>
    %c0_119 = arith.constant 0 : index
    %c0_120 = arith.constant 0 : index
    %200 = vector.load %arg20[%c0_119, %c0_120] : memref<1x32xf32, #tpu.memory_space<vmem>>, vector<1x32xf32>
    %cst_121 = arith.constant dense<0.000000e+00> : vector<8xf32>
    %201 = vector.multi_reduction <add>, %198, %cst_121 [1] : vector<8x32xf32> to vector<8xf32>
    %202 = vector.shape_cast %201 : vector<8xf32> to vector<8x1xf32>
    %cst_122 = arith.constant 3.200000e+01 : f32
    %203 = vector.broadcast %cst_122 : f32 to vector<8x1xf32>
    %204 = arith.divf %202, %203 : vector<8x1xf32>
    %205 = vector.broadcast %204 : vector<8x1xf32> to vector<8x32xf32>
    %206 = arith.subf %198, %205 : vector<8x32xf32>
    %207 = arith.mulf %206, %206 : vector<8x32xf32>
    %cst_123 = arith.constant dense<0.000000e+00> : vector<8xf32>
    %208 = vector.multi_reduction <add>, %207, %cst_123 [1] : vector<8x32xf32> to vector<8xf32>
    %209 = vector.shape_cast %208 : vector<8xf32> to vector<8x1xf32>
    %cst_124 = arith.constant 0.0322580636 : f32
    %210 = vector.broadcast %cst_124 : f32 to vector<8x1xf32>
    %211 = arith.mulf %209, %210 : vector<8x1xf32>
    %212 = math.sqrt %211 : vector<8x1xf32>
    %cst_125 = arith.constant 9.99999997E-7 : f32
    %213 = vector.broadcast %cst_125 : f32 to vector<8x1xf32>
    %214 = arith.addf %212, %213 : vector<8x1xf32>
    %215 = vector.broadcast %214 : vector<8x1xf32> to vector<8x32xf32>
    %216 = arith.divf %206, %215 : vector<8x32xf32>
    %217 = vector.broadcast %199 : vector<1x32xf32> to vector<8x32xf32>
    %218 = arith.mulf %217, %216 : vector<8x32xf32>
    %219 = vector.broadcast %200 : vector<1x32xf32> to vector<8x32xf32>
    %220 = arith.addf %218, %219 : vector<8x32xf32>
    %c0_126 = arith.constant 0 : index
    %c0_127 = arith.constant 0 : index
    %c0_128 = arith.constant 0 : index
    %221 = vector.load %arg21[%c0_126, %c0_127, %c0_128] : memref<1x8x32xf32, #tpu.memory_space<vmem>>, vector<1x8x32xf32>
    %222 = vector.shape_cast %221 : vector<1x8x32xf32> to vector<8x32xf32>
    %223 = vector.shape_cast %220 : vector<8x32xf32> to vector<1x8x32xf32>
    tpu.vector_store %arg21[%c0_126, %c0_127, %c0_128], %223 {strides = array<i32>} : memref<1x8x32xf32, #tpu.memory_space<vmem>>, vector<1x8x32xf32>,
    return
  }
  func.func @transform_0(%arg0: i32, %arg1: i32) -> (i32, i32, i32) {
    %c0_i32 = arith.constant 0 : i32
    %c0_i32_0 = arith.constant 0 : i32
    return %arg0, %arg1, %c0_i32 : i32, i32, i32
  }
  func.func @transform_1(%arg0: i32, %arg1: i32) -> (i32, i32, i32) {
    %c0_i32 = arith.constant 0 : i32
    %c0_i32_0 = arith.constant 0 : i32
    %c0_i32_1 = arith.constant 0 : i32
    return %arg0, %c0_i32, %c0_i32_0 : i32, i32, i32
  }
  func.func @transform_2(%arg0: i32, %arg1: i32) -> (i32, i32, i32) {
    %c0_i32 = arith.constant 0 : i32
    %c0_i32_0 = arith.constant 0 : i32
    %c0_i32_1 = arith.constant 0 : i32
    return %arg0, %c0_i32, %c0_i32_0 : i32, i32, i32
  }
  func.func @transform_3(%arg0: i32, %arg1: i32) -> (i32, i32, i32) {
    %c0_i32 = arith.constant 0 : i32
    %c0_i32_0 = arith.constant 0 : i32
    %c0_i32_1 = arith.constant 0 : i32
    %c0_i32_2 = arith.constant 0 : i32
    return %c0_i32, %c0_i32_0, %c0_i32_1 : i32, i32, i32
  }
  func.func @transform_4(%arg0: i32, %arg1: i32) -> (i32, i32, i32) {
    %c0_i32 = arith.constant 0 : i32
    %c0_i32_0 = arith.constant 0 : i32
    %c0_i32_1 = arith.constant 0 : i32
    %c0_i32_2 = arith.constant 0 : i32
    return %c0_i32, %c0_i32_0, %c0_i32_1 : i32, i32, i32
  }
  func.func @transform_5(%arg0: i32, %arg1: i32) -> (i32, i32, i32) {
    %c0_i32 = arith.constant 0 : i32
    %c0_i32_0 = arith.constant 0 : i32
    %c0_i32_1 = arith.constant 0 : i32
    %c0_i32_2 = arith.constant 0 : i32
    return %c0_i32, %c0_i32_0, %c0_i32_1 : i32, i32, i32
  }
  func.func @transform_6(%arg0: i32, %arg1: i32) -> (i32, i32, i32) {
    %c0_i32 = arith.constant 0 : i32
    %c0_i32_0 = arith.constant 0 : i32
    %c0_i32_1 = arith.constant 0 : i32
    %c0_i32_2 = arith.constant 0 : i32
    return %c0_i32, %c0_i32_0, %c0_i32_1 : i32, i32, i32
  }
  func.func @transform_7(%arg0: i32, %arg1: i32) -> (i32, i32, i32) {
    %c0_i32 = arith.constant 0 : i32
    %c0_i32_0 = arith.constant 0 : i32
    %c0_i32_1 = arith.constant 0 : i32
    %c0_i32_2 = arith.constant 0 : i32
    return %c0_i32, %c0_i32_0, %c0_i32_1 : i32, i32, i32
  }
  func.func @transform_8(%arg0: i32, %arg1: i32) -> (i32, i32, i32) {
    %c0_i32 = arith.constant 0 : i32
    %c0_i32_0 = arith.constant 0 : i32
    %c0_i32_1 = arith.constant 0 : i32
    %c0_i32_2 = arith.constant 0 : i32
    return %c0_i32, %c0_i32_0, %c0_i32_1 : i32, i32, i32
  }
  func.func @transform_9(%arg0: i32, %arg1: i32) -> (i32, i32, i32) {
    %c0_i32 = arith.constant 0 : i32
    %c0_i32_0 = arith.constant 0 : i32
    %c0_i32_1 = arith.constant 0 : i32
    %c0_i32_2 = arith.constant 0 : i32
    return %c0_i32, %c0_i32_0, %c0_i32_1 : i32, i32, i32
  }
  func.func @transform_10(%arg0: i32, %arg1: i32) -> (i32, i32) {
    %c0_i32 = arith.constant 0 : i32
    %c0_i32_0 = arith.constant 0 : i32
    %c0_i32_1 = arith.constant 0 : i32
    return %c0_i32, %c0_i32_0 : i32, i32
  }
  func.func @transform_11(%arg0: i32, %arg1: i32) -> (i32, i32) {
    %c0_i32 = arith.constant 0 : i32
    %c0_i32_0 = arith.constant 0 : i32
    %c0_i32_1 = arith.constant 0 : i32
    return %c0_i32, %c0_i32_0 : i32, i32
  }
  func.func @transform_12(%arg0: i32, %arg1: i32) -> (i32, i32) {
    %c0_i32 = arith.constant 0 : i32
    %c0_i32_0 = arith.constant 0 : i32
    %c0_i32_1 = arith.constant 0 : i32
    return %c0_i32, %c0_i32_0 : i32, i32
  }
  func.func @transform_13(%arg0: i32, %arg1: i32) -> (i32, i32) {
    %c0_i32 = arith.constant 0 : i32
    %c0_i32_0 = arith.constant 0 : i32
    %c0_i32_1 = arith.constant 0 : i32
    return %c0_i32, %c0_i32_0 : i32, i32
  }
  func.func @transform_14(%arg0: i32, %arg1: i32) -> (i32, i32) {
    %c0_i32 = arith.constant 0 : i32
    %c0_i32_0 = arith.constant 0 : i32
    %c0_i32_1 = arith.constant 0 : i32
    return %c0_i32, %c0_i32_0 : i32, i32
  }
  func.func @transform_15(%arg0: i32, %arg1: i32) -> (i32, i32) {
    %c0_i32 = arith.constant 0 : i32
    %c0_i32_0 = arith.constant 0 : i32
    %c0_i32_1 = arith.constant 0 : i32
    return %c0_i32, %c0_i32_0 : i32, i32
  }
  func.func @transform_16(%arg0: i32, %arg1: i32) -> (i32, i32) {
    %c0_i32 = arith.constant 0 : i32
    %c0_i32_0 = arith.constant 0 : i32
    %c0_i32_1 = arith.constant 0 : i32
    return %c0_i32, %c0_i32_0 : i32, i32
  }
  func.func @transform_17(%arg0: i32, %arg1: i32) -> (i32, i32) {
    %c0_i32 = arith.constant 0 : i32
    %c0_i32_0 = arith.constant 0 : i32
    %c0_i32_1 = arith.constant 0 : i32
    return %c0_i32, %c0_i32_0 : i32, i32
  }
  func.func @transform_18(%arg0: i32, %arg1: i32) -> (i32, i32) {
    %c0_i32 = arith.constant 0 : i32
    %c0_i32_0 = arith.constant 0 : i32
    %c0_i32_1 = arith.constant 0 : i32
    return %c0_i32, %c0_i32_0 : i32, i32
  }
  func.func @transform_19(%arg0: i32, %arg1: i32) -> (i32, i32, i32) {
    %c0_i32 = arith.constant 0 : i32
    %c0_i32_0 = arith.constant 0 : i32
    return %arg0, %arg1, %c0_i32 : i32, i32, i32
  }
}

</mosaic_0001>

<bundles_post_ra>
// kernel: tpu_custom_call.1
= control target key start
LH: loop header
LB: loop body
LE: loop exit
PB: predicated region body
PF: predicated region fallthrough
CT: control target
= control target key end

     0   :  { %s3672_s0 = inlined_call_operand.vmem [shape: f32[2,8,32], index: 0, kind: input, shape index: {}]   ;;  %s3673_s1 = inlined_call_operand.vmem [shape: bf16[2,8,32], index: 1, kind: input, shape index: {}]   ;;  %s3674_s2 = inlined_call_operand.vmem [shape: f32[2,1,8], index: 2, kind: input, shape index: {}]   ;;  %s3675_s3 = inlined_call_operand.vmem [shape: bf16[4,32,8], index: 3, kind: input, shape index: {}]   ;;  %s3676_s4 = inlined_call_operand.vmem [shape: f32[4,1,8], index: 4, kind: input, shape index: {}]   ;;  %s3677_s5 = inlined_call_operand.vmem [shape: bf16[4,32,8], index: 5, kind: input, shape index: {}]   ;;  %s3678_s6 = inlined_call_operand.vmem [shape: f32[4,1,8], index: 6, kind: input, shape index: {}]   ;;  %s3679_s7 = inlined_call_operand.vmem [shape: bf16[4,32,8], index: 7, kind: input, shape index: {}]   ;;  %s3680_s8 = inlined_call_operand.vmem [shape: f32[4,1,8], index: 8, kind: input, shape index: {}]   ;;  %s3681_s9 = inlined_call_operand.vmem [shape: bf16[4,8,32], index: 9, kind: input, shape index: {}]   ;;  %s3682_s10 = inlined_call_operand.vmem [shape: f32[1,32], index: 10, kind: input, shape index: {}]   ;;  %s3683_s11 = inlined_call_operand.vmem [shape: f32[1,32], index: 11, kind: input, shape index: {}]   ;;  %s3684_s12 = inlined_call_operand.vmem [shape: f32[1,32], index: 12, kind: input, shape index: {}]   ;;  %s3685_s13 = inlined_call_operand.vmem [shape: bf16[32,128], index: 13, kind: input, shape index: {}]   ;;  %s3686_s14 = inlined_call_operand.vmem [shape: f32[1,128], index: 14, kind: input, shape index: {}]   ;;  %s3687_s15 = inlined_call_operand.vmem [shape: bf16[128,32], index: 15, kind: input, shape index: {}]   ;;  %s3688_s16 = inlined_call_operand.vmem [shape: f32[1,32], index: 16, kind: input, shape index: {}]   ;;  %s3689_s17 = inlined_call_operand.vmem [shape: f32[1,32], index: 17, kind: input, shape index: {}]   ;;  %s3690_s18 = inlined_call_operand.vmem [shape: f32[1,32], index: 18, kind: input, shape index: {}]   ;;  %s3691_s19 = inlined_call_operand.hbm [shape: f32[2,8,32], index: 19, kind: output, shape index: {}]  }
   0x1   :  { %3698 = sst [smem:[#allocation13_spill]] %s3672_s0 }
   0x2   :  { %3699 = sst [smem:[#allocation14_spill]] %s3673_s1 }
   0x3   :  { %3700 = sst [smem:[#allocation15_spill]] %s3674_s2 }
   0x4   :  { %3701 = sst [smem:[#allocation16_spill]] %s3675_s3 }
   0x5   :  { %3702 = sst [smem:[#allocation17_spill]] %s3676_s4 }
   0x6   :  { %3703 = sst [smem:[#allocation18_spill]] %s3677_s5 }
   0x7   :  { %3704 = sst [smem:[#allocation19_spill]] %s3678_s6 }
   0x8   :  { %24 = vsyncpa [#allocation5], 0 }
   0x9   :  { %26 = vsyncpa [#allocation5 + $0x1], 0  ;;  %s3197_s0 = smov 0   ;;  %s3199_s30 = smov 0  }
   0xa   :  { %s3201_s20 = smov 0   ;;  %s3203_s21 = smov 0  }
   0xb   :  { %s3205_s1 = smov 0   ;;  %s3207_s22 = smov 0  }
   0xc LB: > { %3705 = sst [smem:[#allocation7_spill]] %s3071_s0  ;;  %s2491_s2 = sadd.s32 4294967295, %s3091_s22   ;;  %s3091_s22 = sphi %s3207_s22, %s32_s22   ;;  %s3087_s1 = sphi %s3205_s1, %s3725_s1   ;;  %s3083_s21 = sphi %s3203_s21, %s3728_s21   ;;  %s3079_s20 = sphi %s3201_s20, %s3723_s20   ;;  %s3075_s30 = sphi %s3199_s30, %s3727_s30   ;;  %s3071_s0 = sphi %s3197_s0, %s3726_s0  }
   0xd   : > { %3706 = sst [smem:[#allocation8_spill]] %s3079_s20  ;;  %s2492_s23 = sadd.s32 4294967294, %s3091_s22  }
   0xe   : > { %3707 = sst [smem:[#allocation9_spill]] %s3087_s1  ;;  %s44_s24 = sadd.s32 1, %s3087_s1 }
   0xf   : > { %s469_s25 = sadd.s32 1, %s3079_s20  ;;  %p46_p0 = scmp.ge.s32.totalorder %s44_s24, 2 }
  0x10   : > { %p479_p1 = scmp.ne.s32.totalorder %s3079_s20, %s3075_s30  ;;  %p480_p2 = scmp.eq.s32.totalorder %s2491_s2, 1 }
  0x11   : > { %p485_p3 = scmp.ne.s32.totalorder %s3075_s30, %s3071_s0  ;;  %s3730_s24 = smov (%p46_p0, %s44_s24), 0 }
  0x12   : > { %3708 = sst [smem:[#allocation10_spill]] %s3730_s24  ;;  %p3237_p4 = por %p480_p2, %p479_p1 }
  0x13   : > { %p486_p5 = scmp.eq.s32.totalorder %s2492_s23, 1  ;;  %s464_s26 = ssub.s32 %s3087_s1, %s3730_s24 }
  0x14   : > { %p2495_p6 = scmp.ge.s32.totalorder %s3091_s22, 1  ;;  %p467_p7 = scmp.eq.s32.totalorder %s464_s26, 0 }
  0x15   : > { %p3244_p8 = por %p486_p5, %p485_p3  ;;  %p575_p9 = scmp.lt.s32.totalorder %s3091_s22, 3 }
  0x16   : > { %s3250_s28 = scalar_select %p467_p7, %s3079_s20, %s469_s25  }
  0x17   : > { %s3710_s27 = scalar_select %p3244_p8, 1, 0 }
  0x18   : > { %3712 = sst [smem:[#allocation12_spill]] %s3250_s28  ;;  %p576_p10 = pnand %p2495_p6, %p575_p9 }
  0x19   : > { %3711 = sst [smem:[#allocation11_spill]] %s3710_s27  ;;  %p640_p11 = scmp.lt.s32.totalorder (!%p576_p10), %s3083_s21, 1 }
  0x1a   : > { %579 = sbr.rel (%p576_p10) target bundleno = 4405 (0x1135), region = 96  ;;  %s3713_s5 = sld [smem:[#allocation18_spill]] (!%p576_p10) }
  0x1b   : > { %s3714_s1 = sld [smem:[#allocation14_spill]] (!%p576_p10) }
  0x1c   : > { %s3716_s27 = sld [smem:[#allocation13_spill]] (!%p576_p10) }
  0x1d   : > { %s3717_s6 = sld [smem:[#allocation19_spill]] (!%p576_p10) }
  0x1e   : > { %s3718_s4 = sld [smem:[#allocation17_spill]] (!%p576_p10) }
  0x1f   : > { %v3093_v1 = vmov 0.0   ;;  %vm3094_vm0 = vmmov 0   ;;  %s3267_s25 = scalar_select %p640_p11, %s3083_s21, 1  ;;  %vm683_vm1 = vcmask 261120   ;;  %v2957_v3 = vld [vmem:[%s3679_s7 + $0x8] sm:$0xff]   ;;  %v2958_v5 = vld [vmem:[%s3679_s7] sm:$0xff]  }
  0x20   : > { %v2955_v0 = vld [vmem:[%s3713_s5 + $0x8] sm:$0xff]   ;;  %2701 = vmatprep.subr.bf16.mxu0 %v3093_v1  ;;  %2725 = vmatprep.subr.bf16.mxu1 %v3093_v1  ;;  %v2956_v2 = vld [vmem:[%s3713_s5] sm:$0xff]   ;;  %v2967_v6 = vld [vmem:[%s3679_s7 + $0x18] sm:$0xff]   ;;  %vm791_vm2 = vcmask 60416   ;;  %vm1277_vm3 = vcmask 64512   ;;  %vm1346_vm4 = vcmask 1043456  }
  0x21   : > { %2702 = vmatpush3.bf16.msra.mxu0 %v2955_v0  ;;  %2705 = vmatprep.mubr.msk.bf16.mxu0 %vm3094_vm0, %v3093_v1  ;;  %s2498_s29 = sshll.u32 %s3267_s25, 2  ;;  %v2959_v7 = vld [vmem:[%s3713_s5 + $0x18] sm:$0xff]   ;;  %v2968_v8 = vld [vmem:[%s3679_s7 + $0x10] sm:$0xff]   ;;  %v2969_v10 = vld [vmem:[%s3679_s7 + $0x28] sm:$0xff]   ;;  %s2497_s24 = sshll.u32 %s3267_s25, 3 }
  0x22   : > { %2703 = vmatprep.subr.bf16.mxu0 %v3093_v1  ;;  %2729 = vmatprep.mubr.msk.bf16.mxu1 %vm3094_vm0, %v3093_v1  ;;  %s650_s28 = scalar_lea.vmem %s3714_s1, %s2498_s29  ;;  %v2960_v9 = vld [vmem:[%s3713_s5 + $0x10] sm:$0xff]   ;;  %v2961_v11 = vld [vmem:[%s3713_s5 + $0x28] sm:$0xff]   ;;  %v2962_v12 = vld [vmem:[%s3713_s5 + $0x20] sm:$0xff]   ;;  %s646_s0 = scalar_lea.vmem %s3716_s27, %s2497_s24 }
  0x23   : > { %v3277_v4 = vld [vmem:[%s650_s28] sm:$0xf]  ;;  %2726 = vmatpush3.bf16.msra.mxu1 %v2967_v6  ;;  %v2963_v13 = vld [vmem:[%s3713_s5 + $0x38] sm:$0xff]   ;;  %v2964_v14 = vld [vmem:[%s3713_s5 + $0x30] sm:$0xff]   ;;  %s3715_s28 = sld [smem:[#allocation16_spill]]  ;;  %s637_s27 = sand.u32 1, %s3075_s30  }
  0x24   : > { %2727 = vmatprep.subr.bf16.mxu1 %v3093_v1  ;;  %v3354_v17 = vld [vmem:[%s646_s0] sm:$0xff]  ;;  %v2971_v20 = vld [vmem:[%s3679_s7 + $0x38] sm:$0xff]   ;;  %v2972_v21 = vld [vmem:[%s3679_s7 + $0x30] sm:$0xff]   ;;  %s3719_s1 = sld [smem:[#allocation15_spill]]  ;;  %s2496_s23 = sshll.u32 %s637_s27, 3 }
  0x25   : > { %2704 = vmatpush3.bf16.msra.mxu0 %v2956_v2  ;;  %v3359_v18 = vpack.c.bf16 %v3354_v17, %v3354_v17  ;;  %v2970_v19 = vld [vmem:[%s3679_s7 + $0x20] sm:$0xff]   ;;  %s3096_s24 = smov [#allocation4]  }
  0x26   : > { %2709 = vmatprep.subr.bf16.mxu0 %v3093_v1  ;;  %v2499_v22 = vld [vmem:[%s3717_s6] ss:$0 sm:$0xff]  ;;  %v2521_v34 = vld [vmem:[%s3680_s8 + $0x1] ss:$0 sm:$0xff]  ;;  %v2530_v54 = vld [vmem:[%s3717_s6 + $0x2] ss:$0 sm:$0xff] }
  0x27   : > { %2728 = vmatpush3.bf16.msra.mxu1 %v2968_v8  ;;  %v2503_v29 = vld [vmem:[%s3680_s8] ss:$0 sm:$0xff]  ;;  %v2512_v40 = vld [vmem:[%s3717_s6 + $0x1] ss:$0 sm:$0xff]  ;;  %v2548_v61 = vld [vmem:[%s3717_s6 + $0x3] ss:$0 sm:$0xff] }
  0x28   : > { %2706 = vmatmul.mubr.msk.bf16.vlgmr.msra.gmra.mxu0 %vm683_vm1, %v3277_v4  ;;  %2741 = vmatprep.subr.bf16.mxu1 %v3093_v1  ;;  %s2385_s6 = scalar_lea.sflag [#allocation5], %s637_s27  ;;  %s3019_s2 = sshll.u32 %s3096_s24, 4  ;;  %s3020_s2 = int_to_ptr.vmem [resolvable:$false] %s3019_s2 }
  0x29   : > { %2710 = vmatpush3.bf16.msra.mxu0 %v2957_v3  ;;  %2713 = vmatprep.mubr.msk.bf16.mxu0 %vm3094_vm0, %v3093_v1  ;;  %v2965_v15 = vld [vmem:[%s3715_s28 + $0x8] sm:$0xff]   ;;  %v2966_v16 = vld [vmem:[%s3715_s28] sm:$0xff]  }
  0x2a   : > { %2711 = vmatprep.subr.bf16.mxu0 %v3093_v1  ;;  %2730 = vmatmul.mubr.msk.bf16.vlgmr.msra.gmra.mxu1 %vm683_vm1, %v3277_v4  ;;  %s653_s29 = scalar_lea.vmem %s3719_s1, %s3267_s25  ;;  %s2626_s1 = sshll.u32 %s3083_s21, 7 }
  0x2b   : > { %2742 = vmatpush3.bf16.msra.mxu1 %v2969_v10  ;;  %2745 = vmatprep.mubr.msk.bf16.mxu1 %vm3094_vm0, %v3093_v1  ;;  %s2397_s5 = scalar_lea.hbm %s3691_s19, %s2626_s1  ;;  %s3021_s21 = scalar_lea.vmem %s3020_s2, 256 }
  0x2c   : > { %2743 = vmatprep.subr.bf16.mxu1 %v3093_v1 }
  0x2d   : > { %2712 = vmatpush3.bf16.msra.mxu0 %v2958_v5  ;;  %v2561_v5 = vld [vmem:[%s3718_s4] ss:$0 sm:$0xff] }
  0x2e   : > { %2717 = vmatprep.subr.bf16.mxu0 %v3093_v1 }
  0x2f   : > { %2744 = vmatpush3.bf16.msra.mxu1 %v2970_v19 }
  0x30   : > { %2714 = vmatmul.mubr.msk.bf16.vlgmr.msra.gmra.mxu0 %vm683_vm1, %v3277_v4  ;;  %2757 = vmatprep.subr.bf16.mxu1 %v3093_v1 }
  0x31   : > { %2718 = vmatpush3.bf16.msra.mxu0 %v2959_v7  ;;  %2721 = vmatprep.mubr.msk.bf16.mxu0 %vm3094_vm0, %v3093_v1 }
  0x32   : > { %2719 = vmatprep.subr.bf16.mxu0 %v3093_v1  ;;  %2746 = vmatmul.mubr.msk.bf16.vlgmr.msra.gmra.mxu1 %vm683_vm1, %v3277_v4 }
  0x33   : > { %2758 = vmatpush3.bf16.msra.mxu1 %v2971_v20  ;;  %2761 = vmatprep.mubr.msk.bf16.mxu1 %vm3094_vm0, %v3093_v1 }
  0x34   : > { %2759 = vmatprep.subr.bf16.mxu1 %v3093_v1 }
  0x35   : > { %2720 = vmatpush3.bf16.msra.mxu0 %v2960_v9  ;;  %v2973_v9 = vld [vmem:[%s3715_s28 + $0x18] sm:$0xff]  }
  0x36   : > { %2733 = vmatprep.subr.bf16.mxu0 %v3093_v1 }
  0x37   : > { %2760 = vmatpush3.bf16.msra.mxu1 %v2972_v21 }
  0x38   : > { %2722 = vmatmul.mubr.msk.bf16.vlgmr.msra.gmra.mxu0 %vm683_vm1, %v3277_v4  ;;  %2773 = vmatprep.subr.bf16.mxu1 %v3093_v1 }
  0x39   : > { %2734 = vmatpush3.bf16.msra.mxu0 %v2961_v11  ;;  %2737 = vmatprep.mubr.msk.bf16.mxu0 %vm3094_vm0, %v3093_v1 }
  0x3a   : > { %2735 = vmatprep.subr.bf16.mxu0 %v3093_v1  ;;  %2762 = vmatmul.mubr.msk.bf16.vlgmr.msra.gmra.mxu1 %vm683_vm1, %v3277_v4 }
  0x3b   : > { %2775 = vmatprep.mubr.msk.bf16.mxu1 %vm3094_vm0, %v3093_v1 }
  0x3d   : > { %2736 = vmatpush3.bf16.msra.mxu0 %v2962_v12 }
  0x3e   : > { %2749 = vmatprep.subr.bf16.mxu0 %v3093_v1 }
  0x40   : > { %2738 = vmatmul.mubr.msk.bf16.vlgmr.msra.gmra.mxu0 %vm683_vm1, %v3277_v4 }
  0x41   : > { %2750 = vmatpush3.bf16.msra.mxu0 %v2963_v13  ;;  %2753 = vmatprep.mubr.msk.bf16.mxu0 %vm3094_vm0, %v3093_v1  ;;  %v2974_v13 = vld [vmem:[%s3715_s28 + $0x10] sm:$0xff]  }
  0x42   : > { %2751 = vmatprep.subr.bf16.mxu0 %v3093_v1 }
  0x45   : > { %2752 = vmatpush3.bf16.msra.mxu0 %v2964_v14 }
  0x46   : > { %2765 = vmatprep.subr.bf16.mxu0 %v3093_v1 }
  0x48   : > { %2754 = vmatmul.mubr.msk.bf16.vlgmr.msra.gmra.mxu0 %vm683_vm1, %v3277_v4 }
  0x49   : > { %2766 = vmatpush3.bf16.msra.mxu0 %v2965_v15  ;;  %2769 = vmatprep.mubr.msk.bf16.mxu0 %vm3094_vm0, %v3093_v1 }
  0x4a   : > { %2767 = vmatprep.subr.bf16.mxu0 %v3093_v1 }
  0x4d   : > { %2768 = vmatpush3.bf16.msra.mxu0 %v2966_v16  ;;  %v2539_v16 = vld [vmem:[%s3680_s8 + $0x2] ss:$0 sm:$0xff] }
  0x4e   : > { %2779 = vmatprep.subr.bf16.mxu0 %v3093_v1 }
  0x50   : > { %2770 = vmatmul.mubr.msk.bf16.vlgmr.msra.gmra.mxu0 %vm683_vm1, %v3359_v18 }
  0x51   : > { %2781 = vmatprep.mubr.msk.bf16.mxu0 %vm3094_vm0, %v3093_v1 }
  0xe8   : > { %v721_v23 = vpop.f32.mrf.mxu0 }
  0xe9   : > { %v722_v24 = vadd.f32 %v2499_v22, %v721_v23 }
  0xea   : > { %v2707_v25 = vpop.f32.mrf.mxu0  ;;  %v919_v38 = vpop.f32.mrf.mxu1 }
  0xeb   : > { %v790_v26 = vpack.c.bf16 %v722_v24, %v722_v24  ;;  %v920_v41 = vadd.f32 %v2521_v34, %v919_v38  ;;  %v2557_v25 = vld [vmem:[%s3680_s8 + $0x3] ss:$0 sm:$0xff] }
  0xec   : > { %v724_v27 = vpop.f32.mrf.mxu0  ;;  %v2731_v42 = vpop.f32.mrf.mxu1 }
  0xed   : > { %792 = vst.msk [vmem:[#allocation2] sm:$0xf] %vm791_vm2, %v790_v26  ;;  %v928_v44 = vpack.c.bf16 %v920_v41, %v920_v41 }
  0xee   : > { %v2708_v28 = vpop.f32.mrf.mxu0  ;;  %v922_v46 = vpop.f32.mrf.mxu1 }
  0xef   : > { %930 = vst.msk [vmem:[#allocation3 + $0x4] sm:$0xf] %vm791_vm2, %v928_v44 }
  0xf0   : > { %v784_v30 = vpop.f32.mrf.mxu0  ;;  %v2732_v49 = vpop.f32.mrf.mxu1 }
  0xf1   : > { %v785_v31 = vadd.f32 %v2503_v29, %v784_v30 }
  0xf2   : > { %v2715_v32 = vpop.f32.mrf.mxu0  ;;  %v1055_v19 = vpop.f32.mrf.mxu1 }
  0xf3   : > { %v793_v33 = vpack.c.bf16 %v785_v31, %v785_v31  ;;  %v1056_v20 = vadd.f32 %v2539_v16, %v1055_v19  ;;  %v1325_v32 = vlaneseq }
  0xf4   : > { %v787_v35 = vpop.f32.mrf.mxu0  ;;  %v1275_v36 = vld [vmem:[#allocation2] sm:$0xf]  ;;  %v2747_v21 = vpop.f32.mrf.mxu1 }
  0xf5   : > { %794 = vst.msk [vmem:[#allocation3] sm:$0xf] %vm791_vm2, %v793_v33  ;;  %v1282_v37 = vsel %vm1277_vm3, %v1275_v36, 0  ;;  %v1064_v22 = vpack.c.bf16 %v1056_v20, %v1056_v20  ;;  %v1205_v33 = vld [vmem:[%s653_s29] sm:$0x1]  ;;  %v1326_v34 = vshrl.u32 %v1325_v32, 7 }
  0xf6   : > { %v2716_v39 = vpop.f32.mrf.mxu0  ;;  %2774 = vmatpush3.bf16.xpose.msra.mxu1 %v1282_v37  ;;  %v1461_v14 = vld [vmem:[#allocation3 + $0x4] sm:$0xf]  ;;  %v1058_v23 = vpop.f32.mrf.mxu1  ;;  %vm1206_vm5 = vcmp.eq.f32.partialorder %v1205_v33, 0.0  ;;  %v3095_v36 = vmov 0   ;;  %v1391_v21 = vld [vmem:[%s3681_s9] sm:$0xf] }
  0xf7   : > { %2785 = vmatprep.subr.bf16.mxu1 %v3093_v1  ;;  %v1525_v15 = vsel %vm1346_vm4, %v1461_v14, 0  ;;  %1066 = vst.msk [vmem:[#allocation3 + $0x8] sm:$0xf] %vm791_vm2, %v1064_v22  ;;  %v1327_v35 = vsub.s32 0, %v1326_v34  ;;  %v1324_v37 = vsel %vm1206_vm5, 1, %v3095_v36  ;;  %v2976_v33 = vld [vmem:[%s3715_s28 + $0x20] sm:$0xff]  }
  0xf8   : > { %v854_v43 = vpop.f32.mrf.mxu0  ;;  %v2748_v24 = vpop.f32.mrf.mxu1  ;;  %s639_s29 = scalar_lea.vmem [#allocation4], %s2496_s23 }
  0xf9   : > { %v855_v45 = vadd.f32 %v2512_v40, %v854_v43  ;;  %v3446_v38 = vrot.slane %v1324_v37, %v1327_v35  ;;  %v1620_v24 = vsel %vm1346_vm4, %v1391_v21, 0  ;;  %s2399_s25 = sshll.u32 %s639_s29, 4  ;;  %s2400_s25 = int_to_ptr.vmem [resolvable:$true] %s2399_s25 }
  0xfa   : > { %v2723_v47 = vpop.f32.mrf.mxu0  ;;  %v1191_v26 = vpop.f32.mrf.mxu1  ;;  %s3015_s26 = scalar_lea.vmem %s2400_s25, 128  ;;  %p3022_p1 = scmp.lt.s32.totalorder %s2400_s25, %s3020_s2 }
  0xfb   : > { %v925_v48 = vpack.c.bf16 %v855_v45, %v855_v45  ;;  %v1192_v27 = vadd.f32 %v2557_v25, %v1191_v26  ;;  %vm1329_vm6 = vcmp.eq.s32.totalorder %v3446_v38, 1  ;;  %p3016_p12 = scmp.ne.s32.totalorder %s2400_s25, %s3015_s26  ;;  %p3023_p2 = scmp.lt.s32.totalorder %s3021_s21, %s3015_s26 }
  0xfc   : > { %v857_v50 = vpop.f32.mrf.mxu0  ;;  %v1276_v51 = vld [vmem:[#allocation3] sm:$0xf]  ;;  %v2763_v28 = vpop.f32.mrf.mxu1 }
  0xfd   : > { %927 = vst.msk [vmem:[#allocation2 + $0x4] sm:$0xf] %vm791_vm2, %v925_v48  ;;  %v1348_v52 = vsel %vm1346_vm4, %v1276_v51, 0  ;;  %v1200_v29 = vpack.c.bf16 %v1192_v27, %v1192_v27  ;;  %p3017_p13 = pnand %p3016_p12, %p3237_p4  ;;  %p3024_p3 = por %p3023_p2, %p3022_p1 }
  0xfe   : > { %v2724_v53 = vpop.f32.mrf.mxu0  ;;  %2780 = vmatpush3.bf16.msra.mxu0 %v1348_v52  ;;  %v1194_v30 = vpop.f32.mrf.mxu1  ;;  %v1731_v36 = vld [vmem:[#allocation3 + $0x8] sm:$0xf] }
  0xff   : > { %2793 = vmatprep.subr.bf16.mxu0 %v3093_v1  ;;  %1202 = vst.msk [vmem:[#allocation3 + $0xc] sm:$0xf] %vm791_vm2, %v1200_v29  ;;  %v2975_v29 = vld [vmem:[%s3715_s28 + $0x28] sm:$0xff]   ;;  %p3018_p0 = pneg %p3017_p13 }
 0x100   : > { %v990_v55 = vpop.f32.mrf.mxu0  ;;  %v2764_v31 = vpop.f32.mrf.mxu1 }
 0x101   : > { %v991_v56 = vadd.f32 %v2530_v54, %v990_v55  ;;  %p3025_p5 = pnand %p3024_p3, %p3018_p0 }
 0x102   : > { %v2739_v57 = vpop.f32.mrf.mxu0 }
 0x103   : > { %v1061_v58 = vpack.c.bf16 %v991_v56, %v991_v56  ;;  %v2572_v57 = vld [vmem:[%s3718_s4 + $0x1] ss:$0 sm:$0xff] }
 0x104   : > { %v993_v59 = vpop.f32.mrf.mxu0 }
 0x105   : > { %1063 = vst.msk [vmem:[#allocation2 + $0x8] sm:$0xf] %vm791_vm2, %v1061_v58  ;;  %v1459_v58 = vld [vmem:[#allocation2 + $0x4] sm:$0xf] }
 0x106   : > { %v2740_v60 = vpop.f32.mrf.mxu0 }
 0x108   : > { %v1126_v62 = vpop.f32.mrf.mxu0 }
 0x109   : > { %v1127_v63 = vadd.f32 %v2548_v61, %v1126_v62  ;;  %v1466_v61 = vsel %vm1277_vm3, %v1459_v58, 0 }
 0x10a   : > { %v2755_v0 = vpop.f32.mrf.mxu0 }
 0x10b   : > { %v1197_v2 = vpack.c.bf16 %v1127_v63, %v1127_v63 }
 0x10c   : > { %v1129_v3 = vpop.f32.mrf.mxu0  ;;  %v1729_v25 = vld [vmem:[#allocation2 + $0x8] sm:$0xf] }
 0x10d   : > { %1199 = vst.msk [vmem:[#allocation2 + $0xc] sm:$0xf] %vm791_vm2, %v1197_v2  ;;  %v1736_v27 = vsel %vm1277_vm3, %v1729_v25, 0 }
 0x10e   : > { %v2756_v4 = vpop.f32.mrf.mxu0 }
 0x110   : > { %v1268_v6 = vpop.f32.mrf.mxu0 }
 0x111   : > { %v1269_v7 = vadd.f32 %v2561_v5, %v1268_v6 }
 0x112   : > { %v2771_v8 = vpop.f32.mrf.mxu0 }
 0x113   : > { %v1274_v10 = vpack.c.bf16 %v1269_v7, %v1269_v7 }
 0x114   : > { %v1271_v11 = vpop.f32.mrf.mxu0 }
 0x115   : > { %2776 = vmatmul.mubr.msk.bf16.vlgmr.msra.gmra.mxu1 %vm1277_vm3, %v1274_v10 }
 0x116   : > { %v2772_v12 = vpop.f32.mrf.mxu0  ;;  %2786 = vmatpush3.bf16.msra.mxu1 %v2973_v9  ;;  %2789 = vmatprep.mubr.msk.bf16.mxu1 %vm3094_vm0, %v3093_v1 }
 0x117   : > { %2787 = vmatprep.subr.bf16.mxu1 %v3093_v1 }
 0x11a   : > { %2788 = vmatpush3.bf16.msra.mxu1 %v2974_v13 }
 0x11b   : > { %2799 = vmatprep.subr.bf16.mxu1 %v3093_v1 }
 0x11d   : > { %2790 = vmatmul.mubr.msk.bf16.vlgmr.msra.gmra.mxu1 %vm683_vm1, %v3359_v18 }
 0x11e   : > { %2800 = vmatpush3.bf16.msra.mxu1 %v1525_v15  ;;  %2801 = vmatprep.mubr.msk.bf16.mxu1 %vm3094_vm0, %v3093_v1  ;;  %v2578_v15 = vld [vmem:[%s3681_s9 + $0x4] sm:$0xf] }
 0x11f   : > { %2811 = vmatprep.subr.bf16.mxu1 %v3093_v1  ;;  %v1574_v16 = vsel %vm1346_vm4, %v2578_v15, 0 }
 0x1d5   : > { %v1318_v39 = vpop.f32.mrf.mxu1 }
 0x1d6   : > { %v1330_v40 = vsel %vm1329_vm6, -1e+09, %v1318_v39  ;;  %v1795_v39 = vsel %vm1346_vm4, %v1731_v36, 0 }
 0x1d7   : > { %v2777_v41 = vpop.f32.mrf.mxu1  ;;  %v1331_v42 = vsel %vm1277_vm3, %v1330_v40, -inf }
 0x1d8   : > { %1332 = vmax.xlane.f32.xlu0 %v1331_v42 }
 0x1d9   : > { %v1321_v43 = vpop.f32.mrf.mxu1 }
 0x1db   : > { %v2778_v44 = vpop.f32.mrf.mxu1 }
 0x1dd   : > { %v1451_v50 = vpop.f32.mrf.mxu1 }
 0x1de   : > { %v1452_v60 = vadd.f32 %v2572_v57, %v1451_v50 }
 0x1df   : > { %v2791_v51 = vpop.f32.mrf.mxu1 }
 0x1e0   : > { %v1457_v62 = vpack.c.bf16 %v1452_v60, %v1452_v60 }
 0x1e1   : > { %v1454_v52 = vpop.f32.mrf.mxu1 }
 0x1e3   : > { %v2792_v53 = vpop.f32.mrf.mxu1 }
 0x261   : > { %v1333_v45 = vpop.xlane.xlu0 %1332 }
 0x262   : > { %v1334_v46 = vsub.f32 %v1330_v40, %v1333_v45 }
 0x264   : > { %v1335_v47 = vmul.f32 1.442695, %v1334_v46  ;;  %v2586_v46 = vld [vmem:[%s3718_s4 + $0x2] ss:$0 sm:$0xff] }
 0x266   : > { %2989 = vpow2.f32 %v1335_v47 }
 0x273   : > { %v2990_v48 = vpop.eup %2989 }
 0x274   : > { %v1337_v49 = vsel %vm1277_vm3, %v2990_v48, 0.0 }
 0x275   : > { %1338 = vadd.xlane.f32.xlu0 %v1337_v49 }
 0x2fe   : > { %v1339_v54 = vpop.xlane.xlu0 %1338 }
 0x2ff   : > { %2991 = vrcp.f32 %v1339_v54 }
 0x30c   : > { %v2992_v55 = vpop.eup %2991 }
 0x30d   : > { %v1341_v56 = vmul.f32 %v2992_v55, %v2990_v48 }
 0x30f   : > { %v1342_v59 = vpack.c.bf16 %v1341_v56, %v1341_v56 }
 0x311   : > { %2782 = vmatmul.mubr.msk.bf16.vlgmr.msra.gmra.mxu0 %vm1277_vm3, %v1342_v59 }
 0x312   : > { %2794 = vmatpush3.bf16.xpose.msra.mxu0 %v1466_v61  ;;  %2795 = vmatprep.mubr.msk.bf16.mxu0 %vm3094_vm0, %v3093_v1 }
 0x313   : > { %2805 = vmatprep.subr.bf16.mxu0 %v3093_v1 }
 0x319   : > { %2796 = vmatmul.mubr.msk.bf16.vlgmr.msra.gmra.mxu0 %vm1277_vm3, %v1457_v62 }
 0x31a   : > { %2807 = vmatprep.mubr.msk.bf16.mxu0 %vm3094_vm0, %v3093_v1  ;;  %2806 = vmatpush3.bf16.msra.mxu0 %v1574_v16 }
 0x31b   : > { %2817 = vmatprep.subr.bf16.mxu0 %v3093_v1 }
 0x3d1   : > { %v1384_v63 = vpop.f32.mrf.mxu0 }
 0x3d2   : > { %v1390_v26 = vpack.c.bf16 %v1384_v63, %v1384_v63 }
 0x3d3   : > { %v2783_v0 = vpop.f32.mrf.mxu0 }
 0x3d4   : > { %v2592_v0 = vld [vmem:[%s3681_s9 + $0x8] sm:$0xf] }
 0x3d5   : > { %v1387_v2 = vpop.f32.mrf.mxu0 }
 0x3d6   : > { %v1844_v2 = vsel %vm1346_vm4, %v2592_v0, 0 }
 0x3d7   : > { %v2784_v3 = vpop.f32.mrf.mxu0 }
 0x3d9   : > { %v1502_v4 = vpop.f32.mrf.mxu0 }
 0x3da   : > { %v1508_v5 = vsel %vm1329_vm6, -1e+09, %v1502_v4 }
 0x3db   : > { %v2797_v6 = vpop.f32.mrf.mxu0  ;;  %v1509_v7 = vsel %vm1277_vm3, %v1508_v5, -inf }
 0x3dc   : > { %1510 = vmax.xlane.f32.xlu1 %v1509_v7  ;;  %v2977_v6 = vld [vmem:[%s3715_s28 + $0x38] sm:$0xff]  }
 0x3dd   : > { %v1505_v8 = vpop.f32.mrf.mxu0 }
 0x3de   : > { %v2978_v8 = vld [vmem:[%s3715_s28 + $0x30] sm:$0xff]  }
 0x3df   : > { %v2798_v9 = vpop.f32.mrf.mxu0 }
 0x3e0   : > { %v1956_v9 = vld [vmem:[#allocation3 + $0xc] sm:$0xf] }
 0x465   : > { %v1511_v10 = vpop.xlane.xlu1 %1510 }
 0x466   : > { %v1512_v11 = vsub.f32 %v1508_v5, %v1511_v10  ;;  %v2020_v10 = vsel %vm1346_vm4, %v1956_v9, 0 }
 0x468   : > { %v1513_v12 = vmul.f32 1.442695, %v1512_v11 }
 0x46a   : > { %2993 = vpow2.f32 %v1513_v12  ;;  %v1954_v12 = vld [vmem:[#allocation2 + $0xc] sm:$0xf] }
 0x46b   : > { %v1961_v15 = vsel %vm1277_vm3, %v1954_v12, 0 }
 0x477   : > { %v2994_v13 = vpop.eup %2993 }
 0x478   : > { %v1515_v14 = vsel %vm1277_vm3, %v2994_v13, 0.0 }
 0x479   : > { %1516 = vadd.xlane.f32.xlu1 %v1515_v14 }
 0x502   : > { %v1517_v19 = vpop.xlane.xlu1 %1516 }
 0x503   : > { %2995 = vrcp.f32 %v1517_v19  ;;  %v2599_v19 = vld [vmem:[%s3718_s4 + $0x3] ss:$0 sm:$0xff] }
 0x510   : > { %v2996_v20 = vpop.eup %2995 }
 0x511   : > { %v1519_v22 = vmul.f32 %v2996_v20, %v2994_v13 }
 0x513   : > { %v1520_v23 = vpack.c.bf16 %v1519_v22, %v1519_v22 }
 0x515   : > { %2802 = vmatmul.mubr.msk.bf16.vlgmr.msra.gmra.mxu1 %vm1277_vm3, %v1520_v23 }
 0x516   : > { %2812 = vmatpush3.bf16.msra.mxu1 %v1620_v24  ;;  %2813 = vmatprep.mubr.msk.bf16.mxu1 %vm3094_vm0, %v3093_v1 }
 0x517   : > { %2825 = vmatprep.subr.bf16.mxu1 %v3093_v1 }
 0x51d   : > { %2814 = vmatmul.mubr.msk.bf16.vlgmr.msra.gmra.mxu1 %vm1277_vm3, %v1390_v26 }
 0x51e   : > { %2826 = vmatpush3.bf16.xpose.msra.mxu1 %v1736_v27  ;;  %2827 = vmatprep.mubr.msk.bf16.mxu1 %vm3094_vm0, %v3093_v1 }
 0x51f   : > { %2837 = vmatprep.subr.bf16.mxu1 %v3093_v1 }
 0x5d5   : > { %v1561_v28 = vpop.f32.mrf.mxu1 }
 0x5d6   : > { %v1567_v30 = vpack.c.bf16 %v1561_v28, %v1561_v28 }
 0x5d7   : > { %v2803_v31 = vpop.f32.mrf.mxu1 }
 0x5d8   : > { %2808 = vmatmul.mubr.msk.bf16.vlgmr.msra.gmra.mxu0 %vm1277_vm3, %v1567_v30 }
 0x5d9   : > { %2818 = vmatpush3.bf16.msra.mxu0 %v2975_v29  ;;  %v1564_v32 = vpop.f32.mrf.mxu1  ;;  %2821 = vmatprep.mubr.msk.bf16.mxu0 %vm3094_vm0, %v3093_v1 }
 0x5da   : > { %2819 = vmatprep.subr.bf16.mxu0 %v3093_v1 }
 0x5db   : > { %v2804_v34 = vpop.f32.mrf.mxu1 }
 0x5dd   : > { %2820 = vmatpush3.bf16.msra.mxu0 %v2976_v33  ;;  %v3496_v35 = vpop.f32.mrf.mxu1 }
 0x5de   : > { %2831 = vmatprep.subr.bf16.mxu0 %v3093_v1 }
 0x5df   : > { %v2815_v37 = vpop.f32.mrf.mxu1 }
 0x5e0   : > { %2822 = vmatmul.mubr.msk.bf16.vlgmr.msra.gmra.mxu0 %vm683_vm1, %v3359_v18 }
 0x5e1   : > { %2832 = vmatpush3.bf16.msra.mxu0 %v1795_v39  ;;  %v1659_v40 = vpop.f32.mrf.mxu1  ;;  %2833 = vmatprep.mubr.msk.bf16.mxu0 %vm3094_vm0, %v3093_v1 }
 0x5e2   : > { %2843 = vmatprep.subr.bf16.mxu0 %v3093_v1 }
 0x5e3   : > { %v2816_v41 = vpop.f32.mrf.mxu1 }
 0x698   : > { %v3505_v42 = vpop.f32.mrf.mxu0 }
 0x699   : > { %v1657_v26 = vadd.f32 %v3496_v35, %v3505_v42 }
 0x69a   : > { %v2809_v43 = vpop.f32.mrf.mxu0 }
 0x69c   : > { %v1613_v44 = vpop.f32.mrf.mxu0 }
 0x69d   : > { %v2605_v44 = vld [vmem:[%s3681_s9 + $0xc] sm:$0xf] }
 0x69e   : > { %v2810_v45 = vpop.f32.mrf.mxu0  ;;  %v2069_v38 = vsel %vm1346_vm4, %v2605_v44, 0 }
 0x6a0   : > { %v1721_v47 = vpop.f32.mrf.mxu0 }
 0x6a1   : > { %v1722_v48 = vadd.f32 %v2586_v46, %v1721_v47 }
 0x6a2   : > { %v2823_v49 = vpop.f32.mrf.mxu0 }
 0x6a3   : > { %v1727_v50 = vpack.c.bf16 %v1722_v48, %v1722_v48 }
 0x6a4   : > { %v1724_v51 = vpop.f32.mrf.mxu0 }
 0x6a5   : > { %2828 = vmatmul.mubr.msk.bf16.vlgmr.msra.gmra.mxu1 %vm1277_vm3, %v1727_v50 }
 0x6a6   : > { %v2824_v52 = vpop.f32.mrf.mxu0  ;;  %2839 = vmatprep.mubr.msk.bf16.mxu1 %vm3094_vm0, %v3093_v1  ;;  %2838 = vmatpush3.bf16.msra.mxu1 %v1844_v2 }
 0x6a7   : > { %2851 = vmatprep.subr.bf16.mxu1 %v3093_v1 }
 0x765   : > { %v1772_v53 = vpop.f32.mrf.mxu1 }
 0x766   : > { %v1778_v54 = vsel %vm1329_vm6, -1e+09, %v1772_v53 }
 0x767   : > { %v2829_v55 = vpop.f32.mrf.mxu1  ;;  %v1779_v56 = vsel %vm1277_vm3, %v1778_v54, -inf }
 0x768   : > { %1780 = vmax.xlane.f32.xlu0 %v1779_v56  ;;  %v2607_v55 = vld [vmem:[%s3682_s10] ss:$0 sm:$0xff] }
 0x769   : > { %v1775_v57 = vpop.f32.mrf.mxu1 }
 0x76b   : > { %v2830_v58 = vpop.f32.mrf.mxu1 }
 0x7f1   : > { %v1781_v59 = vpop.xlane.xlu0 %1780 }
 0x7f2   : > { %v1782_v60 = vsub.f32 %v1778_v54, %v1781_v59 }
 0x7f4   : > { %v1783_v61 = vmul.f32 1.442695, %v1782_v60 }
 0x7f6   : > { %2997 = vpow2.f32 %v1783_v61 }
 0x803   : > { %v2998_v62 = vpop.eup %2997 }
 0x804   : > { %v1785_v63 = vsel %vm1277_vm3, %v2998_v62, 0.0 }
 0x805   : > { %1786 = vadd.xlane.f32.xlu1 %v1785_v63 }
 0x88e   : > { %v1787_v3 = vpop.xlane.xlu1 %1786 }
 0x88f   : > { %2999 = vrcp.f32 %v1787_v3 }
 0x89c   : > { %v3000_v4 = vpop.eup %2999 }
 0x89d   : > { %v1789_v5 = vmul.f32 %v3000_v4, %v2998_v62 }
 0x89f   : > { %v1790_v7 = vpack.c.bf16 %v1789_v5, %v1789_v5  ;;  %v2979_v5 = vld [vmem:[%s3685_s13 + $0x8] sm:$0xff]  }
 0x8a1   : > { %2834 = vmatmul.mubr.msk.bf16.vlgmr.msra.gmra.mxu0 %vm1277_vm3, %v1790_v7 }
 0x8a2   : > { %2844 = vmatpush3.bf16.msra.mxu0 %v2977_v6  ;;  %2847 = vmatprep.mubr.msk.bf16.mxu0 %vm3094_vm0, %v3093_v1 }
 0x8a3   : > { %2845 = vmatprep.subr.bf16.mxu0 %v3093_v1 }
 0x8a6   : > { %2846 = vmatpush3.bf16.msra.mxu0 %v2978_v8 }
 0x8a7   : > { %2857 = vmatprep.subr.bf16.mxu0 %v3093_v1 }
 0x8a9   : > { %2848 = vmatmul.mubr.msk.bf16.vlgmr.msra.gmra.mxu0 %vm683_vm1, %v3359_v18 }
 0x8aa   : > { %2858 = vmatpush3.bf16.msra.mxu0 %v2020_v10  ;;  %2859 = vmatprep.mubr.msk.bf16.mxu0 %vm3094_vm0, %v3093_v1 }
 0x8ab   : > { %2869 = vmatprep.subr.bf16.mxu0 %v3093_v1 }
 0x961   : > { %v1831_v11 = vpop.f32.mrf.mxu0 }
 0x962   : > { %v1837_v13 = vpack.c.bf16 %v1831_v11, %v1831_v11 }
 0x963   : > { %v2835_v14 = vpop.f32.mrf.mxu0 }
 0x964   : > { %2840 = vmatmul.mubr.msk.bf16.vlgmr.msra.gmra.mxu1 %vm1277_vm3, %v1837_v13 }
 0x965   : > { %2852 = vmatpush3.bf16.xpose.msra.mxu1 %v1961_v15  ;;  %v1834_v16 = vpop.f32.mrf.mxu0  ;;  %2853 = vmatprep.mubr.msk.bf16.mxu1 %vm3094_vm0, %v3093_v1  ;;  %v2608_v15 = vld [vmem:[%s3683_s11] ss:$0 sm:$0xff] }
 0x966   : > { %2863 = vmatprep.subr.bf16.mxu1 %v3093_v1 }
 0x967   : > { %v2836_v18 = vpop.f32.mrf.mxu0 }
 0x968   : > { %v2609_v18 = vld [vmem:[%s3684_s12] ss:$0 sm:$0xff] }
 0x969   : > { %v1946_v20 = vpop.f32.mrf.mxu0 }
 0x96a   : > { %v1947_v21 = vadd.f32 %v2599_v19, %v1946_v20 }
 0x96b   : > { %v2849_v22 = vpop.f32.mrf.mxu0 }
 0x96c   : > { %v1952_v23 = vpack.c.bf16 %v1947_v21, %v1947_v21  ;;  %v2981_v22 = vld [vmem:[%s3687_s15 + $0x38] sm:$0xff]  }
 0x96d   : > { %v1949_v24 = vpop.f32.mrf.mxu0 }
 0x96e   : > { %2854 = vmatmul.mubr.msk.bf16.vlgmr.msra.gmra.mxu1 %vm1277_vm3, %v1952_v23  ;;  %v2982_v23 = vld [vmem:[%s3687_s15 + $0x30] sm:$0xff]   ;;  %v2983_v24 = vld [vmem:[%s3687_s15 + $0x28] sm:$0xff]  }
 0x96f   : > { %v2850_v25 = vpop.f32.mrf.mxu0  ;;  %2865 = vmatprep.mubr.msk.bf16.mxu1 %vm3094_vm0, %v3093_v1  ;;  %2864 = vmatpush3.bf16.msra.mxu1 %v2069_v38 }
 0x970   : > { %2877 = vmatprep.subr.bf16.mxu1 %v3093_v1  ;;  %v2984_v25 = vld [vmem:[%s3687_s15 + $0x20] sm:$0xff]  }
 0xa24   : > { %v1880_v27 = vpop.f32.mrf.mxu1 }
 0xa25   : > { %v1886_v28 = vadd.f32 %v1880_v27, %v1657_v26  ;;  %v2985_v26 = vld [vmem:[%s3687_s15 + $0x18] sm:$0xff]   ;;  %v2986_v27 = vld [vmem:[%s3687_s15 + $0x10] sm:$0xff]  }
 0xa26   : > { %v2841_v29 = vpop.f32.mrf.mxu1 }
 0xa27   : > { %v2988_v29 = vld [vmem:[%s3687_s15] sm:$0xff]  }
 0xa28   : > { %v1883_v30 = vpop.f32.mrf.mxu1 }
 0xa29   : > { %v2610_v30 = vld [vmem:[%s3686_s14] ss:$0 sm:$0xff] }
 0xa2a   : > { %v2842_v31 = vpop.f32.mrf.mxu1 }
 0xa2e   : > { %v1997_v32 = vpop.f32.mrf.mxu1 }
 0xa2f   : > { %v2003_v33 = vsel %vm1329_vm6, -1e+09, %v1997_v32 }
 0xa30   : > { %v2855_v34 = vpop.f32.mrf.mxu1  ;;  %v2004_v36 = vsel %vm1277_vm3, %v2003_v33, -inf }
 0xa31   : > { %2005 = vmax.xlane.f32.xlu0 %v2004_v36 }
 0xa32   : > { %v2000_v37 = vpop.f32.mrf.mxu1 }
 0xa34   : > { %v2856_v39 = vpop.f32.mrf.mxu1 }
 0xaba   : > { %v2006_v40 = vpop.xlane.xlu0 %2005 }
 0xabb   : > { %v2007_v41 = vsub.f32 %v2003_v33, %v2006_v40 }
 0xabd   : > { %v2008_v43 = vmul.f32 1.442695, %v2007_v41 }
 0xabf   : > { %3001 = vpow2.f32 %v2008_v43 }
 0xacc   : > { %v3002_v35 = vpop.eup %3001 }
 0xacd   : > { %v2010_v42 = vsel %vm1277_vm3, %v3002_v35, 0.0 }
 0xace   : > { %2011 = vadd.xlane.f32.xlu1 %v2010_v42 }
 0xb57   : > { %v2012_v45 = vpop.xlane.xlu1 %2011 }
 0xb58   : > { %3003 = vrcp.f32 %v2012_v45  ;;  %v2614_v45 = vld [vmem:[%s3688_s16] ss:$0 sm:$0xff] }
 0xb65   : > { %v3004_v46 = vpop.eup %3003 }
 0xb66   : > { %v2014_v47 = vmul.f32 %v3004_v46, %v3002_v35 }
 0xb68   : > { %v2015_v48 = vpack.c.bf16 %v2014_v47, %v2014_v47 }
 0xb6a   : > { %2860 = vmatmul.mubr.msk.bf16.vlgmr.msra.gmra.mxu0 %vm1277_vm3, %v2015_v48 }
 0xb6b   : > { %2873 = vmatprep.mubr.msk.bf16.mxu0 %vm3094_vm0, %v3093_v1  ;;  %2870 = vmatpush3.bf16.msra.mxu0 %v2979_v5 }
 0xb6c   : > { %2871 = vmatprep.subr.bf16.mxu0 %v3093_v1 }
 0xc2a   : > { %v2056_v49 = vpop.f32.mrf.mxu0 }
 0xc2b   : > { %v2062_v50 = vpack.c.bf16 %v2056_v49, %v2056_v49 }
 0xc2c   : > { %v2861_v51 = vpop.f32.mrf.mxu0 }
 0xc2d   : > { %2866 = vmatmul.mubr.msk.bf16.vlgmr.msra.gmra.mxu1 %vm1277_vm3, %v2062_v50 }
 0xc2e   : > { %v2059_v52 = vpop.f32.mrf.mxu0  ;;  %2893 = vmatprep.mubr.msk.bf16.mxu1 %vm3094_vm0, %v3093_v1  ;;  %2878 = vmatpush3.bf16.msra.mxu1 %v2981_v22 }
 0xc2f   : > { %2879 = vmatprep.subr.bf16.mxu1 %v3093_v1 }
 0xc30   : > { %v2862_v53 = vpop.f32.mrf.mxu0 }
 0xc32   : > { %2880 = vmatpush3.bf16.msra.mxu1 %v2982_v23 }
 0xc33   : > { %2881 = vmatprep.subr.bf16.mxu1 %v3093_v1 }
 0xc36   : > { %2882 = vmatpush3.bf16.msra.mxu1 %v2983_v24 }
 0xc37   : > { %2883 = vmatprep.subr.bf16.mxu1 %v3093_v1 }
 0xc3a   : > { %2884 = vmatpush3.bf16.msra.mxu1 %v2984_v25 }
 0xc3b   : > { %2885 = vmatprep.subr.bf16.mxu1 %v3093_v1 }
 0xc3e   : > { %2886 = vmatpush3.bf16.msra.mxu1 %v2985_v26 }
 0xc3f   : > { %2887 = vmatprep.subr.bf16.mxu1 %v3093_v1 }
 0xc42   : > { %2888 = vmatpush3.bf16.msra.mxu1 %v2986_v27 }
 0xc43   : > { %2889 = vmatprep.subr.bf16.mxu1 %v3093_v1 }
 0xced   : > { %v2105_v54 = vpop.f32.mrf.mxu1 }
 0xcee   : > { %v2111_v56 = vadd.f32 %v2105_v54, %v1886_v28  ;;  %v2987_v28 = vld [vmem:[%s3687_s15 + $0x8] sm:$0xff]  }
 0xcef   : > { %v2867_v57 = vpop.f32.mrf.mxu1  ;;  %2890 = vmatpush3.bf16.msra.mxu1 %v2987_v28 }
 0xcf0   : > { %v2119_v58 = vadd.f32 %v2607_v55, %v2111_v56  ;;  %2891 = vmatprep.subr.bf16.mxu1 %v3093_v1 }
 0xcf1   : > { %v2108_v59 = vpop.f32.mrf.mxu1 }
 0xcf2   : > { %v2120_v60 = vadd.f32 %v2119_v58, %v3354_v17  ;;  %v2980_v17 = vld [vmem:[%s3685_s13] sm:$0xff]  }
 0xcf3   : > { %v2868_v61 = vpop.f32.mrf.mxu1  ;;  %2872 = vmatpush3.bf16.msra.mxu0 %v2980_v17  ;;  %2892 = vmatpush3.bf16.msra.mxu1 %v2988_v29  ;;  %v2624_v17 = vld [vmem:[%s3690_s18] ss:$0 sm:$0xff] }
 0xcf4   : > { %v2123_v62 = vsel %vm683_vm1, %v2120_v60, 0.0 }
 0xcf5   : > { %2124 = vadd.xlane.f32.xlu0 %v2123_v62 }
 0xd7e   : > { %v2125_v63 = vpop.xlane.xlu0 %2124 }
 0xd7f   : > { %v2127_v0 = vmul.f32 0.03125, %v2125_v63 }
 0xd81   : > { %v2128_v2 = vsub.f32 %v2120_v60, %v2127_v0 }
 0xd83   : > { %v2129_v3 = vmul.f32 %v2128_v2, %v2128_v2 }
 0xd85   : > { %v2130_v4 = vsel %vm683_vm1, %v2129_v3, 0.0 }
 0xd86   : > { %2131 = vadd.xlane.f32.xlu1 %v2130_v4  ;;  %v2623_v4 = vld [vmem:[%s3689_s17] ss:$0 sm:$0xff] }
 0xe0f   : > { %v2132_v6 = vpop.xlane.xlu1 %2131 }
 0xe10   : > { %v2133_v7 = vmul.f32 0.032258064, %v2132_v6 }
 0xe12   : > { %3005 = vrsqrt.f32 %v2133_v7  ;;  %vm2136_vm7 = vcmp.eq.f32.partialorder %v2133_v7, inf  ;;  %v2139_v10 = vand.u32 2147483648, %v2133_v7  ;;  %vm2138_vm8 = vcmp.eq.f32.partialorder %v2133_v7, 0.0 }
 0xe1f   : > { %v3006_v8 = vpop.eup %3005 }
 0xe20   : > { %v2135_v9 = vmul.f32 %v3006_v8, %v2133_v7 }
 0xe22   : > { %v2137_v11 = vsel %vm2136_vm7, %v2133_v7, %v2135_v9 }
 0xe23   : > { %v2140_v12 = vsel %vm2138_vm8, %v2139_v10, %v2137_v11 }
 0xe24   : > { %v2141_v13 = vadd.f32 1e-06, %v2140_v12 }
 0xe26   : > { %3007 = vrcp.f32 %v2141_v13 }
 0xe33   : > { %v3008_v14 = vpop.eup %3007 }
 0xe34   : > { %v2143_v16 = vmul.f32 %v3008_v14, %v2128_v2 }
 0xe36   : > { %v2150_v19 = vmul.f32 %v2608_v15, %v2143_v16 }
 0xe38   : > { %v2157_v20 = vadd.f32 %v2609_v18, %v2150_v19 }
 0xe3a   : > { %v2158_v21 = vpack.c.bf16 %v2157_v20, %v2157_v20 }
 0xe3c   : > { %2874 = vmatmul.mubr.msk.bf16.vlgmr.msra.gmra.mxu0 %vm683_vm1, %v2158_v21 }
 0xefc   : > { %v2219_v31 = vpop.f32.mrf.mxu0 }
 0xefd   : > { %v2220_v32 = vadd.f32 %v2610_v30, %v2219_v31 }
 0xefe   : > { %v2875_v33 = vpop.f32.mrf.mxu0 }
 0xeff   : > { %v2226_v34 = vmul.f32 0.044715, %v2220_v32  ;;  %v2225_v42 = vmul.f32 0.5, %v2220_v32 }
 0xf00   : > { %v2222_v36 = vpop.f32.mrf.mxu0 }
 0xf01   : > { %v2227_v37 = vmul.f32 %v2226_v34, %v2220_v32 }
 0xf02   : > { %v2876_v39 = vpop.f32.mrf.mxu0 }
 0xf03   : > { %v2228_v40 = vmul.f32 %v2227_v37, %v2220_v32 }
 0xf05   : > { %v2229_v41 = vadd.f32 %v2228_v40, %v2220_v32 }
 0xf07   : > { %v2230_v43 = vmul.f32 0.7978846, %v2229_v41 }
 0xf09   : > { %3009 = vtanh.f32 %v2230_v43 }
 0xf16   : > { %v3010_v35 = vpop.eup %3009 }
 0xf17   : > { %v2232_v44 = vadd.f32 1.0, %v3010_v35 }
 0xf19   : > { %v2233_v1 = vmul.f32 %v2232_v44, %v2225_v42 }
 0xf1b   : > { %v2234_v38 = vpack.c.bf16 %v2233_v1, %v2233_v1 }
 0xf1d   : > { %2894 = vmatmul.mubr.bf16.vlgmr.msra.gmra.mxu1 %v2234_v38 }
 0xfdd   : > { %v2340_v46 = vpop.f32.mrf.mxu1 }
 0xfde   : > { %v2341_v47 = vadd.f32 %v2614_v45, %v2340_v46 }
 0xfdf   : > { %v2895_v48 = vpop.f32.mrf.mxu1 }
 0xfe0   : > { %v2346_v49 = vadd.f32 %v2341_v47, %v2157_v20 }
 0xfe1   : > { %v2343_v50 = vpop.f32.mrf.mxu1 }
 0xfe2   : > { %v2349_v51 = vsel %vm683_vm1, %v2346_v49, 0.0 }
 0xfe3   : > { %2350 = vadd.xlane.f32.xlu0 %v2349_v51  ;;  %v2896_v52 = vpop.f32.mrf.mxu1 }
0x106c   : > { %v2351_v53 = vpop.xlane.xlu0 %2350 }
0x106d   : > { %v2352_v54 = vmul.f32 0.03125, %v2351_v53 }
0x106f   : > { %v2353_v55 = vsub.f32 %v2346_v49, %v2352_v54 }
0x1071   : > { %v2354_v56 = vmul.f32 %v2353_v55, %v2353_v55 }
0x1073   : > { %v2355_v57 = vsel %vm683_vm1, %v2354_v56, 0.0 }
0x1074   : > { %2356 = vadd.xlane.f32.xlu1 %v2355_v57 }
0x10fd   : > { %v2357_v58 = vpop.xlane.xlu1 %2356 }
0x10fe   : > { %v2358_v59 = vmul.f32 0.032258064, %v2357_v58 }
0x1100   : > { %3011 = vrsqrt.f32 %v2358_v59  ;;  %vm2361_vm9 = vcmp.eq.f32.partialorder %v2358_v59, inf  ;;  %v2364_v62 = vand.u32 2147483648, %v2358_v59  ;;  %vm2363_vm10 = vcmp.eq.f32.partialorder %v2358_v59, 0.0 }
0x110d   : > { %v3012_v60 = vpop.eup %3011 }
0x110e   : > { %v2360_v61 = vmul.f32 %v3012_v60, %v2358_v59 }
0x1110   : > { %v2362_v63 = vsel %vm2361_vm9, %v2358_v59, %v2360_v61 }
0x1111   : > { %v2365_v0 = vsel %vm2363_vm10, %v2364_v62, %v2362_v63 }
0x1112   : > { %v2366_v2 = vadd.f32 1e-06, %v2365_v0 }
0x1114   : > { %3013 = vrcp.f32 %v2366_v2 }
0x1121   : > { %v3014_v3 = vpop.eup %3013 }
0x1122   : > { %v2368_v5 = vmul.f32 %v3014_v3, %v2353_v55 }
0x1124   : > { %v2375_v6 = vmul.f32 %v2623_v4, %v2368_v5 }
0x1126   : > { %v2382_v7 = vadd.f32 %v2624_v17, %v2375_v6 }
0x1128   : > { %2383 = vst.msk [vmem:[%s639_s29] sm:$0xff] %vm683_vm1, %v2382_v7 }
0x1129   : > { %3028 = shalt.err (!%p3025_p5)
}
0x112a   : > { %s3029_s4 = scalar_lea.hbm %s2397_s5, 128  ;;  %s3033_s0 = scalar_lea.hbm %s3691_s19, 256 }
0x112b   : > { %p3030_p6 = scmp.ne.s32.totalorder %s2397_s5, %s3029_s4  ;;  %p3034_p10 = scmp.lt.s32.totalorder %s2397_s5, %s3691_s19 }
0x112c   : > { %p3035_p11 = scmp.lt.s32.totalorder %s3033_s0, %s3029_s4 }
0x112d   : > { %p3031_p7 = pnand %p3030_p6, %p3237_p4 }
0x112e   : > { %p3036_p12 = por %p3035_p11, %p3034_p10 }
0x112f   : > { %p3032_p9 = pneg %p3031_p7 }
0x1131   : > { %p3037_p13 = pnand %p3036_p12, %p3032_p9 }
0x1133   : > { %3040 = shalt.err (!%p3037_p13)
}
0x1134   : > { %2897 = dma.vmem_to_hbm [thread:$0]  (%p3237_p4), %s2400_s25, 128, %s2397_s5, %s2385_s6  }
0x1135 PF: > { %s3720_s20 = sld [smem:[#allocation7_spill]]  ;;  %p2903_p0 = scmp.ge.s32.totalorder %s3091_s22, 2 }
0x1137   : > { %p2900_p1 = pnand %p2903_p0, %p3244_p8 }
0x1139   : > { %p2901_p2 = pneg %p2900_p1 }
0x113b   : > { %s2411_s24 = sand.u32 1, %s3720_s20  }
0x113c   : > { %s2412_s2 = scalar_lea.sflag [#allocation5], %s2411_s24 }
0x113d   : > { %3066 = dma.done.wait (%p2901_p2), %s2412_s2, 128  }
0x113e   : > { %3068 = vsyncadd (%p2901_p2), %s2412_s2, 4294967168  ;;  %s32_s22 = sadd.s32 1, %s3091_s22   ;;  %s3722_s21 = sld [smem:[#allocation8_spill]] }
0x113f   : > { %p29_p3 = scmp.ge.s32.totalorder %s32_s22, 4   ;;  %s3723_s20 = sld [smem:[#allocation12_spill]] }
0x1140   : > { %s3724_s3 = sld [smem:[#allocation9_spill]]  ;;  %s3726_s0 = smov %s3075_s30 }
0x1141   : > { %s3725_s1 = sld [smem:[#allocation10_spill]] }
0x1142   :  { %31 = sbr.rel (!%p29_p3) target bundleno = 12 (0xc), region = 174 }
0x1144   : > { %s3727_s30 = smov %s3722_s21 }
0x1146   : > { %s3728_s21 = smov %s3724_s3 }
0x1147   :  { %2417 = vsyncpa [#allocation5], 1 }
0x1148   :  { %2419 = vsyncpa [#allocation5 + $0x1], 1 }

// kernel: tpu_custom_call.1
= control target key start
LH: loop header
LB: loop body
LE: loop exit
PB: predicated region body
PF: predicated region fallthrough
CT: control target
= control target key end

     0   :  { %s3672_s0 = inlined_call_operand.vmem [shape: f32[2,8,32], index: 0, kind: input, shape index: {}]   ;;  %s3673_s1 = inlined_call_operand.vmem [shape: bf16[2,8,32], index: 1, kind: input, shape index: {}]   ;;  %s3674_s2 = inlined_call_operand.vmem [shape: f32[2,1,8], index: 2, kind: input, shape index: {}]   ;;  %s3675_s3 = inlined_call_operand.vmem [shape: bf16[4,32,8], index: 3, kind: input, shape index: {}]   ;;  %s3676_s4 = inlined_call_operand.vmem [shape: f32[4,1,8], index: 4, kind: input, shape index: {}]   ;;  %s3677_s5 = inlined_call_operand.vmem [shape: bf16[4,32,8], index: 5, kind: input, shape index: {}]   ;;  %s3678_s6 = inlined_call_operand.vmem [shape: f32[4,1,8], index: 6, kind: input, shape index: {}]   ;;  %s3679_s7 = inlined_call_operand.vmem [shape: bf16[4,32,8], index: 7, kind: input, shape index: {}]   ;;  %s3680_s8 = inlined_call_operand.vmem [shape: f32[4,1,8], index: 8, kind: input, shape index: {}]   ;;  %s3681_s9 = inlined_call_operand.vmem [shape: bf16[4,8,32], index: 9, kind: input, shape index: {}]   ;;  %s3682_s10 = inlined_call_operand.vmem [shape: f32[1,32], index: 10, kind: input, shape index: {}]   ;;  %s3683_s11 = inlined_call_operand.vmem [shape: f32[1,32], index: 11, kind: input, shape index: {}]   ;;  %s3684_s12 = inlined_call_operand.vmem [shape: f32[1,32], index: 12, kind: input, shape index: {}]   ;;  %s3685_s13 = inlined_call_operand.vmem [shape: bf16[32,128], index: 13, kind: input, shape index: {}]   ;;  %s3686_s14 = inlined_call_operand.vmem [shape: f32[1,128], index: 14, kind: input, shape index: {}]   ;;  %s3687_s15 = inlined_call_operand.vmem [shape: bf16[128,32], index: 15, kind: input, shape index: {}]   ;;  %s3688_s16 = inlined_call_operand.vmem [shape: f32[1,32], index: 16, kind: input, shape index: {}]   ;;  %s3689_s17 = inlined_call_operand.vmem [shape: f32[1,32], index: 17, kind: input, shape index: {}]   ;;  %s3690_s18 = inlined_call_operand.vmem [shape: f32[1,32], index: 18, kind: input, shape index: {}]   ;;  %s3691_s19 = inlined_call_operand.hbm [shape: f32[2,8,32], index: 19, kind: output, shape index: {}]  }
   0x1   :  { %3698 = sst [smem:[#allocation13_spill]] %s3672_s0 }
   0x2   :  { %3699 = sst [smem:[#allocation14_spill]] %s3673_s1 }
   0x3   :  { %3700 = sst [smem:[#allocation15_spill]] %s3674_s2 }
   0x4   :  { %3701 = sst [smem:[#allocation16_spill]] %s3675_s3 }
   0x5   :  { %3702 = sst [smem:[#allocation17_spill]] %s3676_s4 }
   0x6   :  { %3703 = sst [smem:[#allocation18_spill]] %s3677_s5 }
   0x7   :  { %3704 = sst [smem:[#allocation19_spill]] %s3678_s6 }
   0x8   :  { %24 = vsyncpa [#allocation5], 0 }
   0x9   :  { %26 = vsyncpa [#allocation5 + $0x1], 0  ;;  %s3197_s0 = smov 0   ;;  %s3199_s30 = smov 0  }
   0xa   :  { %s3201_s20 = smov 0   ;;  %s3203_s21 = smov 0  }
   0xb   :  { %s3205_s1 = smov 0   ;;  %s3207_s22 = smov 0  }
   0xc LB: > { %3705 = sst [smem:[#allocation7_spill]] %s3071_s0  ;;  %s2491_s2 = sadd.s32 4294967295, %s3091_s22   ;;  %s3091_s22 = sphi %s3207_s22, %s32_s22   ;;  %s3087_s1 = sphi %s3205_s1, %s3725_s1   ;;  %s3083_s21 = sphi %s3203_s21, %s3728_s21   ;;  %s3079_s20 = sphi %s3201_s20, %s3723_s20   ;;  %s3075_s30 = sphi %s3199_s30, %s3727_s30   ;;  %s3071_s0 = sphi %s3197_s0, %s3726_s0  }
   0xd   : > { %3706 = sst [smem:[#allocation8_spill]] %s3079_s20  ;;  %s2492_s23 = sadd.s32 4294967294, %s3091_s22  }
   0xe   : > { %3707 = sst [smem:[#allocation9_spill]] %s3087_s1  ;;  %s44_s24 = sadd.s32 1, %s3087_s1 }
   0xf   : > { %s469_s25 = sadd.s32 1, %s3079_s20  ;;  %p46_p0 = scmp.ge.s32.totalorder %s44_s24, 2 }
  0x10   : > { %p479_p1 = scmp.ne.s32.totalorder %s3079_s20, %s3075_s30  ;;  %p480_p2 = scmp.eq.s32.totalorder %s2491_s2, 1 }
  0x11   : > { %p485_p3 = scmp.ne.s32.totalorder %s3075_s30, %s3071_s0  ;;  %s3730_s24 = smov (%p46_p0, %s44_s24), 0 }
  0x12   : > { %3708 = sst [smem:[#allocation10_spill]] %s3730_s24  ;;  %p3237_p4 = por %p480_p2, %p479_p1 }
  0x13   : > { %p486_p5 = scmp.eq.s32.totalorder %s2492_s23, 1  ;;  %s464_s26 = ssub.s32 %s3087_s1, %s3730_s24 }
  0x14   : > { %p2495_p6 = scmp.ge.s32.totalorder %s3091_s22, 1  ;;  %p467_p7 = scmp.eq.s32.totalorder %s464_s26, 0 }
  0x15   : > { %p3244_p8 = por %p486_p5, %p485_p3  ;;  %p575_p9 = scmp.lt.s32.totalorder %s3091_s22, 3 }
  0x16   : > { %s3250_s28 = scalar_select %p467_p7, %s3079_s20, %s469_s25  }
  0x17   : > { %s3710_s27 = scalar_select %p3244_p8, 1, 0 }
  0x18   : > { %3712 = sst [smem:[#allocation12_spill]] %s3250_s28  ;;  %p576_p10 = pnand %p2495_p6, %p575_p9 }
  0x19   : > { %3711 = sst [smem:[#allocation11_spill]] %s3710_s27  ;;  %p640_p11 = scmp.lt.s32.totalorder (!%p576_p10), %s3083_s21, 1 }
  0x1a   : > { %579 = sbr.rel (%p576_p10) target bundleno = 4405 (0x1135), region = 96  ;;  %s3713_s5 = sld [smem:[#allocation18_spill]] (!%p576_p10) }
  0x1b   : > { %s3714_s1 = sld [smem:[#allocation14_spill]] (!%p576_p10) }
  0x1c   : > { %s3716_s27 = sld [smem:[#allocation13_spill]] (!%p576_p10) }
  0x1d   : > { %s3717_s6 = sld [smem:[#allocation19_spill]] (!%p576_p10) }
  0x1e   : > { %s3718_s4 = sld [smem:[#allocation17_spill]] (!%p576_p10) }
  0x1f   : > { %v3093_v1 = vmov 0.0   ;;  %vm3094_vm0 = vmmov 0   ;;  %s3267_s25 = scalar_select %p640_p11, %s3083_s21, 1  ;;  %vm683_vm1 = vcmask 261120   ;;  %v2957_v3 = vld [vmem:[%s3679_s7 + $0x8] sm:$0xff]   ;;  %v2958_v5 = vld [vmem:[%s3679_s7] sm:$0xff]  }
  0x20   : > { %v2955_v0 = vld [vmem:[%s3713_s5 + $0x8] sm:$0xff]   ;;  %2701 = vmatprep.subr.bf16.mxu0 %v3093_v1  ;;  %2725 = vmatprep.subr.bf16.mxu1 %v3093_v1  ;;  %v2956_v2 = vld [vmem:[%s3713_s5] sm:$0xff]   ;;  %v2967_v6 = vld [vmem:[%s3679_s7 + $0x18] sm:$0xff]   ;;  %vm791_vm2 = vcmask 60416   ;;  %vm1277_vm3 = vcmask 64512   ;;  %vm1346_vm4 = vcmask 1043456  }
  0x21   : > { %2702 = vmatpush3.bf16.msra.mxu0 %v2955_v0  ;;  %2705 = vmatprep.mubr.msk.bf16.mxu0 %vm3094_vm0, %v3093_v1  ;;  %s2498_s29 = sshll.u32 %s3267_s25, 2  ;;  %v2959_v7 = vld [vmem:[%s3713_s5 + $0x18] sm:$0xff]   ;;  %v2968_v8 = vld [vmem:[%s3679_s7 + $0x10] sm:$0xff]   ;;  %v2969_v10 = vld [vmem:[%s3679_s7 + $0x28] sm:$0xff]   ;;  %s2497_s24 = sshll.u32 %s3267_s25, 3 }
  0x22   : > { %2703 = vmatprep.subr.bf16.mxu0 %v3093_v1  ;;  %2729 = vmatprep.mubr.msk.bf16.mxu1 %vm3094_vm0, %v3093_v1  ;;  %s650_s28 = scalar_lea.vmem %s3714_s1, %s2498_s29  ;;  %v2960_v9 = vld [vmem:[%s3713_s5 + $0x10] sm:$0xff]   ;;  %v2961_v11 = vld [vmem:[%s3713_s5 + $0x28] sm:$0xff]   ;;  %v2962_v12 = vld [vmem:[%s3713_s5 + $0x20] sm:$0xff]   ;;  %s646_s0 = scalar_lea.vmem %s3716_s27, %s2497_s24 }
  0x23   : > { %v3277_v4 = vld [vmem:[%s650_s28] sm:$0xf]  ;;  %2726 = vmatpush3.bf16.msra.mxu1 %v2967_v6  ;;  %v2963_v13 = vld [vmem:[%s3713_s5 + $0x38] sm:$0xff]   ;;  %v2964_v14 = vld [vmem:[%s3713_s5 + $0x30] sm:$0xff]   ;;  %s3715_s28 = sld [smem:[#allocation16_spill]]  ;;  %s637_s27 = sand.u32 1, %s3075_s30  }
  0x24   : > { %2727 = vmatprep.subr.bf16.mxu1 %v3093_v1  ;;  %v3354_v17 = vld [vmem:[%s646_s0] sm:$0xff]  ;;  %v2971_v20 = vld [vmem:[%s3679_s7 + $0x38] sm:$0xff]   ;;  %v2972_v21 = vld [vmem:[%s3679_s7 + $0x30] sm:$0xff]   ;;  %s3719_s1 = sld [smem:[#allocation15_spill]]  ;;  %s2496_s23 = sshll.u32 %s637_s27, 3 }
  0x25   : > { %2704 = vmatpush3.bf16.msra.mxu0 %v2956_v2  ;;  %v3359_v18 = vpack.c.bf16 %v3354_v17, %v3354_v17  ;;  %v2970_v19 = vld [vmem:[%s3679_s7 + $0x20] sm:$0xff]   ;;  %s3096_s24 = smov [#allocation4]  }
  0x26   : > { %2709 = vmatprep.subr.bf16.mxu0 %v3093_v1  ;;  %v2499_v22 = vld [vmem:[%s3717_s6] ss:$0 sm:$0xff]  ;;  %v2521_v34 = vld [vmem:[%s3680_s8 + $0x1] ss:$0 sm:$0xff]  ;;  %v2530_v54 = vld [vmem:[%s3717_s6 + $0x2] ss:$0 sm:$0xff] }
  0x27   : > { %2728 = vmatpush3.bf16.msra.mxu1 %v2968_v8  ;;  %v2503_v29 = vld [vmem:[%s3680_s8] ss:$0 sm:$0xff]  ;;  %v2512_v40 = vld [vmem:[%s3717_s6 + $0x1] ss:$0 sm:$0xff]  ;;  %v2548_v61 = vld [vmem:[%s3717_s6 + $0x3] ss:$0 sm:$0xff] }
  0x28   : > { %2706 = vmatmul.mubr.msk.bf16.vlgmr.msra.gmra.mxu0 %vm683_vm1, %v3277_v4  ;;  %2741 = vmatprep.subr.bf16.mxu1 %v3093_v1  ;;  %s2385_s6 = scalar_lea.sflag [#allocation5], %s637_s27  ;;  %s3019_s2 = sshll.u32 %s3096_s24, 4  ;;  %s3020_s2 = int_to_ptr.vmem [resolvable:$false] %s3019_s2 }
  0x29   : > { %2710 = vmatpush3.bf16.msra.mxu0 %v2957_v3  ;;  %2713 = vmatprep.mubr.msk.bf16.mxu0 %vm3094_vm0, %v3093_v1  ;;  %v2965_v15 = vld [vmem:[%s3715_s28 + $0x8] sm:$0xff]   ;;  %v2966_v16 = vld [vmem:[%s3715_s28] sm:$0xff]  }
  0x2a   : > { %2711 = vmatprep.subr.bf16.mxu0 %v3093_v1  ;;  %2730 = vmatmul.mubr.msk.bf16.vlgmr.msra.gmra.mxu1 %vm683_vm1, %v3277_v4  ;;  %s653_s29 = scalar_lea.vmem %s3719_s1, %s3267_s25  ;;  %s2626_s1 = sshll.u32 %s3083_s21, 7 }
  0x2b   : > { %2742 = vmatpush3.bf16.msra.mxu1 %v2969_v10  ;;  %2745 = vmatprep.mubr.msk.bf16.mxu1 %vm3094_vm0, %v3093_v1  ;;  %s2397_s5 = scalar_lea.hbm %s3691_s19, %s2626_s1  ;;  %s3021_s21 = scalar_lea.vmem %s3020_s2, 256 }
  0x2c   : > { %2743 = vmatprep.subr.bf16.mxu1 %v3093_v1 }
  0x2d   : > { %2712 = vmatpush3.bf16.msra.mxu0 %v2958_v5  ;;  %v2561_v5 = vld [vmem:[%s3718_s4] ss:$0 sm:$0xff] }
  0x2e   : > { %2717 = vmatprep.subr.bf16.mxu0 %v3093_v1 }
  0x2f   : > { %2744 = vmatpush3.bf16.msra.mxu1 %v2970_v19 }
  0x30   : > { %2714 = vmatmul.mubr.msk.bf16.vlgmr.msra.gmra.mxu0 %vm683_vm1, %v3277_v4  ;;  %2757 = vmatprep.subr.bf16.mxu1 %v3093_v1 }
  0x31   : > { %2718 = vmatpush3.bf16.msra.mxu0 %v2959_v7  ;;  %2721 = vmatprep.mubr.msk.bf16.mxu0 %vm3094_vm0, %v3093_v1 }
  0x32   : > { %2719 = vmatprep.subr.bf16.mxu0 %v3093_v1  ;;  %2746 = vmatmul.mubr.msk.bf16.vlgmr.msra.gmra.mxu1 %vm683_vm1, %v3277_v4 }
  0x33   : > { %2758 = vmatpush3.bf16.msra.mxu1 %v2971_v20  ;;  %2761 = vmatprep.mubr.msk.bf16.mxu1 %vm3094_vm0, %v3093_v1 }
  0x34   : > { %2759 = vmatprep.subr.bf16.mxu1 %v3093_v1 }
  0x35   : > { %2720 = vmatpush3.bf16.msra.mxu0 %v2960_v9  ;;  %v2973_v9 = vld [vmem:[%s3715_s28 + $0x18] sm:$0xff]  }
  0x36   : > { %2733 = vmatprep.subr.bf16.mxu0 %v3093_v1 }
  0x37   : > { %2760 = vmatpush3.bf16.msra.mxu1 %v2972_v21 }
  0x38   : > { %2722 = vmatmul.mubr.msk.bf16.vlgmr.msra.gmra.mxu0 %vm683_vm1, %v3277_v4  ;;  %2773 = vmatprep.subr.bf16.mxu1 %v3093_v1 }
  0x39   : > { %2734 = vmatpush3.bf16.msra.mxu0 %v2961_v11  ;;  %2737 = vmatprep.mubr.msk.bf16.mxu0 %vm3094_vm0, %v3093_v1 }
  0x3a   : > { %2735 = vmatprep.subr.bf16.mxu0 %v3093_v1  ;;  %2762 = vmatmul.mubr.msk.bf16.vlgmr.msra.gmra.mxu1 %vm683_vm1, %v3277_v4 }
  0x3b   : > { %2775 = vmatprep.mubr.msk.bf16.mxu1 %vm3094_vm0, %v3093_v1 }
  0x3d   : > { %2736 = vmatpush3.bf16.msra.mxu0 %v2962_v12 }
  0x3e   : > { %2749 = vmatprep.subr.bf16.mxu0 %v3093_v1 }
  0x40   : > { %2738 = vmatmul.mubr.msk.bf16.vlgmr.msra.gmra.mxu0 %vm683_vm1, %v3277_v4 }
  0x41   : > { %2750 = vmatpush3.bf16.msra.mxu0 %v2963_v13  ;;  %2753 = vmatprep.mubr.msk.bf16.mxu0 %vm3094_vm0, %v3093_v1  ;;  %v2974_v13 = vld [vmem:[%s3715_s28 + $0x10] sm:$0xff]  }
  0x42   : > { %2751 = vmatprep.subr.bf16.mxu0 %v3093_v1 }
  0x45   : > { %2752 = vmatpush3.bf16.msra.mxu0 %v2964_v14 }
  0x46   : > { %2765 = vmatprep.subr.bf16.mxu0 %v3093_v1 }
  0x48   : > { %2754 = vmatmul.mubr.msk.bf16.vlgmr.msra.gmra.mxu0 %vm683_vm1, %v3277_v4 }
  0x49   : > { %2766 = vmatpush3.bf16.msra.mxu0 %v2965_v15  ;;  %2769 = vmatprep.mubr.msk.bf16.mxu0 %vm3094_vm0, %v3093_v1 }
  0x4a   : > { %2767 = vmatprep.subr.bf16.mxu0 %v3093_v1 }
  0x4d   : > { %2768 = vmatpush3.bf16.msra.mxu0 %v2966_v16  ;;  %v2539_v16 = vld [vmem:[%s3680_s8 + $0x2] ss:$0 sm:$0xff] }
  0x4e   : > { %2779 = vmatprep.subr.bf16.mxu0 %v3093_v1 }
  0x50   : > { %2770 = vmatmul.mubr.msk.bf16.vlgmr.msra.gmra.mxu0 %vm683_vm1, %v3359_v18 }
  0x51   : > { %2781 = vmatprep.mubr.msk.bf16.mxu0 %vm3094_vm0, %v3093_v1 }
  0xe8   : > { %v721_v23 = vpop.f32.mrf.mxu0 }
  0xe9   : > { %v722_v24 = vadd.f32 %v2499_v22, %v721_v23 }
  0xea   : > { %v2707_v25 = vpop.f32.mrf.mxu0  ;;  %v919_v38 = vpop.f32.mrf.mxu1 }
  0xeb   : > { %v790_v26 = vpack.c.bf16 %v722_v24, %v722_v24  ;;  %v920_v41 = vadd.f32 %v2521_v34, %v919_v38  ;;  %v2557_v25 = vld [vmem:[%s3680_s8 + $0x3] ss:$0 sm:$0xff] }
  0xec   : > { %v724_v27 = vpop.f32.mrf.mxu0  ;;  %v2731_v42 = vpop.f32.mrf.mxu1 }
  0xed   : > { %792 = vst.msk [vmem:[#allocation2] sm:$0xf] %vm791_vm2, %v790_v26  ;;  %v928_v44 = vpack.c.bf16 %v920_v41, %v920_v41 }
  0xee   : > { %v2708_v28 = vpop.f32.mrf.mxu0  ;;  %v922_v46 = vpop.f32.mrf.mxu1 }
  0xef   : > { %930 = vst.msk [vmem:[#allocation3 + $0x4] sm:$0xf] %vm791_vm2, %v928_v44 }
  0xf0   : > { %v784_v30 = vpop.f32.mrf.mxu0  ;;  %v2732_v49 = vpop.f32.mrf.mxu1 }
  0xf1   : > { %v785_v31 = vadd.f32 %v2503_v29, %v784_v30 }
  0xf2   : > { %v2715_v32 = vpop.f32.mrf.mxu0  ;;  %v1055_v19 = vpop.f32.mrf.mxu1 }
  0xf3   : > { %v793_v33 = vpack.c.bf16 %v785_v31, %v785_v31  ;;  %v1056_v20 = vadd.f32 %v2539_v16, %v1055_v19  ;;  %v1325_v32 = vlaneseq }
  0xf4   : > { %v787_v35 = vpop.f32.mrf.mxu0  ;;  %v1275_v36 = vld [vmem:[#allocation2] sm:$0xf]  ;;  %v2747_v21 = vpop.f32.mrf.mxu1 }
  0xf5   : > { %794 = vst.msk [vmem:[#allocation3] sm:$0xf] %vm791_vm2, %v793_v33  ;;  %v1282_v37 = vsel %vm1277_vm3, %v1275_v36, 0  ;;  %v1064_v22 = vpack.c.bf16 %v1056_v20, %v1056_v20  ;;  %v1205_v33 = vld [vmem:[%s653_s29] sm:$0x1]  ;;  %v1326_v34 = vshrl.u32 %v1325_v32, 7 }
  0xf6   : > { %v2716_v39 = vpop.f32.mrf.mxu0  ;;  %2774 = vmatpush3.bf16.xpose.msra.mxu1 %v1282_v37  ;;  %v1461_v14 = vld [vmem:[#allocation3 + $0x4] sm:$0xf]  ;;  %v1058_v23 = vpop.f32.mrf.mxu1  ;;  %vm1206_vm5 = vcmp.eq.f32.partialorder %v1205_v33, 0.0  ;;  %v3095_v36 = vmov 0   ;;  %v1391_v21 = vld [vmem:[%s3681_s9] sm:$0xf] }
  0xf7   : > { %2785 = vmatprep.subr.bf16.mxu1 %v3093_v1  ;;  %v1525_v15 = vsel %vm1346_vm4, %v1461_v14, 0  ;;  %1066 = vst.msk [vmem:[#allocation3 + $0x8] sm:$0xf] %vm791_vm2, %v1064_v22  ;;  %v1327_v35 = vsub.s32 0, %v1326_v34  ;;  %v1324_v37 = vsel %vm1206_vm5, 1, %v3095_v36  ;;  %v2976_v33 = vld [vmem:[%s3715_s28 + $0x20] sm:$0xff]  }
  0xf8   : > { %v854_v43 = vpop.f32.mrf.mxu0  ;;  %v2748_v24 = vpop.f32.mrf.mxu1  ;;  %s639_s29 = scalar_lea.vmem [#allocation4], %s2496_s23 }
  0xf9   : > { %v855_v45 = vadd.f32 %v2512_v40, %v854_v43  ;;  %v3446_v38 = vrot.slane %v1324_v37, %v1327_v35  ;;  %v1620_v24 = vsel %vm1346_vm4, %v1391_v21, 0  ;;  %s2399_s25 = sshll.u32 %s639_s29, 4  ;;  %s2400_s25 = int_to_ptr.vmem [resolvable:$true] %s2399_s25 }
  0xfa   : > { %v2723_v47 = vpop.f32.mrf.mxu0  ;;  %v1191_v26 = vpop.f32.mrf.mxu1  ;;  %s3015_s26 = scalar_lea.vmem %s2400_s25, 128  ;;  %p3022_p1 = scmp.lt.s32.totalorder %s2400_s25, %s3020_s2 }
  0xfb   : > { %v925_v48 = vpack.c.bf16 %v855_v45, %v855_v45  ;;  %v1192_v27 = vadd.f32 %v2557_v25, %v1191_v26  ;;  %vm1329_vm6 = vcmp.eq.s32.totalorder %v3446_v38, 1  ;;  %p3016_p12 = scmp.ne.s32.totalorder %s2400_s25, %s3015_s26  ;;  %p3023_p2 = scmp.lt.s32.totalorder %s3021_s21, %s3015_s26 }
  0xfc   : > { %v857_v50 = vpop.f32.mrf.mxu0  ;;  %v1276_v51 = vld [vmem:[#allocation3] sm:$0xf]  ;;  %v2763_v28 = vpop.f32.mrf.mxu1 }
  0xfd   : > { %927 = vst.msk [vmem:[#allocation2 + $0x4] sm:$0xf] %vm791_vm2, %v925_v48  ;;  %v1348_v52 = vsel %vm1346_vm4, %v1276_v51, 0  ;;  %v1200_v29 = vpack.c.bf16 %v1192_v27, %v1192_v27  ;;  %p3017_p13 = pnand %p3016_p12, %p3237_p4  ;;  %p3024_p3 = por %p3023_p2, %p3022_p1 }
  0xfe   : > { %v2724_v53 = vpop.f32.mrf.mxu0  ;;  %2780 = vmatpush3.bf16.msra.mxu0 %v1348_v52  ;;  %v1194_v30 = vpop.f32.mrf.mxu1  ;;  %v1731_v36 = vld [vmem:[#allocation3 + $0x8] sm:$0xf] }
  0xff   : > { %2793 = vmatprep.subr.bf16.mxu0 %v3093_v1  ;;  %1202 = vst.msk [vmem:[#allocation3 + $0xc] sm:$0xf] %vm791_vm2, %v1200_v29  ;;  %v2975_v29 = vld [vmem:[%s3715_s28 + $0x28] sm:$0xff]   ;;  %p3018_p0 = pneg %p3017_p13 }
 0x100   : > { %v990_v55 = vpop.f32.mrf.mxu0  ;;  %v2764_v31 = vpop.f32.mrf.mxu1 }
 0x101   : > { %v991_v56 = vadd.f32 %v2530_v54, %v990_v55  ;;  %p3025_p5 = pnand %p3024_p3, %p3018_p0 }
 0x102   : > { %v2739_v57 = vpop.f32.mrf.mxu0 }
 0x103   : > { %v1061_v58 = vpack.c.bf16 %v991_v56, %v991_v56  ;;  %v2572_v57 = vld [vmem:[%s3718_s4 + $0x1] ss:$0 sm:$0xff] }
 0x104   : > { %v993_v59 = vpop.f32.mrf.mxu0 }
 0x105   : > { %1063 = vst.msk [vmem:[#allocation2 + $0x8] sm:$0xf] %vm791_vm2, %v1061_v58  ;;  %v1459_v58 = vld [vmem:[#allocation2 + $0x4] sm:$0xf] }
 0x106   : > { %v2740_v60 = vpop.f32.mrf.mxu0 }
 0x108   : > { %v1126_v62 = vpop.f32.mrf.mxu0 }
 0x109   : > { %v1127_v63 = vadd.f32 %v2548_v61, %v1126_v62  ;;  %v1466_v61 = vsel %vm1277_vm3, %v1459_v58, 0 }
 0x10a   : > { %v2755_v0 = vpop.f32.mrf.mxu0 }
 0x10b   : > { %v1197_v2 = vpack.c.bf16 %v1127_v63, %v1127_v63 }
 0x10c   : > { %v1129_v3 = vpop.f32.mrf.mxu0  ;;  %v1729_v25 = vld [vmem:[#allocation2 + $0x8] sm:$0xf] }
 0x10d   : > { %1199 = vst.msk [vmem:[#allocation2 + $0xc] sm:$0xf] %vm791_vm2, %v1197_v2  ;;  %v1736_v27 = vsel %vm1277_vm3, %v1729_v25, 0 }
 0x10e   : > { %v2756_v4 = vpop.f32.mrf.mxu0 }
 0x110   : > { %v1268_v6 = vpop.f32.mrf.mxu0 }
 0x111   : > { %v1269_v7 = vadd.f32 %v2561_v5, %v1268_v6 }
 0x112   : > { %v2771_v8 = vpop.f32.mrf.mxu0 }
 0x113   : > { %v1274_v10 = vpack.c.bf16 %v1269_v7, %v1269_v7 }
 0x114   : > { %v1271_v11 = vpop.f32.mrf.mxu0 }
 0x115   : > { %2776 = vmatmul.mubr.msk.bf16.vlgmr.msra.gmra.mxu1 %vm1277_vm3, %v1274_v10 }
 0x116   : > { %v2772_v12 = vpop.f32.mrf.mxu0  ;;  %2786 = vmatpush3.bf16.msra.mxu1 %v2973_v9  ;;  %2789 = vmatprep.mubr.msk.bf16.mxu1 %vm3094_vm0, %v3093_v1 }
 0x117   : > { %2787 = vmatprep.subr.bf16.mxu1 %v3093_v1 }
 0x11a   : > { %2788 = vmatpush3.bf16.msra.mxu1 %v2974_v13 }
 0x11b   : > { %2799 = vmatprep.subr.bf16.mxu1 %v3093_v1 }
 0x11d   : > { %2790 = vmatmul.mubr.msk.bf16.vlgmr.msra.gmra.mxu1 %vm683_vm1, %v3359_v18 }
 0x11e   : > { %2800 = vmatpush3.bf16.msra.mxu1 %v1525_v15  ;;  %2801 = vmatprep.mubr.msk.bf16.mxu1 %vm3094_vm0, %v3093_v1  ;;  %v2578_v15 = vld [vmem:[%s3681_s9 + $0x4] sm:$0xf] }
 0x11f   : > { %2811 = vmatprep.subr.bf16.mxu1 %v3093_v1  ;;  %v1574_v16 = vsel %vm1346_vm4, %v2578_v15, 0 }
 0x1d5   : > { %v1318_v39 = vpop.f32.mrf.mxu1 }
 0x1d6   : > { %v1330_v40 = vsel %vm1329_vm6, -1e+09, %v1318_v39  ;;  %v1795_v39 = vsel %vm1346_vm4, %v1731_v36, 0 }
 0x1d7   : > { %v2777_v41 = vpop.f32.mrf.mxu1  ;;  %v1331_v42 = vsel %vm1277_vm3, %v1330_v40, -inf }
 0x1d8   : > { %1332 = vmax.xlane.f32.xlu0 %v1331_v42 }
 0x1d9   : > { %v1321_v43 = vpop.f32.mrf.mxu1 }
 0x1db   : > { %v2778_v44 = vpop.f32.mrf.mxu1 }
 0x1dd   : > { %v1451_v50 = vpop.f32.mrf.mxu1 }
 0x1de   : > { %v1452_v60 = vadd.f32 %v2572_v57, %v1451_v50 }
 0x1df   : > { %v2791_v51 = vpop.f32.mrf.mxu1 }
 0x1e0   : > { %v1457_v62 = vpack.c.bf16 %v1452_v60, %v1452_v60 }
 0x1e1   : > { %v1454_v52 = vpop.f32.mrf.mxu1 }
 0x1e3   : > { %v2792_v53 = vpop.f32.mrf.mxu1 }
 0x261   : > { %v1333_v45 = vpop.xlane.xlu0 %1332 }
 0x262   : > { %v1334_v46 = vsub.f32 %v1330_v40, %v1333_v45 }
 0x264   : > { %v1335_v47 = vmul.f32 1.442695, %v1334_v46  ;;  %v2586_v46 = vld [vmem:[%s3718_s4 + $0x2] ss:$0 sm:$0xff] }
 0x266   : > { %2989 = vpow2.f32 %v1335_v47 }
 0x273   : > { %v2990_v48 = vpop.eup %2989 }
 0x274   : > { %v1337_v49 = vsel %vm1277_vm3, %v2990_v48, 0.0 }
 0x275   : > { %1338 = vadd.xlane.f32.xlu0 %v1337_v49 }
 0x2fe   : > { %v1339_v54 = vpop.xlane.xlu0 %1338 }
 0x2ff   : > { %2991 = vrcp.f32 %v1339_v54 }
 0x30c   : > { %v2992_v55 = vpop.eup %2991 }
 0x30d   : > { %v1341_v56 = vmul.f32 %v2992_v55, %v2990_v48 }
 0x30f   : > { %v1342_v59 = vpack.c.bf16 %v1341_v56, %v1341_v56 }
 0x311   : > { %2782 = vmatmul.mubr.msk.bf16.vlgmr.msra.gmra.mxu0 %vm1277_vm3, %v1342_v59 }
 0x312   : > { %2794 = vmatpush3.bf16.xpose.msra.mxu0 %v1466_v61  ;;  %2795 = vmatprep.mubr.msk.bf16.mxu0 %vm3094_vm0, %v3093_v1 }
 0x313   : > { %2805 = vmatprep.subr.bf16.mxu0 %v3093_v1 }
 0x319   : > { %2796 = vmatmul.mubr.msk.bf16.vlgmr.msra.gmra.mxu0 %vm1277_vm3, %v1457_v62 }
 0x31a   : > { %2807 = vmatprep.mubr.msk.bf16.mxu0 %vm3094_vm0, %v3093_v1  ;;  %2806 = vmatpush3.bf16.msra.mxu0 %v1574_v16 }
 0x31b   : > { %2817 = vmatprep.subr.bf16.mxu0 %v3093_v1 }
 0x3d1   : > { %v1384_v63 = vpop.f32.mrf.mxu0 }
 0x3d2   : > { %v1390_v26 = vpack.c.bf16 %v1384_v63, %v1384_v63 }
 0x3d3   : > { %v2783_v0 = vpop.f32.mrf.mxu0 }
 0x3d4   : > { %v2592_v0 = vld [vmem:[%s3681_s9 + $0x8] sm:$0xf] }
 0x3d5   : > { %v1387_v2 = vpop.f32.mrf.mxu0 }
 0x3d6   : > { %v1844_v2 = vsel %vm1346_vm4, %v2592_v0, 0 }
 0x3d7   : > { %v2784_v3 = vpop.f32.mrf.mxu0 }
 0x3d9   : > { %v1502_v4 = vpop.f32.mrf.mxu0 }
 0x3da   : > { %v1508_v5 = vsel %vm1329_vm6, -1e+09, %v1502_v4 }
 0x3db   : > { %v2797_v6 = vpop.f32.mrf.mxu0  ;;  %v1509_v7 = vsel %vm1277_vm3, %v1508_v5, -inf }
 0x3dc   : > { %1510 = vmax.xlane.f32.xlu1 %v1509_v7  ;;  %v2977_v6 = vld [vmem:[%s3715_s28 + $0x38] sm:$0xff]  }
 0x3dd   : > { %v1505_v8 = vpop.f32.mrf.mxu0 }
 0x3de   : > { %v2978_v8 = vld [vmem:[%s3715_s28 + $0x30] sm:$0xff]  }
 0x3df   : > { %v2798_v9 = vpop.f32.mrf.mxu0 }
 0x3e0   : > { %v1956_v9 = vld [vmem:[#allocation3 + $0xc] sm:$0xf] }
 0x465   : > { %v1511_v10 = vpop.xlane.xlu1 %1510 }
 0x466   : > { %v1512_v11 = vsub.f32 %v1508_v5, %v1511_v10  ;;  %v2020_v10 = vsel %vm1346_vm4, %v1956_v9, 0 }
 0x468   : > { %v1513_v12 = vmul.f32 1.442695, %v1512_v11 }
 0x46a   : > { %2993 = vpow2.f32 %v1513_v12  ;;  %v1954_v12 = vld [vmem:[#allocation2 + $0xc] sm:$0xf] }
 0x46b   : > { %v1961_v15 = vsel %vm1277_vm3, %v1954_v12, 0 }
 0x477   : > { %v2994_v13 = vpop.eup %2993 }
 0x478   : > { %v1515_v14 = vsel %vm1277_vm3, %v2994_v13, 0.0 }
 0x479   : > { %1516 = vadd.xlane.f32.xlu1 %v1515_v14 }
 0x502   : > { %v1517_v19 = vpop.xlane.xlu1 %1516 }
 0x503   : > { %2995 = vrcp.f32 %v1517_v19  ;;  %v2599_v19 = vld [vmem:[%s3718_s4 + $0x3] ss:$0 sm:$0xff] }
 0x510   : > { %v2996_v20 = vpop.eup %2995 }
 0x511   : > { %v1519_v22 = vmul.f32 %v2996_v20, %v2994_v13 }
 0x513   : > { %v1520_v23 = vpack.c.bf16 %v1519_v22, %v1519_v22 }
 0x515   : > { %2802 = vmatmul.mubr.msk.bf16.vlgmr.msra.gmra.mxu1 %vm1277_vm3, %v1520_v23 }
 0x516   : > { %2812 = vmatpush3.bf16.msra.mxu1 %v1620_v24  ;;  %2813 = vmatprep.mubr.msk.bf16.mxu1 %vm3094_vm0, %v3093_v1 }
 0x517   : > { %2825 = vmatprep.subr.bf16.mxu1 %v3093_v1 }
 0x51d   : > { %2814 = vmatmul.mubr.msk.bf16.vlgmr.msra.gmra.mxu1 %vm1277_vm3, %v1390_v26 }
 0x51e   : > { %2826 = vmatpush3.bf16.xpose.msra.mxu1 %v1736_v27  ;;  %2827 = vmatprep.mubr.msk.bf16.mxu1 %vm3094_vm0, %v3093_v1 }
 0x51f   : > { %2837 = vmatprep.subr.bf16.mxu1 %v3093_v1 }
 0x5d5   : > { %v1561_v28 = vpop.f32.mrf.mxu1 }
 0x5d6   : > { %v1567_v30 = vpack.c.bf16 %v1561_v28, %v1561_v28 }
 0x5d7   : > { %v2803_v31 = vpop.f32.mrf.mxu1 }
 0x5d8   : > { %2808 = vmatmul.mubr.msk.bf16.vlgmr.msra.gmra.mxu0 %vm1277_vm3, %v1567_v30 }
 0x5d9   : > { %2818 = vmatpush3.bf16.msra.mxu0 %v2975_v29  ;;  %v1564_v32 = vpop.f32.mrf.mxu1  ;;  %2821 = vmatprep.mubr.msk.bf16.mxu0 %vm3094_vm0, %v3093_v1 }
 0x5da   : > { %2819 = vmatprep.subr.bf16.mxu0 %v3093_v1 }
 0x5db   : > { %v2804_v34 = vpop.f32.mrf.mxu1 }
 0x5dd   : > { %2820 = vmatpush3.bf16.msra.mxu0 %v2976_v33  ;;  %v3496_v35 = vpop.f32.mrf.mxu1 }
 0x5de   : > { %2831 = vmatprep.subr.bf16.mxu0 %v3093_v1 }
 0x5df   : > { %v2815_v37 = vpop.f32.mrf.mxu1 }
 0x5e0   : > { %2822 = vmatmul.mubr.msk.bf16.vlgmr.msra.gmra.mxu0 %vm683_vm1, %v3359_v18 }
 0x5e1   : > { %2832 = vmatpush3.bf16.msra.mxu0 %v1795_v39  ;;  %v1659_v40 = vpop.f32.mrf.mxu1  ;;  %2833 = vmatprep.mubr.msk.bf16.mxu0 %vm3094_vm0, %v3093_v1 }
 0x5e2   : > { %2843 = vmatprep.subr.bf16.mxu0 %v3093_v1 }
 0x5e3   : > { %v2816_v41 = vpop.f32.mrf.mxu1 }
 0x698   : > { %v3505_v42 = vpop.f32.mrf.mxu0 }
 0x699   : > { %v1657_v26 = vadd.f32 %v3496_v35, %v3505_v42 }
 0x69a   : > { %v2809_v43 = vpop.f32.mrf.mxu0 }
 0x69c   : > { %v1613_v44 = vpop.f32.mrf.mxu0 }
 0x69d   : > { %v2605_v44 = vld [vmem:[%s3681_s9 + $0xc] sm:$0xf] }
 0x69e   : > { %v2810_v45 = vpop.f32.mrf.mxu0  ;;  %v2069_v38 = vsel %vm1346_vm4, %v2605_v44, 0 }
 0x6a0   : > { %v1721_v47 = vpop.f32.mrf.mxu0 }
 0x6a1   : > { %v1722_v48 = vadd.f32 %v2586_v46, %v1721_v47 }
 0x6a2   : > { %v2823_v49 = vpop.f32.mrf.mxu0 }
 0x6a3   : > { %v1727_v50 = vpack.c.bf16 %v1722_v48, %v1722_v48 }
 0x6a4   : > { %v1724_v51 = vpop.f32.mrf.mxu0 }
 0x6a5   : > { %2828 = vmatmul.mubr.msk.bf16.vlgmr.msra.gmra.mxu1 %vm1277_vm3, %v1727_v50 }
 0x6a6   : > { %v2824_v52 = vpop.f32.mrf.mxu0  ;;  %2839 = vmatprep.mubr.msk.bf16.mxu1 %vm3094_vm0, %v3093_v1  ;;  %2838 = vmatpush3.bf16.msra.mxu1 %v1844_v2 }
 0x6a7   : > { %2851 = vmatprep.subr.bf16.mxu1 %v3093_v1 }
 0x765   : > { %v1772_v53 = vpop.f32.mrf.mxu1 }
 0x766   : > { %v1778_v54 = vsel %vm1329_vm6, -1e+09, %v1772_v53 }
 0x767   : > { %v2829_v55 = vpop.f32.mrf.mxu1  ;;  %v1779_v56 = vsel %vm1277_vm3, %v1778_v54, -inf }
 0x768   : > { %1780 = vmax.xlane.f32.xlu0 %v1779_v56  ;;  %v2607_v55 = vld [vmem:[%s3682_s10] ss:$0 sm:$0xff] }
 0x769   : > { %v1775_v57 = vpop.f32.mrf.mxu1 }
 0x76b   : > { %v2830_v58 = vpop.f32.mrf.mxu1 }
 0x7f1   : > { %v1781_v59 = vpop.xlane.xlu0 %1780 }
 0x7f2   : > { %v1782_v60 = vsub.f32 %v1778_v54, %v1781_v59 }
 0x7f4   : > { %v1783_v61 = vmul.f32 1.442695, %v1782_v60 }
 0x7f6   : > { %2997 = vpow2.f32 %v1783_v61 }
 0x803   : > { %v2998_v62 = vpop.eup %2997 }
 0x804   : > { %v1785_v63 = vsel %vm1277_vm3, %v2998_v62, 0.0 }
 0x805   : > { %1786 = vadd.xlane.f32.xlu1 %v1785_v63 }
 0x88e   : > { %v1787_v3 = vpop.xlane.xlu1 %1786 }
 0x88f   : > { %2999 = vrcp.f32 %v1787_v3 }
 0x89c   : > { %v3000_v4 = vpop.eup %2999 }
 0x89d   : > { %v1789_v5 = vmul.f32 %v3000_v4, %v2998_v62 }
 0x89f   : > { %v1790_v7 = vpack.c.bf16 %v1789_v5, %v1789_v5  ;;  %v2979_v5 = vld [vmem:[%s3685_s13 + $0x8] sm:$0xff]  }
 0x8a1   : > { %2834 = vmatmul.mubr.msk.bf16.vlgmr.msra.gmra.mxu0 %vm1277_vm3, %v1790_v7 }
 0x8a2   : > { %2844 = vmatpush3.bf16.msra.mxu0 %v2977_v6  ;;  %2847 = vmatprep.mubr.msk.bf16.mxu0 %vm3094_vm0, %v3093_v1 }
 0x8a3   : > { %2845 = vmatprep.subr.bf16.mxu0 %v3093_v1 }
 0x8a6   : > { %2846 = vmatpush3.bf16.msra.mxu0 %v2978_v8 }
 0x8a7   : > { %2857 = vmatprep.subr.bf16.mxu0 %v3093_v1 }
 0x8a9   : > { %2848 = vmatmul.mubr.msk.bf16.vlgmr.msra.gmra.mxu0 %vm683_vm1, %v3359_v18 }
 0x8aa   : > { %2858 = vmatpush3.bf16.msra.mxu0 %v2020_v10  ;;  %2859 = vmatprep.mubr.msk.bf16.mxu0 %vm3094_vm0, %v3093_v1 }
 0x8ab   : > { %2869 = vmatprep.subr.bf16.mxu0 %v3093_v1 }
 0x961   : > { %v1831_v11 = vpop.f32.mrf.mxu0 }
 0x962   : > { %v1837_v13 = vpack.c.bf16 %v1831_v11, %v1831_v11 }
 0x963   : > { %v2835_v14 = vpop.f32.mrf.mxu0 }
 0x964   : > { %2840 = vmatmul.mubr.msk.bf16.vlgmr.msra.gmra.mxu1 %vm1277_vm3, %v1837_v13 }
 0x965   : > { %2852 = vmatpush3.bf16.xpose.msra.mxu1 %v1961_v15  ;;  %v1834_v16 = vpop.f32.mrf.mxu0  ;;  %2853 = vmatprep.mubr.msk.bf16.mxu1 %vm3094_vm0, %v3093_v1  ;;  %v2608_v15 = vld [vmem:[%s3683_s11] ss:$0 sm:$0xff] }
 0x966   : > { %2863 = vmatprep.subr.bf16.mxu1 %v3093_v1 }
 0x967   : > { %v2836_v18 = vpop.f32.mrf.mxu0 }
 0x968   : > { %v2609_v18 = vld [vmem:[%s3684_s12] ss:$0 sm:$0xff] }
 0x969   : > { %v1946_v20 = vpop.f32.mrf.mxu0 }
 0x96a   : > { %v1947_v21 = vadd.f32 %v2599_v19, %v1946_v20 }
 0x96b   : > { %v2849_v22 = vpop.f32.mrf.mxu0 }
 0x96c   : > { %v1952_v23 = vpack.c.bf16 %v1947_v21, %v1947_v21  ;;  %v2981_v22 = vld [vmem:[%s3687_s15 + $0x38] sm:$0xff]  }
 0x96d   : > { %v1949_v24 = vpop.f32.mrf.mxu0 }
 0x96e   : > { %2854 = vmatmul.mubr.msk.bf16.vlgmr.msra.gmra.mxu1 %vm1277_vm3, %v1952_v23  ;;  %v2982_v23 = vld [vmem:[%s3687_s15 + $0x30] sm:$0xff]   ;;  %v2983_v24 = vld [vmem:[%s3687_s15 + $0x28] sm:$0xff]  }
 0x96f   : > { %v2850_v25 = vpop.f32.mrf.mxu0  ;;  %2865 = vmatprep.mubr.msk.bf16.mxu1 %vm3094_vm0, %v3093_v1  ;;  %2864 = vmatpush3.bf16.msra.mxu1 %v2069_v38 }
 0x970   : > { %2877 = vmatprep.subr.bf16.mxu1 %v3093_v1  ;;  %v2984_v25 = vld [vmem:[%s3687_s15 + $0x20] sm:$0xff]  }
 0xa24   : > { %v1880_v27 = vpop.f32.mrf.mxu1 }
 0xa25   : > { %v1886_v28 = vadd.f32 %v1880_v27, %v1657_v26  ;;  %v2985_v26 = vld [vmem:[%s3687_s15 + $0x18] sm:$0xff]   ;;  %v2986_v27 = vld [vmem:[%s3687_s15 + $0x10] sm:$0xff]  }
 0xa26   : > { %v2841_v29 = vpop.f32.mrf.mxu1 }
 0xa27   : > { %v2988_v29 = vld [vmem:[%s3687_s15] sm:$0xff]  }
 0xa28   : > { %v1883_v30 = vpop.f32.mrf.mxu1 }
 0xa29   : > { %v2610_v30 = vld [vmem:[%s3686_s14] ss:$0 sm:$0xff] }
 0xa2a   : > { %v2842_v31 = vpop.f32.mrf.mxu1 }
 0xa2e   : > { %v1997_v32 = vpop.f32.mrf.mxu1 }
 0xa2f   : > { %v2003_v33 = vsel %vm1329_vm6, -1e+09, %v1997_v32 }
 0xa30   : > { %v2855_v34 = vpop.f32.mrf.mxu1  ;;  %v2004_v36 = vsel %vm1277_vm3, %v2003_v33, -inf }
 0xa31   : > { %2005 = vmax.xlane.f32.xlu0 %v2004_v36 }
 0xa32   : > { %v2000_v37 = vpop.f32.mrf.mxu1 }
 0xa34   : > { %v2856_v39 = vpop.f32.mrf.mxu1 }
 0xaba   : > { %v2006_v40 = vpop.xlane.xlu0 %2005 }
 0xabb   : > { %v2007_v41 = vsub.f32 %v2003_v33, %v2006_v40 }
 0xabd   : > { %v2008_v43 = vmul.f32 1.442695, %v2007_v41 }
 0xabf   : > { %3001 = vpow2.f32 %v2008_v43 }
 0xacc   : > { %v3002_v35 = vpop.eup %3001 }
 0xacd   : > { %v2010_v42 = vsel %vm1277_vm3, %v3002_v35, 0.0 }
 0xace   : > { %2011 = vadd.xlane.f32.xlu1 %v2010_v42 }
 0xb57   : > { %v2012_v45 = vpop.xlane.xlu1 %2011 }
 0xb58   : > { %3003 = vrcp.f32 %v2012_v45  ;;  %v2614_v45 = vld [vmem:[%s3688_s16] ss:$0 sm:$0xff] }
 0xb65   : > { %v3004_v46 = vpop.eup %3003 }
 0xb66   : > { %v2014_v47 = vmul.f32 %v3004_v46, %v3002_v35 }
 0xb68   : > { %v2015_v48 = vpack.c.bf16 %v2014_v47, %v2014_v47 }
 0xb6a   : > { %2860 = vmatmul.mubr.msk.bf16.vlgmr.msra.gmra.mxu0 %vm1277_vm3, %v2015_v48 }
 0xb6b   : > { %2873 = vmatprep.mubr.msk.bf16.mxu0 %vm3094_vm0, %v3093_v1  ;;  %2870 = vmatpush3.bf16.msra.mxu0 %v2979_v5 }
 0xb6c   : > { %2871 = vmatprep.subr.bf16.mxu0 %v3093_v1 }
 0xc2a   : > { %v2056_v49 = vpop.f32.mrf.mxu0 }
 0xc2b   : > { %v2062_v50 = vpack.c.bf16 %v2056_v49, %v2056_v49 }
 0xc2c   : > { %v2861_v51 = vpop.f32.mrf.mxu0 }
 0xc2d   : > { %2866 = vmatmul.mubr.msk.bf16.vlgmr.msra.gmra.mxu1 %vm1277_vm3, %v2062_v50 }
 0xc2e   : > { %v2059_v52 = vpop.f32.mrf.mxu0  ;;  %2893 = vmatprep.mubr.msk.bf16.mxu1 %vm3094_vm0, %v3093_v1  ;;  %2878 = vmatpush3.bf16.msra.mxu1 %v2981_v22 }
 0xc2f   : > { %2879 = vmatprep.subr.bf16.mxu1 %v3093_v1 }
 0xc30   : > { %v2862_v53 = vpop.f32.mrf.mxu0 }
 0xc32   : > { %2880 = vmatpush3.bf16.msra.mxu1 %v2982_v23 }
 0xc33   : > { %2881 = vmatprep.subr.bf16.mxu1 %v3093_v1 }
 0xc36   : > { %2882 = vmatpush3.bf16.msra.mxu1 %v2983_v24 }
 0xc37   : > { %2883 = vmatprep.subr.bf16.mxu1 %v3093_v1 }
 0xc3a   : > { %2884 = vmatpush3.bf16.msra.mxu1 %v2984_v25 }
 0xc3b   : > { %2885 = vmatprep.subr.bf16.mxu1 %v3093_v1 }
 0xc3e   : > { %2886 = vmatpush3.bf16.msra.mxu1 %v2985_v26 }
 0xc3f   : > { %2887 = vmatprep.subr.bf16.mxu1 %v3093_v1 }
 0xc42   : > { %2888 = vmatpush3.bf16.msra.mxu1 %v2986_v27 }
 0xc43   : > { %2889 = vmatprep.subr.bf16.mxu1 %v3093_v1 }
 0xced   : > { %v2105_v54 = vpop.f32.mrf.mxu1 }
 0xcee   : > { %v2111_v56 = vadd.f32 %v2105_v54, %v1886_v28  ;;  %v2987_v28 = vld [vmem:[%s3687_s15 + $0x8] sm:$0xff]  }
 0xcef   : > { %v2867_v57 = vpop.f32.mrf.mxu1  ;;  %2890 = vmatpush3.bf16.msra.mxu1 %v2987_v28 }
 0xcf0   : > { %v2119_v58 = vadd.f32 %v2607_v55, %v2111_v56  ;;  %2891 = vmatprep.subr.bf16.mxu1 %v3093_v1 }
 0xcf1   : > { %v2108_v59 = vpop.f32.mrf.mxu1 }
 0xcf2   : > { %v2120_v60 = vadd.f32 %v2119_v58, %v3354_v17  ;;  %v2980_v17 = vld [vmem:[%s3685_s13] sm:$0xff]  }
 0xcf3   : > { %v2868_v61 = vpop.f32.mrf.mxu1  ;;  %2872 = vmatpush3.bf16.msra.mxu0 %v2980_v17  ;;  %2892 = vmatpush3.bf16.msra.mxu1 %v2988_v29  ;;  %v2624_v17 = vld [vmem:[%s3690_s18] ss:$0 sm:$0xff] }
 0xcf4   : > { %v2123_v62 = vsel %vm683_vm1, %v2120_v60, 0.0 }
 0xcf5   : > { %2124 = vadd.xlane.f32.xlu0 %v2123_v62 }
 0xd7e   : > { %v2125_v63 = vpop.xlane.xlu0 %2124 }
 0xd7f   : > { %v2127_v0 = vmul.f32 0.03125, %v2125_v63 }
 0xd81   : > { %v2128_v2 = vsub.f32 %v2120_v60, %v2127_v0 }
 0xd83   : > { %v2129_v3 = vmul.f32 %v2128_v2, %v2128_v2 }
 0xd85   : > { %v2130_v4 = vsel %vm683_vm1, %v2129_v3, 0.0 }
 0xd86   : > { %2131 = vadd.xlane.f32.xlu1 %v2130_v4  ;;  %v2623_v4 = vld [vmem:[%s3689_s17] ss:$0 sm:$0xff] }
 0xe0f   : > { %v2132_v6 = vpop.xlane.xlu1 %2131 }
 0xe10   : > { %v2133_v7 = vmul.f32 0.032258064, %v2132_v6 }
 0xe12   : > { %3005 = vrsqrt.f32 %v2133_v7  ;;  %vm2136_vm7 = vcmp.eq.f32.partialorder %v2133_v7, inf  ;;  %v2139_v10 = vand.u32 2147483648, %v2133_v7  ;;  %vm2138_vm8 = vcmp.eq.f32.partialorder %v2133_v7, 0.0 }
 0xe1f   : > { %v3006_v8 = vpop.eup %3005 }
 0xe20   : > { %v2135_v9 = vmul.f32 %v3006_v8, %v2133_v7 }
 0xe22   : > { %v2137_v11 = vsel %vm2136_vm7, %v2133_v7, %v2135_v9 }
 0xe23   : > { %v2140_v12 = vsel %vm2138_vm8, %v2139_v10, %v2137_v11 }
 0xe24   : > { %v2141_v13 = vadd.f32 1e-06, %v2140_v12 }
 0xe26   : > { %3007 = vrcp.f32 %v2141_v13 }
 0xe33   : > { %v3008_v14 = vpop.eup %3007 }
 0xe34   : > { %v2143_v16 = vmul.f32 %v3008_v14, %v2128_v2 }
 0xe36   : > { %v2150_v19 = vmul.f32 %v2608_v15, %v2143_v16 }
 0xe38   : > { %v2157_v20 = vadd.f32 %v2609_v18, %v2150_v19 }
 0xe3a   : > { %v2158_v21 = vpack.c.bf16 %v2157_v20, %v2157_v20 }
 0xe3c   : > { %2874 = vmatmul.mubr.msk.bf16.vlgmr.msra.gmra.mxu0 %vm683_vm1, %v2158_v21 }
 0xefc   : > { %v2219_v31 = vpop.f32.mrf.mxu0 }
 0xefd   : > { %v2220_v32 = vadd.f32 %v2610_v30, %v2219_v31 }
 0xefe   : > { %v2875_v33 = vpop.f32.mrf.mxu0 }
 0xeff   : > { %v2226_v34 = vmul.f32 0.044715, %v2220_v32  ;;  %v2225_v42 = vmul.f32 0.5, %v2220_v32 }
 0xf00   : > { %v2222_v36 = vpop.f32.mrf.mxu0 }
 0xf01   : > { %v2227_v37 = vmul.f32 %v2226_v34, %v2220_v32 }
 0xf02   : > { %v2876_v39 = vpop.f32.mrf.mxu0 }
 0xf03   : > { %v2228_v40 = vmul.f32 %v2227_v37, %v2220_v32 }
 0xf05   : > { %v2229_v41 = vadd.f32 %v2228_v40, %v2220_v32 }
 0xf07   : > { %v2230_v43 = vmul.f32 0.7978846, %v2229_v41 }
 0xf09   : > { %3009 = vtanh.f32 %v2230_v43 }
 0xf16   : > { %v3010_v35 = vpop.eup %3009 }
 0xf17   : > { %v2232_v44 = vadd.f32 1.0, %v3010_v35 }
 0xf19   : > { %v2233_v1 = vmul.f32 %v2232_v44, %v2225_v42 }
 0xf1b   : > { %v2234_v38 = vpack.c.bf16 %v2233_v1, %v2233_v1 }
 0xf1d   : > { %2894 = vmatmul.mubr.bf16.vlgmr.msra.gmra.mxu1 %v2234_v38 }
 0xfdd   : > { %v2340_v46 = vpop.f32.mrf.mxu1 }
 0xfde   : > { %v2341_v47 = vadd.f32 %v2614_v45, %v2340_v46 }
 0xfdf   : > { %v2895_v48 = vpop.f32.mrf.mxu1 }
 0xfe0   : > { %v2346_v49 = vadd.f32 %v2341_v47, %v2157_v20 }
 0xfe1   : > { %v2343_v50 = vpop.f32.mrf.mxu1 }
 0xfe2   : > { %v2349_v51 = vsel %vm683_vm1, %v2346_v49, 0.0 }
 0xfe3   : > { %2350 = vadd.xlane.f32.xlu0 %v2349_v51  ;;  %v2896_v52 = vpop.f32.mrf.mxu1 }
0x106c   : > { %v2351_v53 = vpop.xlane.xlu0 %2350 }
0x106d   : > { %v2352_v54 = vmul.f32 0.03125, %v2351_v53 }
0x106f   : > { %v2353_v55 = vsub.f32 %v2346_v49, %v2352_v54 }
0x1071   : > { %v2354_v56 = vmul.f32 %v2353_v55, %v2353_v55 }
0x1073   : > { %v2355_v57 = vsel %vm683_vm1, %v2354_v56, 0.0 }
0x1074   : > { %2356 = vadd.xlane.f32.xlu1 %v2355_v57 }
0x10fd   : > { %v2357_v58 = vpop.xlane.xlu1 %2356 }
0x10fe   : > { %v2358_v59 = vmul.f32 0.032258064, %v2357_v58 }
0x1100   : > { %3011 = vrsqrt.f32 %v2358_v59  ;;  %vm2361_vm9 = vcmp.eq.f32.partialorder %v2358_v59, inf  ;;  %v2364_v62 = vand.u32 2147483648, %v2358_v59  ;;  %vm2363_vm10 = vcmp.eq.f32.partialorder %v2358_v59, 0.0 }
0x110d   : > { %v3012_v60 = vpop.eup %3011 }
0x110e   : > { %v2360_v61 = vmul.f32 %v3012_v60, %v2358_v59 }
0x1110   : > { %v2362_v63 = vsel %vm2361_vm9, %v2358_v59, %v2360_v61 }
0x1111   : > { %v2365_v0 = vsel %vm2363_vm10, %v2364_v62, %v2362_v63 }
0x1112   : > { %v2366_v2 = vadd.f32 1e-06, %v2365_v0 }
0x1114   : > { %3013 = vrcp.f32 %v2366_v2 }
0x1121   : > { %v3014_v3 = vpop.eup %3013 }
0x1122   : > { %v2368_v5 = vmul.f32 %v3014_v3, %v2353_v55 }
0x1124   : > { %v2375_v6 = vmul.f32 %v2623_v4, %v2368_v5 }
0x1126   : > { %v2382_v7 = vadd.f32 %v2624_v17, %v2375_v6 }
0x1128   : > { %2383 = vst.msk [vmem:[%s639_s29] sm:$0xff] %vm683_vm1, %v2382_v7 }
0x1129   : > { %3028 = shalt.err (!%p3025_p5)
}
0x112a   : > { %s3029_s4 = scalar_lea.hbm %s2397_s5, 128  ;;  %s3033_s0 = scalar_lea.hbm %s3691_s19, 256 }
0x112b   : > { %p3030_p6 = scmp.ne.s32.totalorder %s2397_s5, %s3029_s4  ;;  %p3034_p10 = scmp.lt.s32.totalorder %s2397_s5, %s3691_s19 }
0x112c   : > { %p3035_p11 = scmp.lt.s32.totalorder %s3033_s0, %s3029_s4 }
0x112d   : > { %p3031_p7 = pnand %p3030_p6, %p3237_p4 }
0x112e   : > { %p3036_p12 = por %p3035_p11, %p3034_p10 }
0x112f   : > { %p3032_p9 = pneg %p3031_p7 }
0x1131   : > { %p3037_p13 = pnand %p3036_p12, %p3032_p9 }
0x1133   : > { %3040 = shalt.err (!%p3037_p13)
}
0x1134   : > { %2897 = dma.vmem_to_hbm [thread:$0]  (%p3237_p4), %s2400_s25, 128, %s2397_s5, %s2385_s6  }
0x1135 PF: > { %s3720_s20 = sld [smem:[#allocation7_spill]]  ;;  %p2903_p0 = scmp.ge.s32.totalorder %s3091_s22, 2 }
0x1137   : > { %p2900_p1 = pnand %p2903_p0, %p3244_p8 }
0x1139   : > { %p2901_p2 = pneg %p2900_p1 }
0x113b   : > { %s2411_s24 = sand.u32 1, %s3720_s20  }
0x113c   : > { %s2412_s2 = scalar_lea.sflag [#allocation5], %s2411_s24 }
0x113d   : > { %3066 = dma.done.wait (%p2901_p2), %s2412_s2, 128  }
0x113e   : > { %3068 = vsyncadd (%p2901_p2), %s2412_s2, 4294967168  ;;  %s32_s22 = sadd.s32 1, %s3091_s22   ;;  %s3722_s21 = sld [smem:[#allocation8_spill]] }
0x113f   : > { %p29_p3 = scmp.ge.s32.totalorder %s32_s22, 4   ;;  %s3723_s20 = sld [smem:[#allocation12_spill]] }
0x1140   : > { %s3724_s3 = sld [smem:[#allocation9_spill]]  ;;  %s3726_s0 = smov %s3075_s30 }
0x1141   : > { %s3725_s1 = sld [smem:[#allocation10_spill]] }
0x1142   :  { %31 = sbr.rel (!%p29_p3) target bundleno = 12 (0xc), region = 174 }
0x1144   : > { %s3727_s30 = smov %s3722_s21 }
0x1146   : > { %s3728_s21 = smov %s3724_s3 }
0x1147   :  { %2417 = vsyncpa [#allocation5], 1 }
0x1148   :  { %2419 = vsyncpa [#allocation5 + $0x1], 1 }

</bundles_post_ra>
